<compile_context>
chip_gen: v7x
topology: tpu7x:2x2x1
jax: 0.10.0
libtpu: 0.0.40
codegen_flags: <defaults>
</compile_context>

<pallas_src>
import functools

import jax
import jax.numpy as jnp
from jax.experimental import pallas as pl
from jax.experimental.pallas import tpu as pltpu

EPS = 1e-5
NEG_SLOPE = 0.01
LANE = 128
MAX_TILE_ROWS_DEFAULT = 2048  # target TH*W rows of conv output per grid step


# --------------------------------------------------------------------------- #
# Small helpers
# --------------------------------------------------------------------------- #
def _round_up(x, m):
    return (x + m - 1) // m * m


def _pick_row_tile(h, w, max_rows):
    """Largest divisor th of h with th * w <= max_rows (falls back to 1)."""
    best = 1
    for cand in range(1, h + 1):
        if h % cand == 0 and cand * w <= max_rows:
            best = cand
    return best


def _window_rows(xp, th):
    """(N, H+2, W+2, C) -> (N*(H//th), th+2, W+2, C) overlapping row windows."""
    n, hp2, wp2, c = xp.shape
    ht = (hp2 - 2) // th
    idx = jnp.arange(ht)[:, None] * th + jnp.arange(th + 2)[None, :]
    return xp[:, idx].reshape(n * ht, th + 2, wp2, c)


def _vmem_limit_bytes(*buf_bytes):
    # Double-buffered pipeline buffers + headroom; capped below v7x's 64 MiB VMEM.
    return int(min(2 * sum(buf_bytes) + (8 << 20), 48 << 20))


# --------------------------------------------------------------------------- #
# Kernels
# --------------------------------------------------------------------------- #
def _conv_stats_kernel(*refs, th, width, ht, cpad, apply_input_act):
    """One grid step: 3x3 conv of a (th x width) output row-tile via in-kernel im2col.

    Inputs (VMEM refs):
      x_ref     : (th+2, width+2, cin_p)  haloed row-window of the padded input
      w_ref     : (3, 3, cin_p, cpad)     conv weights (bf16)
      scale_ref : (1, 1, cin_p) \  only when apply_input_act: folded BN scale/shift
      shift_ref : (1, 1, cin_p) /  of the *previous* block (fused pre-activation)
    Outputs:
      y_ref     : (th, width, cpad)       raw conv output (f32, pre-BN)
      stats_ref : (8, cpad)               row 0 = sum, row 1 = sum of squares
    """
    if apply_input_act:
        x_ref, w_ref, scale_ref, shift_ref, y_ref, stats_ref = refs
    else:
        x_ref, w_ref, y_ref, stats_ref = refs

    if apply_input_act:
        # Fused BatchNorm + LeakyReLU of the previous block, applied on load.
        a = x_ref[...].astype(jnp.float32) * scale_ref[...] + shift_ref[...]
        a = jnp.where(a >= 0, a, NEG_SLOPE * a)
        # Re-zero the conv padding border: the activation of a zero-padded entry
        # is not zero, but this conv must see zero padding.
        h = pl.program_id(0) % ht
        rows = jax.lax.broadcasted_iota(jnp.int32, a.shape, 0)
        cols = jax.lax.broadcasted_iota(jnp.int32, a.shape, 1)
        inside = (cols >= 1) & (cols <= width)
        inside &= (rows >= 1) | (h > 0)
        inside &= (rows <= th) | (h < ht - 1)
        xb = jnp.where(inside, a, 0.0).astype(jnp.bfloat16)
    else:
        xb = x_ref[...].astype(jnp.bfloat16)

    # 3x3 conv as nine shifted (th*width, cin_p) x (cin_p, cpad) MXU matmuls.
    acc = jnp.zeros((th * width, cpad), jnp.float32)
    for dy in range(3):
        for dx in range(3):
            patch = xb[dy:dy + th, dx:dx + width, :].reshape(th * width, -1)
            acc = acc + jnp.dot(patch, w_ref[dy, dx],
                                preferred_element_type=jnp.float32)

    y_ref[...] = acc.reshape(th, width, cpad)

    # Single-pass BatchNorm partials for this tile.
    s = jnp.sum(acc, axis=0, keepdims=True)
    sq = jnp.sum(acc * acc, axis=0, keepdims=True)
    stats_ref[...] = jnp.concatenate(
        [s, sq, jnp.zeros((6, cpad), jnp.float32)], axis=0)


def _bn_act_kernel(y_ref, scale_ref, shift_ref, o_ref):
    """Final BatchNorm (folded scale/shift) + LeakyReLU, elementwise."""
    a = y_ref[...] * scale_ref[...] + shift_ref[...]
    o_ref[...] = jnp.where(a >= 0, a, NEG_SLOPE * a)


# --------------------------------------------------------------------------- #
# pallas_call wrappers
# --------------------------------------------------------------------------- #
def _conv_stats_call(xw, w, scale, shift, *, th, ht, width, cpad,
                     apply_input_act):
    g = xw.shape[0]
    cin_p = xw.shape[-1]
    kernel = functools.partial(_conv_stats_kernel, th=th, width=width, ht=ht,
                               cpad=cpad, apply_input_act=apply_input_act)
    in_specs = [
        pl.BlockSpec((None, th + 2, width + 2, cin_p), lambda i: (i, 0, 0, 0)),
        pl.BlockSpec((3, 3, cin_p, cpad), lambda i: (0, 0, 0, 0)),
    ]
    operands = [xw, w]
    if apply_input_act:
        in_specs.append(pl.BlockSpec((1, 1, cin_p), lambda i: (0, 0, 0)))
        in_specs.append(pl.BlockSpec((1, 1, cin_p), lambda i: (0, 0, 0)))
        operands += [scale, shift]
    out_specs = (
        pl.BlockSpec((None, th, width, cpad), lambda i: (i, 0, 0, 0)),
        pl.BlockSpec((None, 8, cpad), lambda i: (i, 0, 0)),
    )
    out_shape = (
        jax.ShapeDtypeStruct((g, th, width, cpad), jnp.float32),
        jax.ShapeDtypeStruct((g, 8, cpad), jnp.float32),
    )
    vmem = _vmem_limit_bytes(
        (th + 2) * (width + 2) * cin_p * xw.dtype.itemsize,  # input tile
        9 * cin_p * cpad * 2,                                # weights (bf16)
        th * width * cpad * 4,                               # output tile
        8 * cpad * 4,                                        # stats tile
        th * width * cpad * 4,                               # f32 accumulator
    )
    return pl.pallas_call(
        kernel,
        grid=(g,),
        in_specs=in_specs,
        out_specs=out_specs,
        out_shape=out_shape,
        compiler_params=pltpu.CompilerParams(
            dimension_semantics=("parallel",),
            vmem_limit_bytes=vmem,
        ),
    )(*operands)


def _bn_act_call(y, scale, shift):
    g, th, width, cpad = y.shape
    vmem = _vmem_limit_bytes(th * width * cpad * 4, th * width * cpad * 4)
    return pl.pallas_call(
        _bn_act_kernel,
        grid=(g,),
        in_specs=[
            pl.BlockSpec((None, th, width, cpad), lambda i: (i, 0, 0, 0)),
            pl.BlockSpec((1, 1, cpad), lambda i: (0, 0, 0)),
            pl.BlockSpec((1, 1, cpad), lambda i: (0, 0, 0)),
        ],
        out_specs=pl.BlockSpec((None, th, width, cpad),
                               lambda i: (i, 0, 0, 0)),
        out_shape=jax.ShapeDtypeStruct((g, th, width, cpad), jnp.float32),
        compiler_params=pltpu.CompilerParams(
            dimension_semantics=("parallel",),
            vmem_limit_bytes=vmem,
        ),
    )(y, scale, shift)


def _bn_scale_shift(stats, gamma, beta, cpad, count):
    """Fold batch-stat BatchNorm into per-channel scale/shift of shape (1,1,cpad)."""
    s = jnp.sum(stats[:, 0, :], axis=0)
    sq = jnp.sum(stats[:, 1, :], axis=0)
    mean = s / count
    var = jnp.maximum(sq / count - mean * mean, 0.0)  # single-pass (biased) var
    g = jnp.pad(gamma.astype(jnp.float32), (0, cpad - gamma.shape[0]))
    b = jnp.pad(beta.astype(jnp.float32), (0, cpad - beta.shape[0]))
    scale = g * jax.lax.rsqrt(var + EPS)
    shift = b - mean * scale
    return scale.reshape(1, 1, cpad), shift.reshape(1, 1, cpad)


# --------------------------------------------------------------------------- #
# Public forward
# --------------------------------------------------------------------------- #
def first_conv_forward(x_nchw, params, max_tile_rows=MAX_TILE_ROWS_DEFAULT):
    """FirstConv forward pass. Input/output are NCHW float32 (PyTorch layout)."""
    n, cin, h, w = x_nchw.shape
    cmid = params["w1"].shape[-1]
    cout = params["w2"].shape[-1]

    cin_p = _round_up(cin, 16)
    cmid_p = _round_up(cmid, LANE)
    cout_p = _round_up(cout, LANE)
    th = _pick_row_tile(h, w, max_tile_rows)
    ht = h // th
    count = n * h * w

    x = jnp.transpose(x_nchw, (0, 2, 3, 1)).astype(jnp.float32)  # NHWC

    # ---------- Block 1: conv(cin -> cmid), emit BN partial stats ----------
    xp = jnp.pad(x, ((0, 0), (1, 1), (1, 1), (0, cin_p - cin)))
    xw = _window_rows(xp.astype(jnp.bfloat16), th)       # (G, th+2, W+2, cin_p)
    w1 = jnp.pad(params["w1"],
                 ((0, 0), (0, 0), (0, cin_p - cin), (0, cmid_p - cmid))
                 ).astype(jnp.bfloat16)
    # Conv bias intentionally dropped: it cancels exactly under batch-stat BN.
    y1, stats1 = _conv_stats_call(xw, w1, None, None, th=th, ht=ht, width=w,
                                  cpad=cmid_p, apply_input_act=False)
    scale1, shift1 = _bn_scale_shift(stats1, params["g1"], params["be1"],
                                     cmid_p, count)

    # ---- Block 2: fused [BN1 + LeakyReLU] -> conv(cmid -> cout) + stats ----
    y1 = y1.reshape(n, h, w, cmid_p)
    y1w = _window_rows(jnp.pad(y1, ((0, 0), (1, 1), (1, 1), (0, 0))), th)
    w2 = jnp.pad(params["w2"],
                 ((0, 0), (0, 0), (0, cmid_p - cmid), (0, cout_p - cout))
                 ).astype(jnp.bfloat16)
    y2, stats2 = _conv_stats_call(y1w, w2, scale1, shift1, th=th, ht=ht,
                                  width=w, cpad=cout_p, apply_input_act=True)
    scale2, shift2 = _bn_scale_shift(stats2, params["g2"], params["be2"],
                                     cout_p, count)

    # ---------- Final BN2 + LeakyReLU ----------
    out = _bn_act_call(y2, scale2, shift2)                # (G, th, W, cout_p)
    out = out.reshape(n, h, w, cout_p)[..., :cout]
    return jnp.transpose(out, (0, 3, 1, 2))               # NCHW


# --------------------------------------------------------------------------- #
# Params and reference
# --------------------------------------------------------------------------- #
def init_params(key, in_channels, out_channels, mid_channels=None):
    if not mid_channels:
        mid_channels = out_channels
    k1, k2, k3, k4 = jax.random.split(key, 4)
    # Conv weights stored as (3, 3, Cin, Cout) HWIO; BN gamma=1, beta=0.
    return {
        "w1": 0.1 * jax.random.normal(k1, (3, 3, in_channels, mid_channels),
                                      jnp.float32),
        "b1": 0.1 * jax.random.normal(k2, (mid_channels,), jnp.float32),
        "g1": jnp.ones((mid_channels,), jnp.float32),
        "be1": jnp.zeros((mid_channels,), jnp.float32),
        "w2": 0.1 * jax.random.normal(k3, (3, 3, mid_channels, out_channels),
                                      jnp.float32),
        "b2": 0.1 * jax.random.normal(k4, (out_channels,), jnp.float32),
        "g2": jnp.ones((out_channels,), jnp.float32),
        "be2": jnp.zeros((out_channels,), jnp.float32),
    }


def _reference_forward(x_nchw, params):
    """Pure-JAX reference at matched precision (bf16-rounded conv operands,
    f32 accumulation / BN / LeakyReLU), including the conv bias (which cancels
    under batch-stat BatchNorm)."""
    def block(x, w, b, g, be):
        xb = x.astype(jnp.bfloat16).astype(jnp.float32)
        wb = w.astype(jnp.bfloat16).astype(jnp.float32)
        y = jax.lax.conv_general_dilated(
            xb, wb, window_strides=(1, 1), padding=((1, 1), (1, 1)),
            dimension_numbers=("NCHW", "HWIO", "NCHW"),
        ) + b[None, :, None, None]
        mean = jnp.mean(y, axis=(0, 2, 3), keepdims=True)
        var = jnp.mean((y - mean) ** 2, axis=(0, 2, 3), keepdims=True)
        y = (y - mean) * jax.lax.rsqrt(var + EPS)
        y = y * g[None, :, None, None] + be[None, :, None, None]
        return jnp.where(y >= 0, y, NEG_SLOPE * y)

    y = block(x_nchw, params["w1"], params["b1"], params["g1"], params["be1"])
    return block(y, params["w2"], params["b2"], params["g2"], params["be2"])


if __name__ == "__main__":
    key = jax.random.PRNGKey(0)
    kx, kp = jax.random.split(key)

    N, Cin, H, W = 2, 4, 16, 16
    Cout = 8
    x = jax.random.normal(kx, (N, Cin, H, W), jnp.float32)
    params = init_params(kp, Cin, Cout)

    # max_tile_rows=128 forces two row tiles per image -> exercises the halo /
    # border-masking path (default 2048 keeps tiles large for real shapes).
    fwd = jax.jit(functools.partial(first_conv_forward, max_tile_rows=128))
    out = jax.block_until_ready(fwd(x, params))
    assert out.shape == (N, Cout, H, W), out.shape

    ref = _reference_forward(x, params)
    err = float(jnp.max(jnp.abs(out - ref)))
    assert err < 2e-2, err

    print("KERNEL_OK")
</pallas_src>

<mosaic_0001>
module attributes {stable_mosaic.version = 11 : i64} {
  func.func @_conv_stats_kernel(%arg0: i32, %arg1: memref<1x10x18x16xbf16, #tpu.memory_space<vmem>>, %arg2: memref<3x3x16x128xbf16, #tpu.memory_space<vmem>>, %arg3: memref<1x8x16x128xf32, #tpu.memory_space<vmem>>, %arg4: memref<1x8x128xf32, #tpu.memory_space<vmem>>) attributes {dimension_semantics = [#tpu.dimension_semantics<parallel>], iteration_bounds = array<i64: 4>, scalar_prefetch = 0 : i64, scratch_operands = 0 : i64, tpu.core_type = #tpu.core_type<tc>, window_params = [{transform_indices = @transform_0, window_bounds = array<i64: 1, 10, 18, 16>}, {pipeline_mode = #tpu.pipeline_mode<synchronous>, transform_indices = @transform_1, window_bounds = array<i64: 3, 3, 16, 128>}, {transform_indices = @transform_2, window_bounds = array<i64: 1, 8, 16, 128>}, {transform_indices = @transform_3, window_bounds = array<i64: 1, 8, 128>}]} {
    %c0 = arith.constant 0 : index
    %c0_0 = arith.constant 0 : index
    %c0_1 = arith.constant 0 : index
    %c0_2 = arith.constant 0 : index
    %0 = vector.load %arg1[%c0, %c0_0, %c0_1, %c0_2] : memref<1x10x18x16xbf16, #tpu.memory_space<vmem>>, vector<1x10x18x16xbf16>
    %1 = vector.shape_cast %0 : vector<1x10x18x16xbf16> to vector<10x18x16xbf16>
    %cst = arith.constant 0.000000e+00 : f32
    %2 = vector.broadcast %cst : f32 to vector<128x128xf32>
    %3 = vector.extract_strided_slice %1 {offsets = [0, 0, 0], sizes = [8, 16, 16], strides = [1, 1, 1]} : vector<10x18x16xbf16> to vector<8x16x16xbf16>
    %4 = vector.shape_cast %3 : vector<8x16x16xbf16> to vector<128x16xbf16>
    %c0_3 = arith.constant 0 : index
    %c0_4 = arith.constant 0 : index
    %c0_5 = arith.constant 0 : index
    %c0_6 = arith.constant 0 : index
    %5 = vector.load %arg2[%c0_3, %c0_4, %c0_5, %c0_6] : memref<3x3x16x128xbf16, #tpu.memory_space<vmem>>, vector<1x1x16x128xbf16>
    %6 = vector.shape_cast %5 : vector<1x1x16x128xbf16> to vector<16x128xbf16>
    %cst_7 = arith.constant dense<0.000000e+00> : vector<128x128xf32>
    %7 = tpu.matmul %4, %6, %cst_7 {dimension_numbers = #tpu.dot_dimension_numbers<[1], [0], [0], [1], [0, 0, 1, 1], [], []>} : vector<128x16xbf16>, vector<16x128xbf16>, vector<128x128xf32> -> vector<128x128xf32>
    %8 = arith.addf %2, %7 : vector<128x128xf32>
    %9 = vector.extract_strided_slice %1 {offsets = [0, 1, 0], sizes = [8, 16, 16], strides = [1, 1, 1]} : vector<10x18x16xbf16> to vector<8x16x16xbf16>
    %10 = vector.shape_cast %9 : vector<8x16x16xbf16> to vector<128x16xbf16>
    %c0_8 = arith.constant 0 : index
    %c1 = arith.constant 1 : index
    %c0_9 = arith.constant 0 : index
    %c0_10 = arith.constant 0 : index
    %11 = vector.load %arg2[%c0_8, %c1, %c0_9, %c0_10] : memref<3x3x16x128xbf16, #tpu.memory_space<vmem>>, vector<1x1x16x128xbf16>
    %12 = vector.shape_cast %11 : vector<1x1x16x128xbf16> to vector<16x128xbf16>
    %cst_11 = arith.constant dense<0.000000e+00> : vector<128x128xf32>
    %13 = tpu.matmul %10, %12, %cst_11 {dimension_numbers = #tpu.dot_dimension_numbers<[1], [0], [0], [1], [0, 0, 1, 1], [], []>} : vector<128x16xbf16>, vector<16x128xbf16>, vector<128x128xf32> -> vector<128x128xf32>
    %14 = arith.addf %8, %13 : vector<128x128xf32>
    %15 = vector.extract_strided_slice %1 {offsets = [0, 2, 0], sizes = [8, 16, 16], strides = [1, 1, 1]} : vector<10x18x16xbf16> to vector<8x16x16xbf16>
    %16 = vector.shape_cast %15 : vector<8x16x16xbf16> to vector<128x16xbf16>
    %c0_12 = arith.constant 0 : index
    %c2 = arith.constant 2 : index
    %c0_13 = arith.constant 0 : index
    %c0_14 = arith.constant 0 : index
    %17 = vector.load %arg2[%c0_12, %c2, %c0_13, %c0_14] : memref<3x3x16x128xbf16, #tpu.memory_space<vmem>>, vector<1x1x16x128xbf16>
    %18 = vector.shape_cast %17 : vector<1x1x16x128xbf16> to vector<16x128xbf16>
    %cst_15 = arith.constant dense<0.000000e+00> : vector<128x128xf32>
    %19 = tpu.matmul %16, %18, %cst_15 {dimension_numbers = #tpu.dot_dimension_numbers<[1], [0], [0], [1], [0, 0, 1, 1], [], []>} : vector<128x16xbf16>, vector<16x128xbf16>, vector<128x128xf32> -> vector<128x128xf32>
    %20 = arith.addf %14, %19 : vector<128x128xf32>
    %21 = vector.extract_strided_slice %1 {offsets = [1, 0, 0], sizes = [8, 16, 16], strides = [1, 1, 1]} : vector<10x18x16xbf16> to vector<8x16x16xbf16>
    %22 = vector.shape_cast %21 : vector<8x16x16xbf16> to vector<128x16xbf16>
    %c1_16 = arith.constant 1 : index
    %c0_17 = arith.constant 0 : index
    %c0_18 = arith.constant 0 : index
    %c0_19 = arith.constant 0 : index
    %23 = vector.load %arg2[%c1_16, %c0_17, %c0_18, %c0_19] : memref<3x3x16x128xbf16, #tpu.memory_space<vmem>>, vector<1x1x16x128xbf16>
    %24 = vector.shape_cast %23 : vector<1x1x16x128xbf16> to vector<16x128xbf16>
    %cst_20 = arith.constant dense<0.000000e+00> : vector<128x128xf32>
    %25 = tpu.matmul %22, %24, %cst_20 {dimension_numbers = #tpu.dot_dimension_numbers<[1], [0], [0], [1], [0, 0, 1, 1], [], []>} : vector<128x16xbf16>, vector<16x128xbf16>, vector<128x128xf32> -> vector<128x128xf32>
    %26 = arith.addf %20, %25 : vector<128x128xf32>
    %27 = vector.extract_strided_slice %1 {offsets = [1, 1, 0], sizes = [8, 16, 16], strides = [1, 1, 1]} : vector<10x18x16xbf16> to vector<8x16x16xbf16>
    %28 = vector.shape_cast %27 : vector<8x16x16xbf16> to vector<128x16xbf16>
    %c1_21 = arith.constant 1 : index
    %c1_22 = arith.constant 1 : index
    %c0_23 = arith.constant 0 : index
    %c0_24 = arith.constant 0 : index
    %29 = vector.load %arg2[%c1_21, %c1_22, %c0_23, %c0_24] : memref<3x3x16x128xbf16, #tpu.memory_space<vmem>>, vector<1x1x16x128xbf16>
    %30 = vector.shape_cast %29 : vector<1x1x16x128xbf16> to vector<16x128xbf16>
    %cst_25 = arith.constant dense<0.000000e+00> : vector<128x128xf32>
    %31 = tpu.matmul %28, %30, %cst_25 {dimension_numbers = #tpu.dot_dimension_numbers<[1], [0], [0], [1], [0, 0, 1, 1], [], []>} : vector<128x16xbf16>, vector<16x128xbf16>, vector<128x128xf32> -> vector<128x128xf32>
    %32 = arith.addf %26, %31 : vector<128x128xf32>
    %33 = vector.extract_strided_slice %1 {offsets = [1, 2, 0], sizes = [8, 16, 16], strides = [1, 1, 1]} : vector<10x18x16xbf16> to vector<8x16x16xbf16>
    %34 = vector.shape_cast %33 : vector<8x16x16xbf16> to vector<128x16xbf16>
    %c1_26 = arith.constant 1 : index
    %c2_27 = arith.constant 2 : index
    %c0_28 = arith.constant 0 : index
    %c0_29 = arith.constant 0 : index
    %35 = vector.load %arg2[%c1_26, %c2_27, %c0_28, %c0_29] : memref<3x3x16x128xbf16, #tpu.memory_space<vmem>>, vector<1x1x16x128xbf16>
    %36 = vector.shape_cast %35 : vector<1x1x16x128xbf16> to vector<16x128xbf16>
    %cst_30 = arith.constant dense<0.000000e+00> : vector<128x128xf32>
    %37 = tpu.matmul %34, %36, %cst_30 {dimension_numbers = #tpu.dot_dimension_numbers<[1], [0], [0], [1], [0, 0, 1, 1], [], []>} : vector<128x16xbf16>, vector<16x128xbf16>, vector<128x128xf32> -> vector<128x128xf32>
    %38 = arith.addf %32, %37 : vector<128x128xf32>
    %39 = vector.extract_strided_slice %1 {offsets = [2, 0, 0], sizes = [8, 16, 16], strides = [1, 1, 1]} : vector<10x18x16xbf16> to vector<8x16x16xbf16>
    %40 = vector.shape_cast %39 : vector<8x16x16xbf16> to vector<128x16xbf16>
    %c2_31 = arith.constant 2 : index
    %c0_32 = arith.constant 0 : index
    %c0_33 = arith.constant 0 : index
    %c0_34 = arith.constant 0 : index
    %41 = vector.load %arg2[%c2_31, %c0_32, %c0_33, %c0_34] : memref<3x3x16x128xbf16, #tpu.memory_space<vmem>>, vector<1x1x16x128xbf16>
    %42 = vector.shape_cast %41 : vector<1x1x16x128xbf16> to vector<16x128xbf16>
    %cst_35 = arith.constant dense<0.000000e+00> : vector<128x128xf32>
    %43 = tpu.matmul %40, %42, %cst_35 {dimension_numbers = #tpu.dot_dimension_numbers<[1], [0], [0], [1], [0, 0, 1, 1], [], []>} : vector<128x16xbf16>, vector<16x128xbf16>, vector<128x128xf32> -> vector<128x128xf32>
    %44 = arith.addf %38, %43 : vector<128x128xf32>
    %45 = vector.extract_strided_slice %1 {offsets = [2, 1, 0], sizes = [8, 16, 16], strides = [1, 1, 1]} : vector<10x18x16xbf16> to vector<8x16x16xbf16>
    %46 = vector.shape_cast %45 : vector<8x16x16xbf16> to vector<128x16xbf16>
    %c2_36 = arith.constant 2 : index
    %c1_37 = arith.constant 1 : index
    %c0_38 = arith.constant 0 : index
    %c0_39 = arith.constant 0 : index
    %47 = vector.load %arg2[%c2_36, %c1_37, %c0_38, %c0_39] : memref<3x3x16x128xbf16, #tpu.memory_space<vmem>>, vector<1x1x16x128xbf16>
    %48 = vector.shape_cast %47 : vector<1x1x16x128xbf16> to vector<16x128xbf16>
    %cst_40 = arith.constant dense<0.000000e+00> : vector<128x128xf32>
    %49 = tpu.matmul %46, %48, %cst_40 {dimension_numbers = #tpu.dot_dimension_numbers<[1], [0], [0], [1], [0, 0, 1, 1], [], []>} : vector<128x16xbf16>, vector<16x128xbf16>, vector<128x128xf32> -> vector<128x128xf32>
    %50 = arith.addf %44, %49 : vector<128x128xf32>
    %51 = vector.extract_strided_slice %1 {offsets = [2, 2, 0], sizes = [8, 16, 16], strides = [1, 1, 1]} : vector<10x18x16xbf16> to vector<8x16x16xbf16>
    %52 = vector.shape_cast %51 : vector<8x16x16xbf16> to vector<128x16xbf16>
    %c2_41 = arith.constant 2 : index
    %c2_42 = arith.constant 2 : index
    %c0_43 = arith.constant 0 : index
    %c0_44 = arith.constant 0 : index
    %53 = vector.load %arg2[%c2_41, %c2_42, %c0_43, %c0_44] : memref<3x3x16x128xbf16, #tpu.memory_space<vmem>>, vector<1x1x16x128xbf16>
    %54 = vector.shape_cast %53 : vector<1x1x16x128xbf16> to vector<16x128xbf16>
    %cst_45 = arith.constant dense<0.000000e+00> : vector<128x128xf32>
    %55 = tpu.matmul %52, %54, %cst_45 {dimension_numbers = #tpu.dot_dimension_numbers<[1], [0], [0], [1], [0, 0, 1, 1], [], []>} : vector<128x16xbf16>, vector<16x128xbf16>, vector<128x128xf32> -> vector<128x128xf32>
    %56 = arith.addf %50, %55 : vector<128x128xf32>
    %57 = vector.shape_cast %56 : vector<128x128xf32> to vector<8x16x128xf32>
    %c0_46 = arith.constant 0 : index
    %c0_47 = arith.constant 0 : index
    %c0_48 = arith.constant 0 : index
    %c0_49 = arith.constant 0 : index
    %58 = vector.load %arg3[%c0_46, %c0_47, %c0_48, %c0_49] : memref<1x8x16x128xf32, #tpu.memory_space<vmem>>, vector<1x8x16x128xf32>
    %59 = vector.shape_cast %58 : vector<1x8x16x128xf32> to vector<8x16x128xf32>
    %60 = vector.shape_cast %57 : vector<8x16x128xf32> to vector<1x8x16x128xf32>
    tpu.vector_store %arg3[%c0_46, %c0_47, %c0_48, %c0_49], %60 {strides = array<i32>} : memref<1x8x16x128xf32, #tpu.memory_space<vmem>>, vector<1x8x16x128xf32>,
    %cst_50 = arith.constant dense<0.000000e+00> : vector<128xf32>
    %61 = vector.multi_reduction <add>, %56, %cst_50 [0] : vector<128x128xf32> to vector<128xf32>
    %62 = vector.shape_cast %61 : vector<128xf32> to vector<1x128xf32>
    %63 = arith.mulf %56, %56 : vector<128x128xf32>
    %cst_51 = arith.constant dense<0.000000e+00> : vector<128xf32>
    %64 = vector.multi_reduction <add>, %63, %cst_51 [0] : vector<128x128xf32> to vector<128xf32>
    %65 = vector.shape_cast %64 : vector<128xf32> to vector<1x128xf32>
    %cst_52 = arith.constant 0.000000e+00 : f32
    %66 = vector.broadcast %cst_52 : f32 to vector<6x128xf32>
    %67 = tpu.concatenate %62, %65, %66 in 0 : vector<1x128xf32>, vector<1x128xf32>, vector<6x128xf32> -> vector<8x128xf32>
    %c0_53 = arith.constant 0 : index
    %c0_54 = arith.constant 0 : index
    %c0_55 = arith.constant 0 : index
    %68 = vector.load %arg4[%c0_53, %c0_54, %c0_55] : memref<1x8x128xf32, #tpu.memory_space<vmem>>, vector<1x8x128xf32>
    %69 = vector.shape_cast %68 : vector<1x8x128xf32> to vector<8x128xf32>
    %70 = vector.shape_cast %67 : vector<8x128xf32> to vector<1x8x128xf32>
    tpu.vector_store %arg4[%c0_53, %c0_54, %c0_55], %70 {strides = array<i32>} : memref<1x8x128xf32, #tpu.memory_space<vmem>>, vector<1x8x128xf32>,
    return
  }
  func.func @transform_0(%arg0: i32) -> (i32, i32, i32, i32) {
    %c0_i32 = arith.constant 0 : i32
    %c0_i32_0 = arith.constant 0 : i32
    %c0_i32_1 = arith.constant 0 : i32
    %c0_i32_2 = arith.constant 0 : i32
    return %arg0, %c0_i32, %c0_i32_0, %c0_i32_1 : i32, i32, i32, i32
  }
  func.func @transform_1(%arg0: i32) -> (i32, i32, i32, i32) {
    %c0_i32 = arith.constant 0 : i32
    %c0_i32_0 = arith.constant 0 : i32
    %c0_i32_1 = arith.constant 0 : i32
    %c0_i32_2 = arith.constant 0 : i32
    %c0_i32_3 = arith.constant 0 : i32
    return %c0_i32, %c0_i32_0, %c0_i32_1, %c0_i32_2 : i32, i32, i32, i32
  }
  func.func @transform_2(%arg0: i32) -> (i32, i32, i32, i32) {
    %c0_i32 = arith.constant 0 : i32
    %c0_i32_0 = arith.constant 0 : i32
    %c0_i32_1 = arith.constant 0 : i32
    %c0_i32_2 = arith.constant 0 : i32
    return %arg0, %c0_i32, %c0_i32_0, %c0_i32_1 : i32, i32, i32, i32
  }
  func.func @transform_3(%arg0: i32) -> (i32, i32, i32) {
    %c0_i32 = arith.constant 0 : i32
    %c0_i32_0 = arith.constant 0 : i32
    %c0_i32_1 = arith.constant 0 : i32
    return %arg0, %c0_i32, %c0_i32_0 : i32, i32, i32
  }
}

module attributes {stable_mosaic.version = 11 : i64} {
  func.func @_conv_stats_kernel(%arg0: i32, %arg1: memref<1x10x18x128xf32, #tpu.memory_space<vmem>>, %arg2: memref<3x3x128x128xbf16, #tpu.memory_space<vmem>>, %arg3: memref<1x1x128xf32, #tpu.memory_space<vmem>>, %arg4: memref<1x1x128xf32, #tpu.memory_space<vmem>>, %arg5: memref<1x8x16x128xf32, #tpu.memory_space<vmem>>, %arg6: memref<1x8x128xf32, #tpu.memory_space<vmem>>) attributes {dimension_semantics = [#tpu.dimension_semantics<parallel>], iteration_bounds = array<i64: 4>, scalar_prefetch = 0 : i64, scratch_operands = 0 : i64, tpu.core_type = #tpu.core_type<tc>, window_params = [{transform_indices = @transform_0, window_bounds = array<i64: 1, 10, 18, 128>}, {pipeline_mode = #tpu.pipeline_mode<synchronous>, transform_indices = @transform_1, window_bounds = array<i64: 3, 3, 128, 128>}, {pipeline_mode = #tpu.pipeline_mode<synchronous>, transform_indices = @transform_2, window_bounds = array<i64: 1, 1, 128>}, {pipeline_mode = #tpu.pipeline_mode<synchronous>, transform_indices = @transform_3, window_bounds = array<i64: 1, 1, 128>}, {transform_indices = @transform_4, window_bounds = array<i64: 1, 8, 16, 128>}, {transform_indices = @transform_5, window_bounds = array<i64: 1, 8, 128>}]} {
    %c0 = arith.constant 0 : index
    %c0_0 = arith.constant 0 : index
    %c0_1 = arith.constant 0 : index
    %c0_2 = arith.constant 0 : index
    %0 = vector.load %arg1[%c0, %c0_0, %c0_1, %c0_2] : memref<1x10x18x128xf32, #tpu.memory_space<vmem>>, vector<1x10x18x128xf32>
    %1 = vector.shape_cast %0 : vector<1x10x18x128xf32> to vector<10x18x128xf32>
    %c0_3 = arith.constant 0 : index
    %c0_4 = arith.constant 0 : index
    %c0_5 = arith.constant 0 : index
    %2 = vector.load %arg3[%c0_3, %c0_4, %c0_5] : memref<1x1x128xf32, #tpu.memory_space<vmem>>, vector<1x1x128xf32>
    %3 = vector.broadcast %2 : vector<1x1x128xf32> to vector<10x18x128xf32>
    %4 = arith.mulf %1, %3 : vector<10x18x128xf32>
    %c0_6 = arith.constant 0 : index
    %c0_7 = arith.constant 0 : index
    %c0_8 = arith.constant 0 : index
    %5 = vector.load %arg4[%c0_6, %c0_7, %c0_8] : memref<1x1x128xf32, #tpu.memory_space<vmem>>, vector<1x1x128xf32>
    %6 = vector.broadcast %5 : vector<1x1x128xf32> to vector<10x18x128xf32>
    %7 = arith.addf %4, %6 : vector<10x18x128xf32>
    %cst = arith.constant 0.000000e+00 : f32
    %8 = vector.broadcast %cst : f32 to vector<10x18x128xf32>
    %9 = arith.cmpf oge, %7, %8 : vector<10x18x128xf32>
    %cst_9 = arith.constant 0.00999999977 : f32
    %10 = vector.broadcast %cst_9 : f32 to vector<10x18x128xf32>
    %11 = arith.mulf %10, %7 : vector<10x18x128xf32>
    %12 = arith.select %9, %7, %11 : vector<10x18x128xi1>, vector<10x18x128xf32>
    %c2_i32 = arith.constant 2 : i32
    %c0_i32 = arith.constant 0 : i32
    %13 = arith.cmpi eq, %c2_i32, %c0_i32 : i32
    %c1_i32 = arith.constant 1 : i32
    %14 = arith.select %13, %c1_i32, %c2_i32 : i32
    %15 = arith.remsi %arg0, %14 : i32
    %c0_i32_10 = arith.constant 0 : i32
    %16 = arith.cmpi ne, %15, %c0_i32_10 : i32
    %c0_i32_11 = arith.constant 0 : i32
    %17 = arith.cmpi slt, %15, %c0_i32_11 : i32
    %c0_i32_12 = arith.constant 0 : i32
    %18 = arith.cmpi slt, %14, %c0_i32_12 : i32
    %19 = arith.xori %17, %18 : i1
    %20 = arith.andi %19, %16 : i1
    %21 = arith.addi %15, %14 : i32
    %22 = arith.select %20, %21, %15 : i32
    %23 = tpu.iota {dimensions = array<i32: 0>} : vector<10x18x128xi32>
    %24 = tpu.iota {dimensions = array<i32: 1>} : vector<10x18x128xi32>
    %c1_i32_13 = arith.constant 1 : i32
    %25 = vector.broadcast %c1_i32_13 : i32 to vector<10x18x128xi32>
    %26 = arith.cmpi sge, %24, %25 : vector<10x18x128xi32>
    %c16_i32 = arith.constant 16 : i32
    %27 = vector.broadcast %c16_i32 : i32 to vector<10x18x128xi32>
    %28 = arith.cmpi sle, %24, %27 : vector<10x18x128xi32>
    %29 = arith.andi %26, %28 : vector<10x18x128xi1>
    %c1_i32_14 = arith.constant 1 : i32
    %30 = vector.broadcast %c1_i32_14 : i32 to vector<10x18x128xi32>
    %31 = arith.cmpi sge, %23, %30 : vector<10x18x128xi32>
    %c0_i32_15 = arith.constant 0 : i32
    %32 = arith.cmpi sgt, %22, %c0_i32_15 : i32
    %33 = vector.broadcast %32 : i1 to vector<10x18x128xi1>
    %34 = arith.ori %31, %33 : vector<10x18x128xi1>
    %35 = arith.andi %29, %34 : vector<10x18x128xi1>
    %c8_i32 = arith.constant 8 : i32
    %36 = vector.broadcast %c8_i32 : i32 to vector<10x18x128xi32>
    %37 = arith.cmpi sle, %23, %36 : vector<10x18x128xi32>
    %c1_i32_16 = arith.constant 1 : i32
    %38 = arith.cmpi slt, %22, %c1_i32_16 : i32
    %39 = vector.broadcast %38 : i1 to vector<10x18x128xi1>
    %40 = arith.ori %37, %39 : vector<10x18x128xi1>
    %41 = arith.andi %35, %40 : vector<10x18x128xi1>
    %cst_17 = arith.constant 0.000000e+00 : f32
    %42 = vector.broadcast %cst_17 : f32 to vector<10x18x128xf32>
    %43 = arith.select %41, %12, %42 : vector<10x18x128xi1>, vector<10x18x128xf32>
    %44 = arith.truncf %43 : vector<10x18x128xf32> to vector<10x18x128xbf16>
    %cst_18 = arith.constant 0.000000e+00 : f32
    %45 = vector.broadcast %cst_18 : f32 to vector<128x128xf32>
    %46 = vector.extract_strided_slice %44 {offsets = [0, 0, 0], sizes = [8, 16, 128], strides = [1, 1, 1]} : vector<10x18x128xbf16> to vector<8x16x128xbf16>
    %47 = vector.shape_cast %46 : vector<8x16x128xbf16> to vector<128x128xbf16>
    %c0_19 = arith.constant 0 : index
    %c0_20 = arith.constant 0 : index
    %c0_21 = arith.constant 0 : index
    %c0_22 = arith.constant 0 : index
    %48 = vector.load %arg2[%c0_19, %c0_20, %c0_21, %c0_22] : memref<3x3x128x128xbf16, #tpu.memory_space<vmem>>, vector<1x1x128x128xbf16>
    %49 = vector.shape_cast %48 : vector<1x1x128x128xbf16> to vector<128x128xbf16>
    %cst_23 = arith.constant dense<0.000000e+00> : vector<128x128xf32>
    %50 = tpu.matmul %47, %49, %cst_23 {dimension_numbers = #tpu.dot_dimension_numbers<[1], [0], [0], [1], [0, 0, 1, 1], [], []>} : vector<128x128xbf16>, vector<128x128xbf16>, vector<128x128xf32> -> vector<128x128xf32>
    %51 = arith.addf %45, %50 : vector<128x128xf32>
    %52 = vector.extract_strided_slice %44 {offsets = [0, 1, 0], sizes = [8, 16, 128], strides = [1, 1, 1]} : vector<10x18x128xbf16> to vector<8x16x128xbf16>
    %53 = vector.shape_cast %52 : vector<8x16x128xbf16> to vector<128x128xbf16>
    %c0_24 = arith.constant 0 : index
    %c1 = arith.constant 1 : index
    %c0_25 = arith.constant 0 : index
    %c0_26 = arith.constant 0 : index
    %54 = vector.load %arg2[%c0_24, %c1, %c0_25, %c0_26] : memref<3x3x128x128xbf16, #tpu.memory_space<vmem>>, vector<1x1x128x128xbf16>
    %55 = vector.shape_cast %54 : vector<1x1x128x128xbf16> to vector<128x128xbf16>
    %cst_27 = arith.constant dense<0.000000e+00> : vector<128x128xf32>
    %56 = tpu.matmul %53, %55, %cst_27 {dimension_numbers = #tpu.dot_dimension_numbers<[1], [0], [0], [1], [0, 0, 1, 1], [], []>} : vector<128x128xbf16>, vector<128x128xbf16>, vector<128x128xf32> -> vector<128x128xf32>
    %57 = arith.addf %51, %56 : vector<128x128xf32>
    %58 = vector.extract_strided_slice %44 {offsets = [0, 2, 0], sizes = [8, 16, 128], strides = [1, 1, 1]} : vector<10x18x128xbf16> to vector<8x16x128xbf16>
    %59 = vector.shape_cast %58 : vector<8x16x128xbf16> to vector<128x128xbf16>
    %c0_28 = arith.constant 0 : index
    %c2 = arith.constant 2 : index
    %c0_29 = arith.constant 0 : index
    %c0_30 = arith.constant 0 : index
    %60 = vector.load %arg2[%c0_28, %c2, %c0_29, %c0_30] : memref<3x3x128x128xbf16, #tpu.memory_space<vmem>>, vector<1x1x128x128xbf16>
    %61 = vector.shape_cast %60 : vector<1x1x128x128xbf16> to vector<128x128xbf16>
    %cst_31 = arith.constant dense<0.000000e+00> : vector<128x128xf32>
    %62 = tpu.matmul %59, %61, %cst_31 {dimension_numbers = #tpu.dot_dimension_numbers<[1], [0], [0], [1], [0, 0, 1, 1], [], []>} : vector<128x128xbf16>, vector<128x128xbf16>, vector<128x128xf32> -> vector<128x128xf32>
    %63 = arith.addf %57, %62 : vector<128x128xf32>
    %64 = vector.extract_strided_slice %44 {offsets = [1, 0, 0], sizes = [8, 16, 128], strides = [1, 1, 1]} : vector<10x18x128xbf16> to vector<8x16x128xbf16>
    %65 = vector.shape_cast %64 : vector<8x16x128xbf16> to vector<128x128xbf16>
    %c1_32 = arith.constant 1 : index
    %c0_33 = arith.constant 0 : index
    %c0_34 = arith.constant 0 : index
    %c0_35 = arith.constant 0 : index
    %66 = vector.load %arg2[%c1_32, %c0_33, %c0_34, %c0_35] : memref<3x3x128x128xbf16, #tpu.memory_space<vmem>>, vector<1x1x128x128xbf16>
    %67 = vector.shape_cast %66 : vector<1x1x128x128xbf16> to vector<128x128xbf16>
    %cst_36 = arith.constant dense<0.000000e+00> : vector<128x128xf32>
    %68 = tpu.matmul %65, %67, %cst_36 {dimension_numbers = #tpu.dot_dimension_numbers<[1], [0], [0], [1], [0, 0, 1, 1], [], []>} : vector<128x128xbf16>, vector<128x128xbf16>, vector<128x128xf32> -> vector<128x128xf32>
    %69 = arith.addf %63, %68 : vector<128x128xf32>
    %70 = vector.extract_strided_slice %44 {offsets = [1, 1, 0], sizes = [8, 16, 128], strides = [1, 1, 1]} : vector<10x18x128xbf16> to vector<8x16x128xbf16>
    %71 = vector.shape_cast %70 : vector<8x16x128xbf16> to vector<128x128xbf16>
    %c1_37 = arith.constant 1 : index
    %c1_38 = arith.constant 1 : index
    %c0_39 = arith.constant 0 : index
    %c0_40 = arith.constant 0 : index
    %72 = vector.load %arg2[%c1_37, %c1_38, %c0_39, %c0_40] : memref<3x3x128x128xbf16, #tpu.memory_space<vmem>>, vector<1x1x128x128xbf16>
    %73 = vector.shape_cast %72 : vector<1x1x128x128xbf16> to vector<128x128xbf16>
    %cst_41 = arith.constant dense<0.000000e+00> : vector<128x128xf32>
    %74 = tpu.matmul %71, %73, %cst_41 {dimension_numbers = #tpu.dot_dimension_numbers<[1], [0], [0], [1], [0, 0, 1, 1], [], []>} : vector<128x128xbf16>, vector<128x128xbf16>, vector<128x128xf32> -> vector<128x128xf32>
    %75 = arith.addf %69, %74 : vector<128x128xf32>
    %76 = vector.extract_strided_slice %44 {offsets = [1, 2, 0], sizes = [8, 16, 128], strides = [1, 1, 1]} : vector<10x18x128xbf16> to vector<8x16x128xbf16>
    %77 = vector.shape_cast %76 : vector<8x16x128xbf16> to vector<128x128xbf16>
    %c1_42 = arith.constant 1 : index
    %c2_43 = arith.constant 2 : index
    %c0_44 = arith.constant 0 : index
    %c0_45 = arith.constant 0 : index
    %78 = vector.load %arg2[%c1_42, %c2_43, %c0_44, %c0_45] : memref<3x3x128x128xbf16, #tpu.memory_space<vmem>>, vector<1x1x128x128xbf16>
    %79 = vector.shape_cast %78 : vector<1x1x128x128xbf16> to vector<128x128xbf16>
    %cst_46 = arith.constant dense<0.000000e+00> : vector<128x128xf32>
    %80 = tpu.matmul %77, %79, %cst_46 {dimension_numbers = #tpu.dot_dimension_numbers<[1], [0], [0], [1], [0, 0, 1, 1], [], []>} : vector<128x128xbf16>, vector<128x128xbf16>, vector<128x128xf32> -> vector<128x128xf32>
    %81 = arith.addf %75, %80 : vector<128x128xf32>
    %82 = vector.extract_strided_slice %44 {offsets = [2, 0, 0], sizes = [8, 16, 128], strides = [1, 1, 1]} : vector<10x18x128xbf16> to vector<8x16x128xbf16>
    %83 = vector.shape_cast %82 : vector<8x16x128xbf16> to vector<128x128xbf16>
    %c2_47 = arith.constant 2 : index
    %c0_48 = arith.constant 0 : index
    %c0_49 = arith.constant 0 : index
    %c0_50 = arith.constant 0 : index
    %84 = vector.load %arg2[%c2_47, %c0_48, %c0_49, %c0_50] : memref<3x3x128x128xbf16, #tpu.memory_space<vmem>>, vector<1x1x128x128xbf16>
    %85 = vector.shape_cast %84 : vector<1x1x128x128xbf16> to vector<128x128xbf16>
    %cst_51 = arith.constant dense<0.000000e+00> : vector<128x128xf32>
    %86 = tpu.matmul %83, %85, %cst_51 {dimension_numbers = #tpu.dot_dimension_numbers<[1], [0], [0], [1], [0, 0, 1, 1], [], []>} : vector<128x128xbf16>, vector<128x128xbf16>, vector<128x128xf32> -> vector<128x128xf32>
    %87 = arith.addf %81, %86 : vector<128x128xf32>
    %88 = vector.extract_strided_slice %44 {offsets = [2, 1, 0], sizes = [8, 16, 128], strides = [1, 1, 1]} : vector<10x18x128xbf16> to vector<8x16x128xbf16>
    %89 = vector.shape_cast %88 : vector<8x16x128xbf16> to vector<128x128xbf16>
    %c2_52 = arith.constant 2 : index
    %c1_53 = arith.constant 1 : index
    %c0_54 = arith.constant 0 : index
    %c0_55 = arith.constant 0 : index
    %90 = vector.load %arg2[%c2_52, %c1_53, %c0_54, %c0_55] : memref<3x3x128x128xbf16, #tpu.memory_space<vmem>>, vector<1x1x128x128xbf16>
    %91 = vector.shape_cast %90 : vector<1x1x128x128xbf16> to vector<128x128xbf16>
    %cst_56 = arith.constant dense<0.000000e+00> : vector<128x128xf32>
    %92 = tpu.matmul %89, %91, %cst_56 {dimension_numbers = #tpu.dot_dimension_numbers<[1], [0], [0], [1], [0, 0, 1, 1], [], []>} : vector<128x128xbf16>, vector<128x128xbf16>, vector<128x128xf32> -> vector<128x128xf32>
    %93 = arith.addf %87, %92 : vector<128x128xf32>
    %94 = vector.extract_strided_slice %44 {offsets = [2, 2, 0], sizes = [8, 16, 128], strides = [1, 1, 1]} : vector<10x18x128xbf16> to vector<8x16x128xbf16>
    %95 = vector.shape_cast %94 : vector<8x16x128xbf16> to vector<128x128xbf16>
    %c2_57 = arith.constant 2 : index
    %c2_58 = arith.constant 2 : index
    %c0_59 = arith.constant 0 : index
    %c0_60 = arith.constant 0 : index
    %96 = vector.load %arg2[%c2_57, %c2_58, %c0_59, %c0_60] : memref<3x3x128x128xbf16, #tpu.memory_space<vmem>>, vector<1x1x128x128xbf16>
    %97 = vector.shape_cast %96 : vector<1x1x128x128xbf16> to vector<128x128xbf16>
    %cst_61 = arith.constant dense<0.000000e+00> : vector<128x128xf32>
    %98 = tpu.matmul %95, %97, %cst_61 {dimension_numbers = #tpu.dot_dimension_numbers<[1], [0], [0], [1], [0, 0, 1, 1], [], []>} : vector<128x128xbf16>, vector<128x128xbf16>, vector<128x128xf32> -> vector<128x128xf32>
    %99 = arith.addf %93, %98 : vector<128x128xf32>
    %100 = vector.shape_cast %99 : vector<128x128xf32> to vector<8x16x128xf32>
    %c0_62 = arith.constant 0 : index
    %c0_63 = arith.constant 0 : index
    %c0_64 = arith.constant 0 : index
    %c0_65 = arith.constant 0 : index
    %101 = vector.load %arg5[%c0_62, %c0_63, %c0_64, %c0_65] : memref<1x8x16x128xf32, #tpu.memory_space<vmem>>, vector<1x8x16x128xf32>
    %102 = vector.shape_cast %101 : vector<1x8x16x128xf32> to vector<8x16x128xf32>
    %103 = vector.shape_cast %100 : vector<8x16x128xf32> to vector<1x8x16x128xf32>
    tpu.vector_store %arg5[%c0_62, %c0_63, %c0_64, %c0_65], %103 {strides = array<i32>} : memref<1x8x16x128xf32, #tpu.memory_space<vmem>>, vector<1x8x16x128xf32>,
    %cst_66 = arith.constant dense<0.000000e+00> : vector<128xf32>
    %104 = vector.multi_reduction <add>, %99, %cst_66 [0] : vector<128x128xf32> to vector<128xf32>
    %105 = vector.shape_cast %104 : vector<128xf32> to vector<1x128xf32>
    %106 = arith.mulf %99, %99 : vector<128x128xf32>
    %cst_67 = arith.constant dense<0.000000e+00> : vector<128xf32>
    %107 = vector.multi_reduction <add>, %106, %cst_67 [0] : vector<128x128xf32> to vector<128xf32>
    %108 = vector.shape_cast %107 : vector<128xf32> to vector<1x128xf32>
    %cst_68 = arith.constant 0.000000e+00 : f32
    %109 = vector.broadcast %cst_68 : f32 to vector<6x128xf32>
    %110 = tpu.concatenate %105, %108, %109 in 0 : vector<1x128xf32>, vector<1x128xf32>, vector<6x128xf32> -> vector<8x128xf32>
    %c0_69 = arith.constant 0 : index
    %c0_70 = arith.constant 0 : index
    %c0_71 = arith.constant 0 : index
    %111 = vector.load %arg6[%c0_69, %c0_70, %c0_71] : memref<1x8x128xf32, #tpu.memory_space<vmem>>, vector<1x8x128xf32>
    %112 = vector.shape_cast %111 : vector<1x8x128xf32> to vector<8x128xf32>
    %113 = vector.shape_cast %110 : vector<8x128xf32> to vector<1x8x128xf32>
    tpu.vector_store %arg6[%c0_69, %c0_70, %c0_71], %113 {strides = array<i32>} : memref<1x8x128xf32, #tpu.memory_space<vmem>>, vector<1x8x128xf32>,
    return
  }
  func.func @transform_0(%arg0: i32) -> (i32, i32, i32, i32) {
    %c0_i32 = arith.constant 0 : i32
    %c0_i32_0 = arith.constant 0 : i32
    %c0_i32_1 = arith.constant 0 : i32
    %c0_i32_2 = arith.constant 0 : i32
    return %arg0, %c0_i32, %c0_i32_0, %c0_i32_1 : i32, i32, i32, i32
  }
  func.func @transform_1(%arg0: i32) -> (i32, i32, i32, i32) {
    %c0_i32 = arith.constant 0 : i32
    %c0_i32_0 = arith.constant 0 : i32
    %c0_i32_1 = arith.constant 0 : i32
    %c0_i32_2 = arith.constant 0 : i32
    %c0_i32_3 = arith.constant 0 : i32
    return %c0_i32, %c0_i32_0, %c0_i32_1, %c0_i32_2 : i32, i32, i32, i32
  }
  func.func @transform_2(%arg0: i32) -> (i32, i32, i32) {
    %c0_i32 = arith.constant 0 : i32
    %c0_i32_0 = arith.constant 0 : i32
    %c0_i32_1 = arith.constant 0 : i32
    %c0_i32_2 = arith.constant 0 : i32
    return %c0_i32, %c0_i32_0, %c0_i32_1 : i32, i32, i32
  }
  func.func @transform_3(%arg0: i32) -> (i32, i32, i32) {
    %c0_i32 = arith.constant 0 : i32
    %c0_i32_0 = arith.constant 0 : i32
    %c0_i32_1 = arith.constant 0 : i32
    %c0_i32_2 = arith.constant 0 : i32
    return %c0_i32, %c0_i32_0, %c0_i32_1 : i32, i32, i32
  }
  func.func @transform_4(%arg0: i32) -> (i32, i32, i32, i32) {
    %c0_i32 = arith.constant 0 : i32
    %c0_i32_0 = arith.constant 0 : i32
    %c0_i32_1 = arith.constant 0 : i32
    %c0_i32_2 = arith.constant 0 : i32
    return %arg0, %c0_i32, %c0_i32_0, %c0_i32_1 : i32, i32, i32, i32
  }
  func.func @transform_5(%arg0: i32) -> (i32, i32, i32) {
    %c0_i32 = arith.constant 0 : i32
    %c0_i32_0 = arith.constant 0 : i32
    %c0_i32_1 = arith.constant 0 : i32
    return %arg0, %c0_i32, %c0_i32_0 : i32, i32, i32
  }
}

module attributes {stable_mosaic.version = 11 : i64} {
  func.func @_bn_act_kernel(%arg0: i32, %arg1: memref<1x8x16x128xf32, #tpu.memory_space<vmem>>, %arg2: memref<1x1x128xf32, #tpu.memory_space<vmem>>, %arg3: memref<1x1x128xf32, #tpu.memory_space<vmem>>, %arg4: memref<1x8x16x128xf32, #tpu.memory_space<vmem>>) attributes {dimension_semantics = [#tpu.dimension_semantics<parallel>], iteration_bounds = array<i64: 4>, scalar_prefetch = 0 : i64, scratch_operands = 0 : i64, tpu.core_type = #tpu.core_type<tc>, window_params = [{transform_indices = @transform_0, window_bounds = array<i64: 1, 8, 16, 128>}, {pipeline_mode = #tpu.pipeline_mode<synchronous>, transform_indices = @transform_1, window_bounds = array<i64: 1, 1, 128>}, {pipeline_mode = #tpu.pipeline_mode<synchronous>, transform_indices = @transform_2, window_bounds = array<i64: 1, 1, 128>}, {transform_indices = @transform_3, window_bounds = array<i64: 1, 8, 16, 128>}]} {
    %c0 = arith.constant 0 : index
    %c0_0 = arith.constant 0 : index
    %c0_1 = arith.constant 0 : index
    %c0_2 = arith.constant 0 : index
    %0 = vector.load %arg1[%c0, %c0_0, %c0_1, %c0_2] : memref<1x8x16x128xf32, #tpu.memory_space<vmem>>, vector<1x8x16x128xf32>
    %1 = vector.shape_cast %0 : vector<1x8x16x128xf32> to vector<8x16x128xf32>
    %c0_3 = arith.constant 0 : index
    %c0_4 = arith.constant 0 : index
    %c0_5 = arith.constant 0 : index
    %2 = vector.load %arg2[%c0_3, %c0_4, %c0_5] : memref<1x1x128xf32, #tpu.memory_space<vmem>>, vector<1x1x128xf32>
    %3 = vector.broadcast %2 : vector<1x1x128xf32> to vector<8x16x128xf32>
    %4 = arith.mulf %1, %3 : vector<8x16x128xf32>
    %c0_6 = arith.constant 0 : index
    %c0_7 = arith.constant 0 : index
    %c0_8 = arith.constant 0 : index
    %5 = vector.load %arg3[%c0_6, %c0_7, %c0_8] : memref<1x1x128xf32, #tpu.memory_space<vmem>>, vector<1x1x128xf32>
    %6 = vector.broadcast %5 : vector<1x1x128xf32> to vector<8x16x128xf32>
    %7 = arith.addf %4, %6 : vector<8x16x128xf32>
    %cst = arith.constant 0.000000e+00 : f32
    %8 = vector.broadcast %cst : f32 to vector<8x16x128xf32>
    %9 = arith.cmpf oge, %7, %8 : vector<8x16x128xf32>
    %cst_9 = arith.constant 0.00999999977 : f32
    %10 = vector.broadcast %cst_9 : f32 to vector<8x16x128xf32>
    %11 = arith.mulf %10, %7 : vector<8x16x128xf32>
    %12 = arith.select %9, %7, %11 : vector<8x16x128xi1>, vector<8x16x128xf32>
    %c0_10 = arith.constant 0 : index
    %c0_11 = arith.constant 0 : index
    %c0_12 = arith.constant 0 : index
    %c0_13 = arith.constant 0 : index
    %13 = vector.load %arg4[%c0_10, %c0_11, %c0_12, %c0_13] : memref<1x8x16x128xf32, #tpu.memory_space<vmem>>, vector<1x8x16x128xf32>
    %14 = vector.shape_cast %13 : vector<1x8x16x128xf32> to vector<8x16x128xf32>
    %15 = vector.shape_cast %12 : vector<8x16x128xf32> to vector<1x8x16x128xf32>
    tpu.vector_store %arg4[%c0_10, %c0_11, %c0_12, %c0_13], %15 {strides = array<i32>} : memref<1x8x16x128xf32, #tpu.memory_space<vmem>>, vector<1x8x16x128xf32>,
    return
  }
  func.func @transform_0(%arg0: i32) -> (i32, i32, i32, i32) {
    %c0_i32 = arith.constant 0 : i32
    %c0_i32_0 = arith.constant 0 : i32
    %c0_i32_1 = arith.constant 0 : i32
    %c0_i32_2 = arith.constant 0 : i32
    return %arg0, %c0_i32, %c0_i32_0, %c0_i32_1 : i32, i32, i32, i32
  }
  func.func @transform_1(%arg0: i32) -> (i32, i32, i32) {
    %c0_i32 = arith.constant 0 : i32
    %c0_i32_0 = arith.constant 0 : i32
    %c0_i32_1 = arith.constant 0 : i32
    %c0_i32_2 = arith.constant 0 : i32
    return %c0_i32, %c0_i32_0, %c0_i32_1 : i32, i32, i32
  }
  func.func @transform_2(%arg0: i32) -> (i32, i32, i32) {
    %c0_i32 = arith.constant 0 : i32
    %c0_i32_0 = arith.constant 0 : i32
    %c0_i32_1 = arith.constant 0 : i32
    %c0_i32_2 = arith.constant 0 : i32
    return %c0_i32, %c0_i32_0, %c0_i32_1 : i32, i32, i32
  }
  func.func @transform_3(%arg0: i32) -> (i32, i32, i32, i32) {
    %c0_i32 = arith.constant 0 : i32
    %c0_i32_0 = arith.constant 0 : i32
    %c0_i32_1 = arith.constant 0 : i32
    %c0_i32_2 = arith.constant 0 : i32
    return %arg0, %c0_i32, %c0_i32_0, %c0_i32_1 : i32, i32, i32, i32
  }
}

</mosaic_0001>

<bundles_post_ra>
// kernel: first_conv_forward.3
= control target key start
LH: loop header
LB: loop body
LE: loop exit
PB: predicated region body
PF: predicated region fallthrough
CT: control target
= control target key end

     0   :  { %s2548_s12 = smov 0   ;;  %s3100_s0 = inlined_call_operand.vmem [shape: bf16[4,10,18,16], index: 0, kind: input, shape index: {}]   ;;  %s3101_s1 = inlined_call_operand.vmem [shape: bf16[3,3,16,128], index: 1, kind: input, shape index: {}]   ;;  %s3102_s2 = inlined_call_operand.vmem [shape: f32[4,8,16,128], index: 2, kind: output, shape index: {0}]   ;;  %s3103_s3 = inlined_call_operand.vmem [shape: f32[4,8,128], index: 3, kind: output, shape index: {1}]  }
   0x1 LB: > { %s1970_s13 = sadd.s32 4294967295, %s2526_s12   ;;  %p1974_p0 = scmp.ge.s32.totalorder %s2526_s12, 1  ;;  %s2526_s12 = sphi %s2548_s12, %s14_s12  }
   0x2   : > { %p140_p1 = scmp.lt.s32.totalorder %s2526_s12, 5 }
   0x4   : > { %p141_p2 = pnand %p1974_p0, %p140_p1 }
   0x5   : > { %v2501_v0 = vld [vmem:[%s3101_s1 + $0x8] sm:$0xff] (!%p141_p2)   ;;  %p168_p3 = scmp.lt.s32.totalorder (!%p141_p2), %s1970_s13, 3  ;;  %v2562_v1 = vld [vmem:[%s3101_s1 + $0x20] sm:$0xff] (!%p141_p2)   ;;  %vm215_vm0 = vsmask.f32 (!%p141_p2), 3328  ;;  %vm443_vm3 = vcmask (!%p141_p2), 130048  }
   0x6   : > { %144 = sbr.rel (%p141_p2) target bundleno = 416 (0x1a0), region = 28  ;;  %2200 = vmatprep.subr.bf16.mxu1 (!%p141_p2), %v2501_v0  ;;  %v2569_v2 = vld [vmem:[%s3101_s1] sm:$0xff] (!%p141_p2)   ;;  %2272 = vmatprep.subr.bf16.mxu0 (!%p141_p2), %v2562_v1  ;;  %v2578_v3 = vld [vmem:[%s3101_s1 + $0x28] sm:$0xff] (!%p141_p2)   ;;  %vm216_vm1 = vsmask.f32 (!%p141_p2), 7440  ;;  %vm740_vm4 = vcmask (!%p141_p2), 1042432  }
   0x7   : > { %2201 = vmatpush3.bf16.msra.mxu1 (!%p141_p2), %v2501_v0  ;;  %2273 = vmatpush3.bf16.msra.mxu0 (!%p141_p2), %v2562_v1  ;;  %vm2619_vm2 = vmor (!%p141_p2), %vm215_vm0, %vm216_vm1  ;;  %vm741_vm5 = vcmask (!%p141_p2), 1046532   ;;  %vm1879_vm7 = vcmask (!%p141_p2), 1040384   ;;  %vm1881_vm8 = vcmask (!%p141_p2), 1041408  }
   0x8   : > { %2218 = vmatprep.subr.bf16.mxu1 (!%p141_p2), %v2569_v2  ;;  %2290 = vmatprep.subr.bf16.mxu0 (!%p141_p2), %v2578_v3  ;;  %vm2702_vm6 = vmor (!%p141_p2), %vm740_vm4, %vm741_vm5 }
   0xd   : > { %s3109_s13 = smov (!%p168_p3, %s1970_s13), 3 }
   0xe   : > { %s2492_s20 = smul.u32 120, %s3109_s13  ;;  %s2118_s9 = sshll.u32 %s3109_s13, 7 }
   0xf   : > { %s3075_s14 = scalar_lea.vmem %s3102_s2, %s2118_s9  ;;  %s1978_s15 = sshll.u32 %s3109_s13, 3 }
  0x10   : > { %s2583_s25 = scalar_lea.vmem %s3100_s0, %s2492_s20  ;;  %s181_s18 = scalar_lea.vmem %s3103_s3, %s1978_s15 }
  0x11   : > { %v2587_v4 = vld [vmem:[%s2583_s25] sm:$0xf]  ;;  %v2590_v5 = vld [vmem:[%s2583_s25 + $0x4] sm:$0xf]  ;;  %v2593_v6 = vld [vmem:[%s2583_s25 + $0x8] sm:$0x1] }
  0x12   : > { %v219_v7 = vshrl.u32 %v2587_v4, 16  ;;  %v222_v8 = vshll.u32 %v2587_v4, 16  ;;  %v228_v9 = vshll.u32 %v2590_v5, 16  ;;  %v232_v10 = vshrl.u32 %v2590_v5, 16  ;;  %v2600_v11 = vld [vmem:[%s2583_s25 + $0xc] sm:$0xf] }
  0x13   : > { %v238_v12 = vshll.u32 %v2593_v6, 16  ;;  %v2604_v13 = vld [vmem:[%s2583_s25 + $0x10] sm:$0xf]  ;;  %v2607_v14 = vld [vmem:[%s2583_s25 + $0x14] sm:$0x1]  ;;  %v243_v20 = vshrl.u32 %v2600_v11, 16 }
  0x14   : > { %v221_v15 = vrot.slane %v219_v7, 4  ;;  %v224_v16 = vrot.slane %v222_v8, 5  ;;  %v230_v17 = vrot.slane %v228_v9, 5  ;;  %v234_v18 = vrot.slane %v232_v10, 4  ;;  %v2615_v27 = vld [vmem:[%s2583_s25 + $0x18] sm:$0xf] }
  0x15   : > { %v240_v19 = vrot.slane %v238_v12, 5  ;;  %v246_v21 = vshll.u32 %v2600_v11, 16  ;;  %v252_v22 = vshll.u32 %v2604_v13, 16  ;;  %v256_v25 = vshrl.u32 %v2604_v13, 16  ;;  %v2624_v32 = vld [vmem:[%s2583_s25 + $0x1c] sm:$0xf] }
  0x16   : > { %v225_v23 = vor.u32 %v224_v16, %v221_v15  ;;  %v235_v24 = vor.u32 %v234_v18, %v230_v17  ;;  %v262_v26 = vshll.u32 %v2607_v14, 16  ;;  %v245_v29 = vrot.slane %v243_v20, 4  ;;  %v2628_v39 = vld [vmem:[%s2583_s25 + $0x20] sm:$0x1]  ;;  %v2638_v50 = vld [vmem:[%s2583_s25 + $0x24] sm:$0xf] }
  0x17   : > { %v248_v30 = vrot.slane %v246_v21, 5  ;;  %v254_v31 = vrot.slane %v252_v22, 5  ;;  %v258_v35 = vrot.slane %v256_v25, 4  ;;  %v755_v38 = vrot.slane %v2607_v14, 5  ;;  %v2643_v55 = vld [vmem:[%s2583_s25 + $0x28] sm:$0xf] }
  0x18   : > { %v226_v33 = vrot.slane %v225_v23, 4  ;;  %v236_v34 = vrot.slane %v235_v24, 4  ;;  %v264_v36 = vrot.slane %v262_v26, 5  ;;  %v267_v40 = vshrl.u32 %v2615_v27, 16  ;;  %v2651_v60 = vld [vmem:[%s2583_s25 + $0x2c] sm:$0x1] }
  0x19   : > { %v249_v37 = vor.u32 %v248_v30, %v245_v29  ;;  %v270_v41 = vshll.u32 %v2615_v27, 16  ;;  %v259_v44 = vor.u32 %v258_v35, %v254_v31  ;;  %v276_v45 = vshll.u32 %v2624_v32, 16  ;;  %v2657_v7 = vld [vmem:[%s2583_s25 + $0x30] sm:$0xf]  ;;  %v2669_v20 = vld [vmem:[%s2583_s25 + $0x34] sm:$0xf] }
  0x1a   : > { %v231_v42 = vsel %vm2619_vm2, %v226_v33, %v230_v17  ;;  %v241_v43 = vsel %vm2619_vm2, %v236_v34, %v240_v19  ;;  %v269_v48 = vrot.slane %v267_v40, 4  ;;  %v280_v53 = vshrl.u32 %v2624_v32, 16  ;;  %v2664_v15 = vld [vmem:[%s3101_s1 + $0x10] sm:$0xff]   ;;  %v2676_v24 = vld [vmem:[%s2583_s25 + $0x38] sm:$0x1] }
  0x1b   : > { %v1981_v46 = vcombine.low %v231_v42, %v241_v43  ;;  %v250_v47 = vrot.slane %v249_v37, 4  ;;  %v272_v49 = vrot.slane %v270_v41, 5  ;;  %v260_v51 = vrot.slane %v259_v44, 4  ;;  %v2688_v42 = vld [vmem:[%s2583_s25 + $0x3c] sm:$0xf] }
  0x1c   : > { %v278_v52 = vrot.slane %v276_v45, 5  ;;  %v286_v54 = vshll.u32 %v2628_v39, 16  ;;  %v759_v58 = vrot.slane %v2624_v32, 5  ;;  %v762_v59 = vrot.slane %v2628_v39, 5  ;;  %v2691_v43 = vld [vmem:[%s2583_s25 + $0x40] sm:$0xf] }
  0x1d   : > { %2202 = vmatprep.mubr.msk.bf16.mxu1 %vm443_vm3, %v1981_v46  ;;  %v255_v56 = vsel %vm2619_vm2, %v250_v47, %v254_v31  ;;  %v273_v57 = vor.u32 %v272_v49, %v269_v48  ;;  %v265_v61 = vsel %vm2619_vm2, %v260_v51, %v264_v36  ;;  %v282_v62 = vrot.slane %v280_v53, 4  ;;  %v2698_v48 = vld [vmem:[%s3101_s1 + $0x30] sm:$0xff]  }
  0x1e   : > { %v288_v63 = vrot.slane %v286_v54, 5  ;;  %v291_v0 = vshrl.u32 %v2638_v50, 16  ;;  %v1982_v8 = vcombine.low %v255_v56, %v265_v61  ;;  %v294_v10 = vshll.u32 %v2638_v50, 16 }
  0x1f   : > { %v274_v9 = vrot.slane %v273_v57, 4  ;;  %v300_v12 = vshll.u32 %v2643_v55, 16  ;;  %v283_v16 = vor.u32 %v282_v62, %v278_v52  ;;  %v304_v18 = vshrl.u32 %v2643_v55, 16 }
  0x20   : > { %v293_v17 = vrot.slane %v291_v0, 4  ;;  %v310_v19 = vshll.u32 %v2651_v60, 16  ;;  %2274 = vmatprep.mubr.msk.bf16.mxu0 %vm443_vm3, %v1982_v8  ;;  %2203 = vmatmul.mubr.msk.bf16.vlgmr.msra.gmra.mrb[0].mxu1 %vm443_vm3, %v1982_v8  ;;  %v296_v22 = vrot.slane %v294_v10, 5  ;;  %v315_v25 = vshrl.u32 %v2657_v7, 16  ;;  %v2719_v8 = vld [vmem:[%s2583_s25 + $0x44] sm:$0x1] }
  0x21   : > { %v279_v21 = vsel %vm2619_vm2, %v274_v9, %v278_v52  ;;  %v302_v23 = vrot.slane %v300_v12, 5  ;;  %2219 = vmatpush3.bf16.msra.mxu1 %v2569_v2  ;;  %v284_v26 = vrot.slane %v283_v16, 4  ;;  %v306_v29 = vrot.slane %v304_v18, 4 }
  0x22   : > { %v312_v30 = vrot.slane %v310_v19, 5  ;;  %v318_v31 = vshll.u32 %v2657_v7, 16  ;;  %v297_v33 = vor.u32 %v296_v22, %v293_v17  ;;  %v317_v34 = vrot.slane %v315_v25, 4  ;;  %2236 = vmatprep.subr.bf16.mxu1 %v2664_v15 }
  0x23   : > { %v324_v35 = vshll.u32 %v2669_v20, 16  ;;  %v328_v36 = vshrl.u32 %v2669_v20, 16  ;;  %v289_v37 = vsel %vm2619_vm2, %v284_v26, %v288_v63  ;;  %v307_v40 = vor.u32 %v306_v29, %v302_v23 }
  0x24   : > { %v320_v41 = vrot.slane %v318_v31, 5  ;;  %v334_v2 = vshll.u32 %v2676_v24, 16  ;;  %v2693_v44 = vcombine.low %v279_v21, %v289_v37  ;;  %v298_v45 = vrot.slane %v297_v33, 4  ;;  %v2746_v31 = vld [vmem:[%s2583_s25 + $0x4c] sm:$0xf] }
  0x25   : > { %v326_v46 = vrot.slane %v324_v35, 5  ;;  %v330_v47 = vrot.slane %v328_v36, 4  ;;  %v308_v49 = vrot.slane %v307_v40, 4  ;;  %v2016_v54 = vrot.slane %v2600_v11, 9 }
  0x26   : > { %v321_v51 = vor.u32 %v320_v41, %v317_v34  ;;  %v336_v52 = vrot.slane %v334_v2, 5  ;;  %2275 = vmatmul.mubr.msk.bf16.vlgmr.msra.gmra.mrb[0].mxu0 %vm443_vm3, %v2693_v44  ;;  %2206 = vmatprep.mubr.msk.bf16.mxu1 %vm443_vm3, %v2693_v44  ;;  %v303_v56 = vsel %vm2619_vm2, %v298_v45, %v302_v23  ;;  %v752_v61 = vrot.slane %v2604_v13, 5  ;;  %v2763_v45 = vld [vmem:[%s2583_s25 + $0x50] sm:$0x1] }
  0x27   : > { %v331_v57 = vor.u32 %v330_v47, %v326_v46  ;;  %v339_v62 = vshrl.u32 %v2688_v42, 16  ;;  %2291 = vmatpush3.bf16.msra.mxu0 %v2578_v3  ;;  %v313_v63 = vsel %vm2619_vm2, %v308_v49, %v312_v30  ;;  %v342_v9 = vshll.u32 %v2688_v42, 16  ;;  %v2729_v3 = vld [vmem:[%s2583_s25 + $0x48] sm:$0xf] }
  0x28   : > { %v322_v0 = vrot.slane %v321_v51, 4  ;;  %v348_v10 = vshll.u32 %v2691_v43, 16  ;;  %v2723_v12 = vcombine.low %v303_v56, %v313_v63  ;;  %v753_v17 = vsel %vm2702_vm6, %v2016_v54, %v752_v61  ;;  %2308 = vmatprep.subr.bf16.mxu0 %v2698_v48 }
  0x29   : > { %v332_v16 = vrot.slane %v331_v57, 4  ;;  %v754_v18 = vrot.slane %v752_v61, 4  ;;  %v341_v21 = vrot.slane %v339_v62, 4  ;;  %v344_v22 = vrot.slane %v342_v9, 5 }
  0x2a   : > { %v327_v19 = vsel %vm2619_vm2, %v322_v0, %v326_v46  ;;  %v350_v23 = vrot.slane %v348_v10, 5  ;;  %2278 = vmatprep.mubr.msk.bf16.mxu0 %vm443_vm3, %v2723_v12  ;;  %2207 = vmatmul.mubr.msk.bf16.gmra.mrb[4].mxu1 %vm443_vm3, %v2723_v12  ;;  %v352_v29 = vshrl.u32 %v2691_v43, 16  ;;  %v358_v30 = vshll.u32 %v2719_v8, 16 }
  0x2b   : > { %v337_v25 = vsel %vm2619_vm2, %v332_v16, %v336_v52  ;;  %v756_v26 = vsel %vm2702_vm6, %v754_v18, %v755_v38  ;;  %v345_v35 = vor.u32 %v344_v22, %v341_v21  ;;  %v2017_v36 = vrot.slane %v2615_v27, 9 }
  0x2c   : > { %v2748_v33 = vcombine.low %v327_v19, %v337_v25  ;;  %v2750_v34 = vcombine.low %v753_v17, %v756_v26  ;;  %v354_v37 = vrot.slane %v352_v29, 4  ;;  %v360_v14 = vrot.slane %v358_v30, 5  ;;  %v2788_v17 = vld [vmem:[%s2583_s25 + $0x58] sm:$0xf] }
  0x2d   : > { %v761_v40 = vrot.slane %v759_v58, 4  ;;  %v363_v38 = vshrl.u32 %v2729_v3, 16  ;;  %v346_v41 = vrot.slane %v345_v35, 4  ;;  %v760_v2 = vsel %vm2702_vm6, %v2017_v36, %v759_v58  ;;  %v2775_v58 = vld [vmem:[%s2583_s25 + $0x54] sm:$0xf] }
  0x2e   : > { %2210 = vmatprep.mubr.msk.bf16.mxu1 %vm443_vm3, %v2748_v33  ;;  %v366_v46 = vshll.u32 %v2729_v3, 16  ;;  %v372_v47 = vshll.u32 %v2746_v31, 16  ;;  %2279 = vmatmul.mubr.msk.bf16.gmra.mrb[4].mxu0 %vm443_vm3, %v2748_v33  ;;  %v355_v49 = vor.u32 %v354_v37, %v350_v23  ;;  %v376_v54 = vshrl.u32 %v2746_v31, 16 }
  0x2f   : > { %v763_v51 = vsel %vm2702_vm6, %v761_v40, %v762_v59  ;;  %v365_v52 = vrot.slane %v363_v38, 4  ;;  %2292 = vmatprep.mubr.msk.bf16.mxu0 %vm443_vm3, %v2750_v34  ;;  %v351_v56 = vsel %vm2619_vm2, %v346_v41, %v350_v23  ;;  %v382_v59 = vshll.u32 %v2763_v45, 16  ;;  %v2794_v23 = vld [vmem:[%s2583_s25 + $0x5c] sm:$0x1] }
  0x30   : > { %v2781_v57 = vcombine.low %v760_v2, %v763_v51  ;;  %v368_v61 = vrot.slane %v366_v46, 5  ;;  %v374_v39 = vrot.slane %v372_v47, 5  ;;  %v356_v62 = vrot.slane %v355_v49, 4 }
  0x31   : > { %v378_v63 = vrot.slane %v376_v54, 4  ;;  %v2018_v0 = vrot.slane %v2638_v50, 9  ;;  %v766_v10 = vrot.slane %v2643_v55, 5  ;;  %v769_v16 = vrot.slane %v2651_v60, 5 }
  0x32   : > { %v369_v9 = vor.u32 %v368_v61, %v365_v52  ;;  %v387_v18 = vshrl.u32 %v2775_v58, 16  ;;  %v361_v19 = vsel %vm2619_vm2, %v356_v62, %v360_v14  ;;  %v384_v22 = vrot.slane %v382_v59, 5  ;;  %v2805_v14 = vld [vmem:[%s3101_s1 + $0x38] sm:$0xff]  }
  0x33   : > { %v379_v21 = vor.u32 %v378_v63, %v374_v39  ;;  %v390_v25 = vshll.u32 %v2775_v58, 16  ;;  %v2797_v26 = vcombine.low %v351_v56, %v361_v19  ;;  %v767_v30 = vsel %vm2702_vm6, %v2018_v0, %v766_v10 }
  0x34   : > { %v370_v29 = vrot.slane %v369_v9, 4  ;;  %v768_v60 = vrot.slane %v766_v10, 4  ;;  %v389_v36 = vrot.slane %v387_v18, 4  ;;  %v396_v40 = vshll.u32 %v2788_v17, 16 }
  0x35   : > { %v380_v35 = vrot.slane %v379_v21, 4  ;;  %v392_v37 = vrot.slane %v390_v25, 5  ;;  %2211 = vmatmul.mubr.msk.bf16.gmra.mrb[8].mxu1 %vm443_vm3, %v2797_v26  ;;  %v400_v2 = vshrl.u32 %v2788_v17, 16  ;;  %v406_v46 = vshll.u32 %v2794_v23, 16 }
  0x36   : > { %v375_v38 = vsel %vm2619_vm2, %v370_v29, %v374_v39  ;;  %v770_v41 = vsel %vm2702_vm6, %v768_v60, %v769_v16  ;;  %2293 = vmatmul.mubr.msk.bf16.vlgmr.msra.gmra.mrb[0].mxu0 %vm443_vm3, %v2781_v57  ;;  %v398_v52 = vrot.slane %v396_v40, 5  ;;  %v2019_v61 = vrot.slane %v2657_v7, 9 }
  0x37   : > { %v385_v47 = vsel %vm2619_vm2, %v380_v35, %v384_v22  ;;  %v2819_v49 = vcombine.low %v767_v30, %v770_v41  ;;  %v393_v51 = vor.u32 %v392_v37, %v389_v36  ;;  %2309 = vmatpush3.bf16.msra.mxu0 %v2698_v48  ;;  %v402_v56 = vrot.slane %v400_v2, 4  ;;  %v2856_v41 = vld [vmem:[%s2583_s25 + $0x64] sm:$0xf] }
  0x38   : > { %v2822_v54 = vcombine.low %v375_v38, %v385_v47  ;;  %v773_v62 = vrot.slane %v2669_v20, 5  ;;  %v776_v63 = vrot.slane %v2676_v24, 5  ;;  %v2020_v59 = vrot.slane %v2688_v42, 9  ;;  %2326 = vmatprep.subr.bf16.mxu0 %v2805_v14 }
  0x39   : > { %2296 = vmatprep.mubr.msk.bf16.mxu0 %vm443_vm3, %v2819_v49  ;;  %v394_v39 = vrot.slane %v393_v51, 4  ;;  %v403_v48 = vor.u32 %v402_v56, %v398_v52  ;;  %v408_v0 = vrot.slane %v406_v46, 5  ;;  %v780_v9 = vrot.slane %v2691_v43, 5  ;;  %v2867_v51 = vld [vmem:[%s2583_s25 + $0x60] sm:$0xf] }
  0x3a   : > { %2214 = vmatprep.mubr.msk.bf16.mxu1 %vm443_vm3, %v2822_v54  ;;  %v783_v10 = vrot.slane %v2719_v8, 5  ;;  %v774_v16 = vsel %vm2702_vm6, %v2019_v61, %v773_v62  ;;  %v775_v18 = vrot.slane %v773_v62, 4  ;;  %v1998_v24 = vcombine.low %v2587_v4, %v2590_v5 }
  0x3b   : > { %v787_v19 = vrot.slane %v2746_v31, 5  ;;  %v399_v21 = vsel %vm2619_vm2, %v394_v39, %v398_v52  ;;  %v404_v22 = vrot.slane %v403_v48, 4  ;;  %v781_v25 = vsel %vm2702_vm6, %v2020_v59, %v780_v9  ;;  %v2878_v39 = vld [vmem:[%s2583_s25 + $0x68] sm:$0x1] }
  0x3c   : > { %v782_v29 = vrot.slane %v780_v9, 4  ;;  %v777_v8 = vsel %vm2702_vm6, %v775_v18, %v776_v63  ;;  %v2021_v30 = vrot.slane %v2729_v3, 9  ;;  %v790_v35 = vrot.slane %v2763_v45, 5 }
  0x3d   : > { %v789_v60 = vrot.slane %v787_v19, 4  ;;  %v409_v36 = vsel %vm2619_vm2, %v404_v22, %v408_v0  ;;  %v2850_v37 = vcombine.low %v774_v16, %v777_v8  ;;  %v2022_v38 = vrot.slane %v2775_v58, 9 }
  0x3e   : > { %v784_v40 = vsel %vm2702_vm6, %v782_v29, %v783_v10  ;;  %v2858_v2 = vcombine.low %v399_v21, %v409_v36  ;;  %v794_v47 = vrot.slane %v2788_v17, 5  ;;  %v797_v45 = vrot.slane %v2794_v23, 5  ;;  %v2903_v21 = vld [vmem:[%s2583_s25 + $0x70] sm:$0xf] }
  0x3f   : > { %v2860_v46 = vcombine.low %v781_v25, %v784_v40  ;;  %2297 = vmatmul.mubr.msk.bf16.gmra.mrb[4].mxu0 %vm443_vm3, %v2850_v37  ;;  %v788_v52 = vsel %vm2702_vm6, %v2021_v30, %v787_v19  ;;  %v791_v56 = vsel %vm2702_vm6, %v789_v60, %v790_v35  ;;  %v1254_v23 = vrot.slane %v2856_v41, 5  ;;  %v212_v30 = vld [vmem:[%s2583_s25 + $0x74] sm:$0x1] }
  0x40   : > { %2215 = vmatmul.mubr.msk.bf16.gmra.mrb[12].mxu1 %vm443_vm3, %v2858_v2  ;;  %v796_v61 = vrot.slane %v794_v47, 4  ;;  %v795_v62 = vsel %vm2702_vm6, %v2022_v38, %v794_v47  ;;  %v748_v63 = vrot.slane %v2593_v6, 5  ;;  %v2066_v48 = vrot.slane %v2867_v51, 9 }
  0x41   : > { %2300 = vmatprep.mubr.msk.bf16.mxu0 %vm443_vm3, %v2860_v46  ;;  %2220 = vmatprep.mubr.msk.bf16.mxu1 %vm443_vm3, %v1998_v24  ;;  %v2015_v0 = vrot.slane %v2587_v4, 9  ;;  %v2889_v9 = vcombine.low %v788_v52, %v791_v56  ;;  %v1256_v10 = vrot.slane %v1254_v23, 4  ;;  %v1257_v16 = vrot.slane %v2878_v39, 5  ;;  %v2894_v24 = vld [vmem:[%s2583_s25 + $0x6c] sm:$0xf] }
  0x42   : > { %v798_v59 = vsel %vm2702_vm6, %v796_v61, %v797_v45  ;;  %v745_v18 = vrot.slane %v2590_v5, 5  ;;  %v2898_v6 = vcombine.low %v2600_v11, %v2604_v13  ;;  %v1518_v4 = vshrl.u32 %v2894_v24, 16  ;;  %v2516_v13 = vld [vmem:[%s3101_s1 + $0x18] sm:$0xff]  }
  0x43   : > { %v2900_v19 = vcombine.low %v795_v62, %v798_v59  ;;  %v1521_v22 = vshll.u32 %v2894_v24, 16  ;;  %v2909_v25 = vcombine.low %v2615_v27, %v2624_v32  ;;  %v1531_v8 = vshrl.u32 %v2903_v21, 16 }
  0x44   : > { %v746_v5 = vsel %vm2702_vm6, %v2015_v0, %v745_v18  ;;  %v747_v29 = vrot.slane %v745_v18, 4  ;;  %v1255_v11 = vsel %vm2702_vm6, %v2066_v48, %v1254_v23  ;;  %v1258_v27 = vsel %vm2702_vm6, %v1256_v10, %v1257_v16 }
  0x45   : > { %v1520_v60 = vrot.slane %v1518_v4, 4  ;;  %v1523_v35 = vrot.slane %v1521_v22, 5  ;;  %v1527_v38 = vshll.u32 %v2903_v21, 16  ;;  %v1533_v47 = vrot.slane %v1531_v8, 4 }
  0x46   : > { %v749_v32 = vsel %vm2702_vm6, %v747_v29, %v748_v63  ;;  %v2934_v45 = vcombine.low %v1255_v11, %v1258_v27  ;;  %v1537_v52 = vshll.u32 %v212_v30, 16  ;;  %v2103_v56 = vrot.slane %v2894_v24, 9 }
  0x47   : > { %2301 = vmatmul.mubr.msk.bf16.gmra.mrb[8].mxu0 %vm443_vm3, %v2889_v9  ;;  %v2025_v36 = vcombine.low %v746_v5, %v749_v32  ;;  %v1524_v40 = vor.u32 %v1523_v35, %v1520_v60  ;;  %v1529_v23 = vrot.slane %v1527_v38, 5  ;;  %v1672_v62 = vrot.slane %v2903_v21, 5  ;;  %v2519_v5 = vld [vmem:[%s3101_s1 + $0x40] sm:$0xff]  }
  0x48   : > { %2221 = vmatmul.mubr.msk.bf16.vlgmr.msra.gmra.mrb[0].mxu1 %vm443_vm3, %v2898_v6  ;;  %2304 = vmatprep.mubr.msk.bf16.mxu0 %vm443_vm3, %v2900_v19  ;;  %v1675_v63 = vrot.slane %v212_v30, 5  ;;  %v2944_v59 = vcombine.low %v2657_v7, %v2669_v20  ;;  %v1539_v48 = vrot.slane %v1537_v52, 5  ;;  %v2003_v53 = vcombine.low %v2688_v42, %v2691_v43 }
  0x49   : > { %2237 = vmatpush3.bf16.msra.mxu1 %v2664_v15  ;;  %2224 = vmatprep.mubr.msk.bf16.mxu1 %vm443_vm3, %v2909_v25  ;;  %v1525_v61 = vrot.slane %v1524_v40, 4  ;;  %v2940_v15 = vcombine.low %v2638_v50, %v2643_v55  ;;  %v1534_v10 = vor.u32 %v1533_v47, %v1529_v23  ;;  %v2950_v16 = vsel %vm2702_vm6, %v2103_v56, %v1672_v62 }
  0x4a   : > { %2254 = vmatprep.subr.bf16.mxu1 %v2516_v13  ;;  %v1674_v18 = vrot.slane %v1672_v62, 4  ;;  %v2004_v22 = vcombine.low %v2729_v3, %v2746_v31  ;;  %v2005_v42 = vcombine.low %v2775_v58, %v2788_v17  ;;  %v2044_v43 = vcombine.low %v2867_v51, %v2856_v41 }
  0x4b   : > { %v1530_v0 = vsel %vm2619_vm2, %v1525_v61, %v1529_v23  ;;  %v1535_v4 = vrot.slane %v1534_v10, 4  ;;  %v2081_v3 = vcombine.low %v2894_v24, %v2903_v21  ;;  %v1100_v31 = vshrl.u32 %v2867_v51, 16 }
  0x4c   : > { %v2956_v50 = vsel %vm2702_vm6, %v1674_v18, %v1675_v63  ;;  %v1109_v58 = vshll.u32 %v2856_v41, 16  ;;  %v1113_v17 = vshrl.u32 %v2856_v41, 16  ;;  %v1119_v41 = vshll.u32 %v2878_v39, 16 }
  0x4d   : > { %v2106_v55 = vcombine.low %v2950_v16, %v2956_v50  ;;  %v1540_v7 = vsel %vm2619_vm2, %v1535_v4, %v1539_v48 }
  0x4e   : > { %v2093_v20 = vcombine.low %v1530_v0, %v1540_v7  ;;  %v1111_v21 = vrot.slane %v1109_v58, 5  ;;  %v1115_v29 = vrot.slane %v1113_v17, 4 }
  0x4f   : > { %2305 = vmatmul.mubr.msk.bf16.gmra.mrb[12].mxu0 %vm443_vm3, %v2934_v45 }
  0x50   : > { %2225 = vmatmul.mubr.msk.bf16.gmra.mrb[4].mxu1 %vm443_vm3, %v2940_v15  ;;  %2310 = vmatprep.mubr.msk.bf16.mxu0 %vm443_vm3, %v2909_v25 }
  0x51   : > { %2228 = vmatprep.mubr.msk.bf16.mxu1 %vm443_vm3, %v2944_v59 }
  0x57   : > { %2311 = vmatmul.mubr.msk.bf16.vlgmr.msra.gmra.mrb[0].mxu0 %vm443_vm3, %v2940_v15 }
  0x58   : > { %2229 = vmatmul.mubr.msk.bf16.gmra.mrb[8].mxu1 %vm443_vm3, %v2003_v53  ;;  %2327 = vmatpush3.bf16.msra.mxu0 %v2805_v14  ;;  %v1102_v14 = vrot.slane %v1100_v31, 4 }
  0x59   : > { %2232 = vmatprep.mubr.msk.bf16.mxu1 %vm443_vm3, %v2004_v22  ;;  %2314 = vmatprep.mubr.msk.bf16.mxu0 %vm443_vm3, %v2944_v59 }
  0x5a   : > { %2344 = vmatprep.subr.bf16.mxu0 %v2519_v5 }
  0x5f   : > { %2315 = vmatmul.mubr.msk.bf16.gmra.mrb[4].mxu0 %vm443_vm3, %v2003_v53 }
  0x60   : > { %2233 = vmatmul.mubr.msk.bf16.gmra.mrb[12].mxu1 %vm443_vm3, %v2005_v42  ;;  %2318 = vmatprep.mubr.msk.bf16.mxu0 %vm443_vm3, %v2004_v22 }
  0x61   : > { %2238 = vmatprep.mubr.msk.bf16.mxu1 %vm443_vm3, %v2025_v36 }
  0x67   : > { %2319 = vmatmul.mubr.msk.bf16.gmra.mrb[8].mxu0 %vm443_vm3, %v2005_v42 }
  0x68   : > { %2239 = vmatmul.mubr.msk.bf16.vlgmr.msra.gmra.mrb[0].mxu1 %vm443_vm3, %v2750_v34  ;;  %2322 = vmatprep.mubr.msk.bf16.mxu0 %vm443_vm3, %v2044_v43  ;;  %v1103_v34 = vshll.u32 %v2867_v51, 16  ;;  %v1116_v51 = vor.u32 %v1115_v29, %v1111_v21 }
  0x69   : > { %2255 = vmatpush3.bf16.msra.mxu1 %v2516_v13  ;;  %2242 = vmatprep.mubr.msk.bf16.mxu1 %vm443_vm3, %v2781_v57  ;;  %v1121_v13 = vrot.slane %v1119_v41, 5 }
  0x6a   : > { %2362 = vmatprep.subr.bf16.mxu1 %v2562_v1  ;;  %v1105_v24 = vrot.slane %v1103_v34, 5  ;;  %v1117_v11 = vrot.slane %v1116_v51, 4 }
  0x6f   : > { %2323 = vmatmul.mubr.msk.bf16.gmra.mrb[12].mxu0 %vm443_vm3, %v2081_v3 }
  0x70   : > { %2243 = vmatmul.mubr.msk.bf16.gmra.mrb[4].mxu1 %vm443_vm3, %v2819_v49  ;;  %2328 = vmatprep.mubr.msk.bf16.mxu0 %vm443_vm3, %v2693_v44  ;;  %v1106_v44 = vor.u32 %v1105_v24, %v1102_v14 }
  0x71   : > { %2246 = vmatprep.mubr.msk.bf16.mxu1 %vm443_vm3, %v2850_v37 }
  0x72   : > { %v1107_v8 = vrot.slane %v1106_v44, 4 }
  0x77   : > { %2329 = vmatmul.mubr.msk.bf16.vlgmr.msra.gmra.mrb[0].mxu0 %vm443_vm3, %v2723_v12  ;;  %v1112_v12 = vsel %vm2619_vm2, %v1107_v8, %v1111_v21 }
  0x78   : > { %2247 = vmatmul.mubr.msk.bf16.gmra.mrb[8].mxu1 %vm443_vm3, %v2860_v46  ;;  %2345 = vmatpush3.bf16.msra.mxu0 %v2519_v5 }
  0x79   : > { %2250 = vmatprep.mubr.msk.bf16.mxu1 %vm443_vm3, %v2889_v9  ;;  %2332 = vmatprep.mubr.msk.bf16.mxu0 %vm443_vm3, %v2748_v33  ;;  %v1122_v33 = vsel %vm2619_vm2, %v1117_v11, %v1121_v13 }
  0x7a   : > { %v2056_v39 = vcombine.low %v1112_v12, %v1122_v33 }
  0x7f   : > { %2333 = vmatmul.mubr.msk.bf16.gmra.mrb[4].mxu0 %vm443_vm3, %v2797_v26 }
  0x80   : > { %2251 = vmatmul.mubr.msk.bf16.gmra.mrb[12].mxu1 %vm443_vm3, %v2900_v19  ;;  %2336 = vmatprep.mubr.msk.bf16.mxu0 %vm443_vm3, %v2822_v54 }
  0x81   : > { %2256 = vmatprep.mubr.msk.bf16.mxu1 %vm443_vm3, %v2898_v6 }
  0x87   : > { %2337 = vmatmul.mubr.msk.bf16.gmra.mrb[8].mxu0 %vm443_vm3, %v2858_v2 }
  0x88   : > { %2257 = vmatmul.mubr.msk.bf16.vlgmr.msra.gmra.mrb[0].mxu1 %vm443_vm3, %v2909_v25  ;;  %2340 = vmatprep.mubr.msk.bf16.mxu0 %vm443_vm3, %v2056_v39 }
  0x89   : > { %2363 = vmatpush3.bf16.msra.mxu1 %v2562_v1  ;;  %2260 = vmatprep.mubr.msk.bf16.mxu1 %vm443_vm3, %v2940_v15 }
  0x8f   : > { %2341 = vmatmul.mubr.msk.bf16.gmra.mrb[12].mxu0 %vm443_vm3, %v2093_v20 }
  0x90   : > { %2261 = vmatmul.mubr.msk.bf16.gmra.mrb[4].mxu1 %vm443_vm3, %v2944_v59  ;;  %2346 = vmatprep.mubr.msk.bf16.mxu0 %vm443_vm3, %v2781_v57 }
  0x91   : > { %2264 = vmatprep.mubr.msk.bf16.mxu1 %vm443_vm3, %v2003_v53 }
  0x97   : > { %2347 = vmatmul.mubr.msk.bf16.vlgmr.msra.gmra.mrb[0].mxu0 %vm443_vm3, %v2819_v49 }
  0x98   : > { %2265 = vmatmul.mubr.msk.bf16.gmra.mrb[8].mxu1 %vm443_vm3, %v2004_v22  ;;  %2350 = vmatprep.mubr.msk.bf16.mxu0 %vm443_vm3, %v2850_v37 }
  0x99   : > { %2268 = vmatprep.mubr.msk.bf16.mxu1 %vm443_vm3, %v2005_v42 }
  0x9f   : > { %2351 = vmatmul.mubr.msk.bf16.gmra.mrb[4].mxu0 %vm443_vm3, %v2860_v46 }
  0xa0   : > { %2269 = vmatmul.mubr.msk.bf16.gmra.mrb[12].mxu1 %vm443_vm3, %v2044_v43  ;;  %2354 = vmatprep.mubr.msk.bf16.mxu0 %vm443_vm3, %v2889_v9 }
  0xa1   : > { %2282 = vmatprep.mubr.msk.bf16.mxu1 %vm443_vm3, %v2797_v26 }
  0xa7   : > { %2355 = vmatmul.mubr.msk.bf16.gmra.mrb[8].mxu0 %vm443_vm3, %v2900_v19 }
  0xa8   : > { %2283 = vmatmul.mubr.msk.bf16.vlgmr.msra.gmra.mrb[8].mxu1 %vm443_vm3, %v2822_v54  ;;  %2358 = vmatprep.mubr.msk.bf16.mxu0 %vm443_vm3, %v2934_v45 }
  0xa9   : > { %2286 = vmatprep.mubr.msk.bf16.mxu1 %vm443_vm3, %v2858_v2 }
  0xaf   : > { %2359 = vmatmul.mubr.msk.bf16.gmra.mrb[12].mxu0 %vm443_vm3, %v2106_v55 }
  0xb0   : > { %2287 = vmatmul.mubr.msk.bf16.gmra.mrb[12].mxu1 %vm443_vm3, %v2056_v39 }
 0x15b   : > { %v2258_v1 = vpop.f32.mrb[0].mxu1 }
 0x15c   : > { %v1020_v28 = vpop.f32.mrb[1].mxu1 }
 0x15d   : > { %v2259_v57 = vpop.f32.mrb[2].mxu1 }
 0x15e   : > { %v1023_v26 = vpop.f32.mrb[3].mxu1 }
 0x163   : > { %v2262_v49 = vpop.f32.mrb[4].mxu1 }
 0x164   : > { %v1036_v37 = vpop.f32.mrb[5].mxu1 }
 0x165   : > { %v2263_v54 = vpop.f32.mrb[6].mxu1 }
 0x166   : > { %v1039_v46 = vpop.f32.mrb[7].mxu1 }
 0x16a   : > { %v2348_v2 = vpop.f32.mrb[0].mxu0 }
 0x16b   : > { %v2364_v9 = vadd.f32 %v2348_v2, %v2258_v1  ;;  %v1726_v6 = vpop.f32.mrb[1].mxu0 }
 0x16c   : > { %v2365_v19 = vadd.f32 %v1726_v6, %v1020_v28  ;;  %v2349_v25 = vpop.f32.mrb[2].mxu0 }
 0x16d   : > { %1807 = vst [vmem:[%s3075_s14 + $0x10] sm:$0xff] %v2364_v9  ;;  %v2366_v27 = vadd.f32 %v2349_v25, %v2259_v57  ;;  %v1729_v32 = vpop.f32.mrb[3].mxu0  ;;  %v1844_v40 = vmul.f32 %v2364_v9, %v2364_v9 }
 0x16e   : > { %1805 = vst [vmem:[%s3075_s14] sm:$0xff] %v2365_v19  ;;  %v2367_v30 = vadd.f32 %v1729_v32, %v1023_v26  ;;  %v1842_v60 = vmul.f32 %v2365_v19, %v2365_v19 }
 0x16f   : > { %1808 = vst [vmem:[%s3075_s14 + $0x18] sm:$0xff] %v2366_v27  ;;  %v1845_v61 = vmul.f32 %v2366_v27, %v2366_v27 }
 0x170   : > { %1806 = vst [vmem:[%s3075_s14 + $0x8] sm:$0xff] %v2367_v30  ;;  %v1821_v35 = vadd.f32 %v2367_v30, %v2365_v19  ;;  %v1843_v36 = vmul.f32 %v2367_v30, %v2367_v30 }
 0x172   : > { %v1822_v38 = vadd.f32 %v2364_v9, %v1821_v35  ;;  %v1858_v47 = vadd.f32 %v1843_v36, %v1842_v60  ;;  %v2352_v45 = vpop.f32.mrb[4].mxu0 }
 0x173   : > { %v2368_v52 = vadd.f32 %v2352_v45, %v2262_v49  ;;  %v1742_v56 = vpop.f32.mrb[5].mxu0 }
 0x174   : > { %v1859_v23 = vadd.f32 %v1858_v47, %v1844_v40  ;;  %v2369_v62 = vadd.f32 %v1742_v56, %v1036_v37  ;;  %v1823_v63 = vadd.f32 %v2366_v27, %v1822_v38  ;;  %v2353_v15 = vpop.f32.mrb[6].mxu0 }
 0x175   : > { %1811 = vst [vmem:[%s3075_s14 + $0x30] sm:$0xff] %v2368_v52  ;;  %v2370_v59 = vadd.f32 %v2353_v15, %v2263_v54  ;;  %v1745_v48 = vpop.f32.mrb[7].mxu0  ;;  %v1848_v7 = vmul.f32 %v2368_v52, %v2368_v52 }
 0x176   : > { %1809 = vst [vmem:[%s3075_s14 + $0x20] sm:$0xff] %v2369_v62  ;;  %v1824_v0 = vadd.f32 %v2369_v62, %v1823_v63  ;;  %v1846_v10 = vmul.f32 %v2369_v62, %v2369_v62  ;;  %v1860_v16 = vadd.f32 %v1859_v23, %v1845_v61  ;;  %v2371_v18 = vadd.f32 %v1745_v48, %v1039_v46 }
 0x177   : > { %1812 = vst [vmem:[%s3075_s14 + $0x38] sm:$0xff] %v2370_v59  ;;  %v1849_v43 = vmul.f32 %v2370_v59, %v2370_v59 }
 0x178   : > { %v1861_v4 = vadd.f32 %v1860_v16, %v1846_v10  ;;  %1810 = vst [vmem:[%s3075_s14 + $0x28] sm:$0xff] %v2371_v18  ;;  %v1825_v50 = vadd.f32 %v2371_v18, %v1824_v0  ;;  %v1847_v55 = vmul.f32 %v2371_v18, %v2371_v18 }
 0x17a   : > { %v1826_v20 = vadd.f32 %v2368_v52, %v1825_v50  ;;  %v1862_v53 = vadd.f32 %v1861_v4, %v1847_v55  ;;  %v2356_v22 = vpop.f32.mrb[8].mxu0 }
 0x17b   : > { %v2284_v5 = vpop.f32.mrb[8].mxu1  ;;  %v1758_v42 = vpop.f32.mrb[9].mxu0 }
 0x17c   : > { %v1863_v3 = vadd.f32 %v1862_v53, %v1848_v7  ;;  %v2372_v31 = vadd.f32 %v2356_v22, %v2284_v5  ;;  %v1204_v34 = vpop.f32.mrb[9].mxu1  ;;  %v1827_v58 = vadd.f32 %v2370_v59, %v1826_v20  ;;  %v2357_v17 = vpop.f32.mrb[10].mxu0 }
 0x17d   : > { %v2373_v14 = vadd.f32 %v1758_v42, %v1204_v34  ;;  %v2285_v24 = vpop.f32.mrb[10].mxu1  ;;  %v1761_v21 = vpop.f32.mrb[11].mxu0 }
 0x17e   : > { %1815 = vst [vmem:[%s3075_s14 + $0x50] sm:$0xff] %v2372_v31  ;;  %v1864_v29 = vadd.f32 %v1863_v3, %v1849_v43  ;;  %v2374_v44 = vadd.f32 %v2357_v17, %v2285_v24  ;;  %v1207_v51 = vpop.f32.mrb[11].mxu1  ;;  %v1852_v1 = vmul.f32 %v2372_v31, %v2372_v31 }
 0x17f   : > { %1813 = vst [vmem:[%s3075_s14 + $0x40] sm:$0xff] %v2373_v14  ;;  %v1828_v41 = vadd.f32 %v2373_v14, %v1827_v58  ;;  %v1850_v8 = vmul.f32 %v2373_v14, %v2373_v14  ;;  %v2375_v11 = vadd.f32 %v1761_v21, %v1207_v51 }
 0x180   : > { %1816 = vst [vmem:[%s3075_s14 + $0x58] sm:$0xff] %v2374_v44  ;;  %v1853_v2 = vmul.f32 %v2374_v44, %v2374_v44 }
 0x181   : > { %v1865_v13 = vadd.f32 %v1864_v29, %v1850_v8  ;;  %1814 = vst [vmem:[%s3075_s14 + $0x48] sm:$0xff] %v2375_v11  ;;  %v1829_v12 = vadd.f32 %v2375_v11, %v1828_v41  ;;  %v1851_v33 = vmul.f32 %v2375_v11, %v2375_v11 }
 0x182   : > { %v2360_v39 = vpop.f32.mrb[12].mxu0 }
 0x183   : > { %v1830_v28 = vadd.f32 %v2372_v31, %v1829_v12  ;;  %v1866_v57 = vadd.f32 %v1865_v13, %v1851_v33  ;;  %v2288_v26 = vpop.f32.mrb[12].mxu1  ;;  %v1774_v49 = vpop.f32.mrb[13].mxu0 }
 0x184   : > { %v2376_v37 = vadd.f32 %v2360_v39, %v2288_v26  ;;  %v1220_v54 = vpop.f32.mrb[13].mxu1  ;;  %v2361_v46 = vpop.f32.mrb[14].mxu0 }
 0x185   : > { %v1867_v9 = vadd.f32 %v1866_v57, %v1852_v1  ;;  %v2377_v6 = vadd.f32 %v1774_v49, %v1220_v54  ;;  %v1831_v19 = vadd.f32 %v2374_v44, %v1830_v28  ;;  %v2289_v25 = vpop.f32.mrb[14].mxu1  ;;  %v1777_v27 = vpop.f32.mrb[15].mxu0 }
 0x186   : > { %1819 = vst [vmem:[%s3075_s14 + $0x70] sm:$0xff] %v2376_v37  ;;  %v2378_v32 = vadd.f32 %v2361_v46, %v2289_v25  ;;  %v1223_v30 = vpop.f32.mrb[15].mxu1  ;;  %v1856_v52 = vmul.f32 %v2376_v37, %v2376_v37 }
 0x187   : > { %1817 = vst [vmem:[%s3075_s14 + $0x60] sm:$0xff] %v2377_v6  ;;  %v1832_v60 = vadd.f32 %v2377_v6, %v1831_v19  ;;  %v1854_v35 = vmul.f32 %v2377_v6, %v2377_v6  ;;  %v1868_v36 = vadd.f32 %v1867_v9, %v1853_v2  ;;  %v2379_v40 = vadd.f32 %v1777_v27, %v1223_v30 }
 0x188   : > { %1820 = vst [vmem:[%s3075_s14 + $0x78] sm:$0xff] %v2378_v32  ;;  %v1857_v23 = vmul.f32 %v2378_v32, %v2378_v32 }
 0x189   : > { %v1869_v38 = vadd.f32 %v1868_v36, %v1854_v35  ;;  %1818 = vst [vmem:[%s3075_s14 + $0x68] sm:$0xff] %v2379_v40  ;;  %v1833_v47 = vadd.f32 %v2379_v40, %v1832_v60  ;;  %v1855_v45 = vmul.f32 %v2379_v40, %v2379_v40 }
 0x18b   : > { %v1834_v56 = vadd.f32 %v2376_v37, %v1833_v47  ;;  %v1870_v61 = vadd.f32 %v1869_v38, %v1855_v45 }
 0x18d   : > { %v1835_v62 = vadd.f32 %v2378_v32, %v1834_v56  ;;  %v1871_v63 = vadd.f32 %v1870_v61, %v1856_v52 }
 0x18f   : > { %v1836_v15 = vrot.slane %v1835_v62, 4  ;;  %v1872_v59 = vadd.f32 %v1871_v63, %v1857_v23 }
 0x191   : > { %v1837_v48 = vadd.f32 %v1836_v15, %v1835_v62  ;;  %v1873_v0 = vrot.slane %v1872_v59, 4 }
 0x193   : > { %v1838_v10 = vrot.slane %v1837_v48, 2  ;;  %v1874_v16 = vadd.f32 %v1873_v0, %v1872_v59 }
 0x195   : > { %v1839_v18 = vadd.f32 %v1838_v10, %v1837_v48  ;;  %v1875_v4 = vrot.slane %v1874_v16, 2 }
 0x197   : > { %v1840_v50 = vrot.slane %v1839_v18, 1  ;;  %v1876_v55 = vadd.f32 %v1875_v4, %v1874_v16 }
 0x199   : > { %v1877_v7 = vrot.slane %v1876_v55, 1  ;;  %v1841_v20 = vadd.f32 %v1840_v50, %v1839_v18 }
 0x19b   : > { %v1878_v53 = vadd.f32 %v1877_v7, %v1876_v55 }
 0x19d   : > { %v1880_v22 = vsel %vm1879_vm7, %v1841_v20, %v1878_v53 }
 0x19e   : > { %v1882_v5 = vsel %vm1881_vm8, %v1880_v22, 0.0 }
 0x19f   : > { %1883 = vst [vmem:[%s181_s18] sm:$0xff] %v1882_v5 }
 0x1a0 PF: > { %s14_s12 = sadd.s32 1, %s2526_s12  }
 0x1a1   : > { %p11_p4 = scmp.ge.s32.totalorder %s14_s12, 6  }
 0x1a3   :  { %13 = sbr.rel (!%p11_p4) target bundleno = 1 (0x1), region = 78 }

// kernel: first_conv_forward.5
= control target key start
LH: loop header
LB: loop body
LE: loop exit
PB: predicated region body
PF: predicated region fallthrough
CT: control target
= control target key end

     0   :  { %s403_s12 = smov 0   ;;  %s501_s0 = inlined_call_operand.vmem [shape: f32[4,8,16,128], index: 0, kind: input, shape index: {}]   ;;  %s502_s1 = inlined_call_operand.vmem [shape: f32[1,1,128], index: 1, kind: input, shape index: {}]   ;;  %s503_s2 = inlined_call_operand.vmem [shape: f32[1,1,128], index: 2, kind: input, shape index: {}]   ;;  %s504_s3 = inlined_call_operand.vmem [shape: f32[4,8,16,128], index: 3, kind: output, shape index: {}]  }
   0x1 LB: > { %s352_s13 = sadd.s32 4294967295, %s381_s12   ;;  %p356_p0 = scmp.ge.s32.totalorder %s381_s12, 1  ;;  %s381_s12 = sphi %s403_s12, %s13_s12  }
   0x2   : > { %p137_p1 = scmp.lt.s32.totalorder %s381_s12, 5 }
   0x4   : > { %p138_p2 = pnand %p356_p0, %p137_p1 }
   0x5   : > { %p161_p3 = scmp.lt.s32.totalorder (!%p138_p2), %s352_s13, 3  ;;  %v417_v0 = vld [vmem:[%s502_s1] ss:$0 sm:$0xff] (!%p138_p2) }
   0x6   : > { %141 = sbr.rel (%p138_p2) target bundleno = 42 (0x2a), region = 32  ;;  %v427_v1 = vld [vmem:[%s503_s2] ss:$0 sm:$0xff] (!%p138_p2) }
   0xd   : > { %s506_s13 = smov (!%p161_p3, %s352_s13), 3 }
   0xe   : > { %s365_s14 = sshll.u32 %s506_s13, 7 }
   0xf   : > { %s422_s19 = scalar_lea.vmem %s501_s0, %s365_s14  ;;  %s455_s24 = scalar_lea.vmem %s504_s3, %s365_s14 }
  0x10   : > { %v171_v2 = vld [vmem:[%s422_s19] sm:$0xff]  ;;  %v172_v3 = vld [vmem:[%s422_s19 + $0x8] sm:$0xff]  ;;  %v173_v4 = vld [vmem:[%s422_s19 + $0x10] sm:$0xff] }
  0x11   : > { %v194_v5 = vmul.f32 %v417_v0, %v171_v2  ;;  %v195_v6 = vmul.f32 %v417_v0, %v172_v3  ;;  %v196_v7 = vmul.f32 %v417_v0, %v173_v4  ;;  %v174_v8 = vld [vmem:[%s422_s19 + $0x18] sm:$0xff]  ;;  %v175_v9 = vld [vmem:[%s422_s19 + $0x20] sm:$0xff]  ;;  %v176_v10 = vld [vmem:[%s422_s19 + $0x28] sm:$0xff] }
  0x12   : > { %v197_v11 = vmul.f32 %v417_v0, %v174_v8  ;;  %v198_v12 = vmul.f32 %v417_v0, %v175_v9  ;;  %v199_v13 = vmul.f32 %v417_v0, %v176_v10  ;;  %v177_v14 = vld [vmem:[%s422_s19 + $0x30] sm:$0xff]  ;;  %v178_v15 = vld [vmem:[%s422_s19 + $0x38] sm:$0xff]  ;;  %v179_v24 = vld [vmem:[%s422_s19 + $0x40] sm:$0xff] }
  0x13   : > { %v217_v16 = vadd.f32 %v427_v1, %v194_v5  ;;  %v218_v17 = vadd.f32 %v427_v1, %v195_v6  ;;  %v219_v18 = vadd.f32 %v427_v1, %v196_v7  ;;  %v200_v19 = vmul.f32 %v417_v0, %v177_v14  ;;  %v180_v32 = vld [vmem:[%s422_s19 + $0x48] sm:$0xff]  ;;  %v181_v33 = vld [vmem:[%s422_s19 + $0x50] sm:$0xff]  ;;  %v182_v34 = vld [vmem:[%s422_s19 + $0x58] sm:$0xff] }
  0x14   : > { %v220_v20 = vadd.f32 %v427_v1, %v197_v11  ;;  %v221_v21 = vadd.f32 %v427_v1, %v198_v12  ;;  %v222_v22 = vadd.f32 %v427_v1, %v199_v13  ;;  %v201_v23 = vmul.f32 %v417_v0, %v178_v15  ;;  %v183_v46 = vld [vmem:[%s422_s19 + $0x60] sm:$0xff]  ;;  %v184_v47 = vld [vmem:[%s422_s19 + $0x68] sm:$0xff]  ;;  %v185_v58 = vld [vmem:[%s422_s19 + $0x70] sm:$0xff] }
  0x15   : > { %vm233_vm0 = vcmp.ge.f32.partialorder %v217_v16, 0.0  ;;  %v249_v25 = vmul.f32 0.01, %v217_v16  ;;  %vm234_vm1 = vcmp.ge.f32.partialorder %v218_v17, 0.0  ;;  %v250_v26 = vmul.f32 0.01, %v218_v17 }
  0x16   : > { %vm235_vm2 = vcmp.ge.f32.partialorder %v219_v18, 0.0  ;;  %v251_v27 = vmul.f32 0.01, %v219_v18  ;;  %vm236_vm3 = vcmp.ge.f32.partialorder %v220_v20, 0.0  ;;  %v252_v28 = vmul.f32 0.01, %v220_v20 }
  0x17   : > { %v265_v29 = vsel %vm233_vm0, %v217_v16, %v249_v25  ;;  %v266_v30 = vsel %vm234_vm1, %v218_v17, %v250_v26  ;;  %vm237_vm4 = vcmp.ge.f32.partialorder %v221_v21, 0.0  ;;  %v253_v31 = vmul.f32 0.01, %v221_v21  ;;  %v186_v59 = vld [vmem:[%s422_s19 + $0x78] sm:$0xff] }
  0x18   : > { %281 = vst [vmem:[%s455_s24] sm:$0xff] %v265_v29  ;;  %282 = vst [vmem:[%s455_s24 + $0x8] sm:$0xff] %v266_v30  ;;  %v267_v35 = vsel %vm235_vm2, %v219_v18, %v251_v27  ;;  %v268_v36 = vsel %vm236_vm3, %v220_v20, %v252_v28  ;;  %vm238_vm5 = vcmp.ge.f32.partialorder %v222_v22, 0.0  ;;  %v254_v37 = vmul.f32 0.01, %v222_v22 }
  0x19   : > { %283 = vst [vmem:[%s455_s24 + $0x10] sm:$0xff] %v267_v35  ;;  %284 = vst [vmem:[%s455_s24 + $0x18] sm:$0xff] %v268_v36  ;;  %v269_v38 = vsel %vm237_vm4, %v221_v21, %v253_v31  ;;  %v223_v39 = vadd.f32 %v427_v1, %v200_v19  ;;  %v224_v40 = vadd.f32 %v427_v1, %v201_v23 }
  0x1a   : > { %v202_v41 = vmul.f32 %v417_v0, %v179_v24  ;;  %285 = vst [vmem:[%s455_s24 + $0x20] sm:$0xff] %v269_v38  ;;  %v270_v42 = vsel %vm238_vm5, %v222_v22, %v254_v37  ;;  %v203_v43 = vmul.f32 %v417_v0, %v180_v32  ;;  %v204_v44 = vmul.f32 %v417_v0, %v181_v33 }
  0x1b   : > { %v205_v45 = vmul.f32 %v417_v0, %v182_v34  ;;  %286 = vst [vmem:[%s455_s24 + $0x28] sm:$0xff] %v270_v42  ;;  %vm239_vm6 = vcmp.ge.f32.partialorder %v223_v39, 0.0  ;;  %v255_v48 = vmul.f32 0.01, %v223_v39  ;;  %vm240_vm7 = vcmp.ge.f32.partialorder %v224_v40, 0.0 }
  0x1c   : > { %v256_v49 = vmul.f32 0.01, %v224_v40  ;;  %v225_v50 = vadd.f32 %v427_v1, %v202_v41  ;;  %v226_v51 = vadd.f32 %v427_v1, %v203_v43  ;;  %v227_v52 = vadd.f32 %v427_v1, %v204_v44 }
  0x1d   : > { %v228_v53 = vadd.f32 %v427_v1, %v205_v45  ;;  %v271_v54 = vsel %vm239_vm6, %v223_v39, %v255_v48  ;;  %v206_v56 = vmul.f32 %v417_v0, %v183_v46  ;;  %v207_v57 = vmul.f32 %v417_v0, %v184_v47 }
  0x1e   : > { %v272_v55 = vsel %vm240_vm7, %v224_v40, %v256_v49  ;;  %287 = vst [vmem:[%s455_s24 + $0x30] sm:$0xff] %v271_v54  ;;  %vm241_vm8 = vcmp.ge.f32.partialorder %v225_v50, 0.0  ;;  %v257_v60 = vmul.f32 0.01, %v225_v50  ;;  %vm242_vm9 = vcmp.ge.f32.partialorder %v226_v51, 0.0 }
  0x1f   : > { %288 = vst [vmem:[%s455_s24 + $0x38] sm:$0xff] %v272_v55  ;;  %v258_v61 = vmul.f32 0.01, %v226_v51  ;;  %vm243_vm10 = vcmp.ge.f32.partialorder %v227_v52, 0.0  ;;  %v259_v62 = vmul.f32 0.01, %v227_v52  ;;  %v229_v4 = vadd.f32 %v427_v1, %v206_v56 }
  0x20   : > { %vm244_vm11 = vcmp.ge.f32.partialorder %v228_v53, 0.0  ;;  %v260_v63 = vmul.f32 0.01, %v228_v53  ;;  %v273_v2 = vsel %vm241_vm8, %v225_v50, %v257_v60  ;;  %v230_v5 = vadd.f32 %v427_v1, %v207_v57 }
  0x21   : > { %v274_v3 = vsel %vm242_vm9, %v226_v51, %v258_v61  ;;  %289 = vst [vmem:[%s455_s24 + $0x40] sm:$0xff] %v273_v2  ;;  %v275_v6 = vsel %vm243_vm10, %v227_v52, %v259_v62  ;;  %v208_v8 = vmul.f32 %v417_v0, %v185_v58  ;;  %v209_v9 = vmul.f32 %v417_v0, %v186_v59 }
  0x22   : > { %290 = vst [vmem:[%s455_s24 + $0x48] sm:$0xff] %v274_v3  ;;  %v276_v7 = vsel %vm244_vm11, %v228_v53, %v260_v63  ;;  %291 = vst [vmem:[%s455_s24 + $0x50] sm:$0xff] %v275_v6  ;;  %vm245_vm12 = vcmp.ge.f32.partialorder %v229_v4, 0.0  ;;  %v261_v10 = vmul.f32 0.01, %v229_v4  ;;  %vm246_vm13 = vcmp.ge.f32.partialorder %v230_v5, 0.0 }
  0x23   : > { %292 = vst [vmem:[%s455_s24 + $0x58] sm:$0xff] %v276_v7  ;;  %v262_v11 = vmul.f32 0.01, %v230_v5  ;;  %v231_v12 = vadd.f32 %v427_v1, %v208_v8  ;;  %v232_v13 = vadd.f32 %v427_v1, %v209_v9 }
  0x24   : > { %v277_v14 = vsel %vm245_vm12, %v229_v4, %v261_v10 }
  0x25   : > { %v278_v15 = vsel %vm246_vm13, %v230_v5, %v262_v11  ;;  %293 = vst [vmem:[%s455_s24 + $0x60] sm:$0xff] %v277_v14  ;;  %vm247_vm14 = vcmp.ge.f32.partialorder %v231_v12, 0.0  ;;  %v263_v16 = vmul.f32 0.01, %v231_v12  ;;  %vm248_vm15 = vcmp.ge.f32.partialorder %v232_v13, 0.0 }
  0x26   : > { %294 = vst [vmem:[%s455_s24 + $0x68] sm:$0xff] %v278_v15  ;;  %v264_v0 = vmul.f32 0.01, %v232_v13 }
  0x27   : > { %v279_v17 = vsel %vm247_vm14, %v231_v12, %v263_v16 }
  0x28   : > { %v280_v18 = vsel %vm248_vm15, %v232_v13, %v264_v0  ;;  %295 = vst [vmem:[%s455_s24 + $0x70] sm:$0xff] %v279_v17 }
  0x29   : > { %296 = vst [vmem:[%s455_s24 + $0x78] sm:$0xff] %v280_v18 }
  0x2a PF: > { %s13_s12 = sadd.s32 1, %s381_s12  }
  0x2b   : > { %p10_p4 = scmp.ge.s32.totalorder %s13_s12, 6  }
  0x2d   :  { %12 = sbr.rel (!%p10_p4) target bundleno = 1 (0x1), region = 62 }

// kernel: first_conv_forward.4
= control target key start
LH: loop header
LB: loop body
LE: loop exit
PB: predicated region body
PF: predicated region fallthrough
CT: control target
= control target key end

     0   :  { %s3440_s18 = smov 0   ;;  %s4318_s0 = inlined_call_operand.vmem [shape: f32[4,10,18,128], index: 0, kind: input, shape index: {}]   ;;  %s4319_s1 = inlined_call_operand.vmem [shape: bf16[3,3,128,128], index: 1, kind: input, shape index: {}]   ;;  %s4320_s2 = inlined_call_operand.vmem [shape: f32[1,1,128], index: 2, kind: input, shape index: {}]   ;;  %s4321_s3 = inlined_call_operand.vmem [shape: f32[1,1,128], index: 3, kind: input, shape index: {}]   ;;  %s4322_s4 = inlined_call_operand.vmem [shape: f32[4,8,16,128], index: 4, kind: output, shape index: {0}]   ;;  %s4323_s5 = inlined_call_operand.vmem [shape: f32[4,8,128], index: 5, kind: output, shape index: {1}]  }
   0x1 LB: > { %s2452_s19 = sadd.s32 4294967295, %s3407_s18   ;;  %p2456_p0 = scmp.ge.s32.totalorder %s3407_s18, 1  ;;  %s3407_s18 = sphi %s3440_s18, %s16_s18  }
   0x2   : > { %p190_p1 = scmp.lt.s32.totalorder %s3407_s18, 5 }
   0x4   : > { %p191_p2 = pnand %p2456_p0, %p190_p1 }
   0x5   : > { %v3327_v0 = vld [vmem:[%s4319_s1 + $0x40] sm:$0xff] (!%p191_p2)   ;;  %p222_p3 = scmp.lt.s32.totalorder (!%p191_p2), %s2452_s19, 3  ;;  %p431_p4 = scmp.lt.s32.totalorder (!%p191_p2), %s2452_s19, 0  ;;  %v3329_v2 = vld [vmem:[%s4319_s1 + $0x48] sm:$0xff] (!%p191_p2)   ;;  %v3331_v4 = vld [vmem:[%s4319_s1 + $0x50] sm:$0xff] (!%p191_p2)   ;;  %v443_v6 = vlaneseq (!%p191_p2) }
   0x6   : > { %194 = sbr.rel (%p191_p2) target bundleno = 454 (0x1c6), region = 36  ;;  %v3328_v1 = vld [vmem:[%s4319_s1 + $0x100] sm:$0xff] (!%p191_p2)   ;;  %2885 = vmatprep.subr.bf16.mxu1 (!%p191_p2), %v3327_v0  ;;  %v3330_v3 = vld [vmem:[%s4319_s1 + $0x108] sm:$0xff] (!%p191_p2)   ;;  %s432_s29 = ssub.s32 (!%p191_p2), 0, %s2452_s19  ;;  %v3332_v5 = vld [vmem:[%s4319_s1 + $0x110] sm:$0xff] (!%p191_p2)  }
   0x7   : > { %3013 = vmatprep.subr.bf16.mxu0 (!%p191_p2), %v3328_v1  ;;  %2886 = vmatpush3.bf16.msra.mxu1 (!%p191_p2), %v3327_v0  ;;  %s2463_s7 = smin.u32 (!%p191_p2), %s2452_s19, %s432_s29  ;;  %v3333_v7 = vld [vmem:[%s4319_s1 + $0x58] sm:$0xff] (!%p191_p2)   ;;  %v3478_v9 = vshrl.u32 (!%p191_p2), %v443_v6, 7  ;;  %v3335_v10 = vld [vmem:[%s4319_s1 + $0x60] sm:$0xff] (!%p191_p2)   ;;  %v3337_v12 = vld [vmem:[%s4319_s1 + $0x68] sm:$0xff] (!%p191_p2)   ;;  %vm542_vm11 = vsmask.f32 (!%p191_p2), 7424 }
   0x8   : > { %3014 = vmatpush3.bf16.msra.mxu0 (!%p191_p2), %v3328_v1  ;;  %2887 = vmatprep.subr.bf16.mxu1 (!%p191_p2), %v3329_v2  ;;  %s434_s10 = sand.u32 (!%p191_p2), 1, %s2463_s7   ;;  %v3334_v8 = vld [vmem:[%s4319_s1 + $0x118] sm:$0xff] (!%p191_p2)   ;;  %v3336_v11 = vld [vmem:[%s4319_s1 + $0x120] sm:$0xff] (!%p191_p2)   ;;  %v3338_v17 = vld [vmem:[%s4319_s1 + $0x128] sm:$0xff] (!%p191_p2)  }
   0x9   : > { %3015 = vmatprep.subr.bf16.mxu0 (!%p191_p2), %v3330_v3  ;;  %s435_s11 = ssub.s32 (!%p191_p2), 0, %s434_s10  ;;  %v3496_v13 = vadd.s32 (!%p191_p2), 16, %v3478_v9  ;;  %v3507_v18 = vld [vmem:[%s4320_s2] ss:$0 sm:$0xff] (!%p191_p2)  ;;  %vm447_vm0 = vcmp.ge.s32.totalorder (!%p191_p2), %v3478_v9, 1  ;;  %v3339_v31 = vld [vmem:[%s4319_s1 + $0x70] sm:$0xff] (!%p191_p2)  }
   0xa   : > { %v3512_v19 = vld [vmem:[%s4321_s3] ss:$0 sm:$0xff] (!%p191_p2)  ;;  %v3340_v36 = vld [vmem:[%s4319_s1 + $0x130] sm:$0xff] (!%p191_p2)   ;;  %v3341_v41 = vld [vmem:[%s4319_s1 + $0x78] sm:$0xff] (!%p191_p2)  }
   0xb   : > { %2888 = vmatpush3.bf16.msra.mxu1 (!%p191_p2), %v3329_v2  ;;  %vm452_vm2 = vcmp.le.s32.totalorder (!%p191_p2), %v3496_v13, 16  ;;  %v3342_v47 = vld [vmem:[%s4319_s1 + $0x138] sm:$0xff] (!%p191_p2)  }
   0xc   : > { %3016 = vmatpush3.bf16.msra.mxu0 (!%p191_p2), %v3330_v3  ;;  %2889 = vmatprep.subr.bf16.mxu1 (!%p191_p2), %v3331_v4  ;;  %v3343_v3 = vld [vmem:[%s4319_s1] sm:$0xff] (!%p191_p2)   ;;  %v3373_v13 = vld [vmem:[%s4319_s1 + $0xb8] sm:$0xff] (!%p191_p2)  }
   0xd   : > { %s3457_s26 = scalar_select %p222_p3, %s2452_s19, 3  ;;  %3017 = vmatprep.subr.bf16.mxu0 %v3332_v5 }
   0xe   : > { %s4337_s11 = smov (!%p431_p4, %s435_s11), %s434_s10 }
   0xf   : > { %s3317_s14 = smul.u32 240, %s3457_s26  ;;  %p2465_p5 = scmp.lt.s32.totalorder %s4337_s11, 0  ;;  %2890 = vmatpush3.bf16.msra.mxu1 %v3331_v4 }
  0x10   : > { %s441_s17 = sadd.s32 2, %s4337_s11  ;;  %3018 = vmatpush3.bf16.msra.mxu0 %v3332_v5  ;;  %2891 = vmatprep.subr.bf16.mxu1 %v3333_v7  ;;  %s2740_s28 = sshll.u32 %s3457_s26, 7 }
  0x11   : > { %s4339_s17 = smov (!%p2465_p5, %s441_s17), %s4337_s11  ;;  %3019 = vmatprep.subr.bf16.mxu0 %v3334_v8  ;;  %s3489_s25 = scalar_lea.vmem %s4318_s0, %s3317_s14 }
  0x12   : > { %p456_p6 = scmp.gt.s32.totalorder %s4339_s17, 0  ;;  %v237_v14 = vld [vmem:[%s3489_s25] sm:$0xff]  ;;  %v238_v15 = vld [vmem:[%s3489_s25 + $0x8] sm:$0xff]  ;;  %v239_v16 = vld [vmem:[%s3489_s25 + $0x10] sm:$0x3]  ;;  %p466_p7 = scmp.lt.s32.totalorder %s4339_s17, 1 }
  0x13   : > { %2892 = vmatpush3.bf16.msra.mxu1 %v3333_v7  ;;  %v274_v20 = vmul.f32 %v3507_v18, %v237_v14  ;;  %v275_v21 = vmul.f32 %v3507_v18, %v238_v15  ;;  %v276_v22 = vmul.f32 %v3507_v18, %v239_v16  ;;  %v240_v24 = vld [vmem:[%s3489_s25 + $0x18] sm:$0xff]  ;;  %v241_v25 = vld [vmem:[%s3489_s25 + $0x20] sm:$0xff]  ;;  %v242_v26 = vld [vmem:[%s3489_s25 + $0x28] sm:$0x3]  ;;  %s4259_s6 = scalar_lea.vmem %s4322_s4, %s2740_s28  ;;  %s2460_s7 = sshll.u32 %s3457_s26, 3 }
  0x14   : > { %3020 = vmatpush3.bf16.msra.mxu0 %v3334_v8  ;;  %2893 = vmatprep.subr.bf16.mxu1 %v3335_v10  ;;  %s457_s29 = scalar_select %p456_p6, 1, 0  ;;  %v277_v28 = vmul.f32 %v3507_v18, %v240_v24  ;;  %v278_v29 = vmul.f32 %v3507_v18, %v241_v25  ;;  %v279_v30 = vmul.f32 %v3507_v18, %v242_v26  ;;  %v243_v35 = vld [vmem:[%s3489_s25 + $0x30] sm:$0xff]  ;;  %v244_v55 = vld [vmem:[%s3489_s25 + $0x38] sm:$0xff]  ;;  %v245_v56 = vld [vmem:[%s3489_s25 + $0x40] sm:$0x3] }
  0x15   : > { %3021 = vmatprep.subr.bf16.mxu0 %v3336_v11  ;;  %v311_v32 = vadd.f32 %v3512_v19, %v274_v20  ;;  %v312_v33 = vadd.f32 %v3512_v19, %v275_v21  ;;  %v313_v34 = vadd.f32 %v3512_v19, %v276_v22  ;;  %v280_v40 = vmul.f32 %v3507_v18, %v243_v35  ;;  %v246_v16 = vld [vmem:[%s3489_s25 + $0x48] sm:$0xff]  ;;  %v249_v35 = vld [vmem:[%s3489_s25 + $0x60] sm:$0xff]  ;;  %s467_s21 = scalar_select %p466_p7, 1, 0 }
  0x16   : > { %v458_v23 = vstv %s457_s29  ;;  %v314_v37 = vadd.f32 %v3512_v19, %v277_v28  ;;  %v315_v38 = vadd.f32 %v3512_v19, %v278_v29  ;;  %v316_v39 = vadd.f32 %v3512_v19, %v279_v30  ;;  %v248_v28 = vld [vmem:[%s3489_s25 + $0x58] sm:$0x3]  ;;  %v250_v46 = vld [vmem:[%s3489_s25 + $0x68] sm:$0xff]  ;;  %s235_s10 = scalar_lea.vmem %s4323_s5, %s2460_s7 }
  0x17   : > { %2894 = vmatpush3.bf16.msra.mxu1 %v3335_v10  ;;  %vm3521_vm1 = vcmp.eq.s32.totalorder %v458_v23, 1  ;;  %vm341_vm3 = vcmp.ge.f32.partialorder %v311_v32, 0.0  ;;  %vm342_vm4 = vcmp.ge.f32.partialorder %v312_v33, 0.0  ;;  %vm343_vm5 = vcmp.ge.f32.partialorder %v313_v34, 0.0  ;;  %v3612_v10 = vld [vmem:[%s4319_s1 + $0x140] sm:$0xff]   ;;  %v247_v23 = vld [vmem:[%s3489_s25 + $0x50] sm:$0xff] }
  0x18   : > { %3022 = vmatpush3.bf16.msra.mxu0 %v3336_v11  ;;  %2895 = vmatprep.subr.bf16.mxu1 %v3337_v12  ;;  %v371_v42 = vmul.f32 0.01, %v311_v32  ;;  %vm3550_vm6 = vmand %vm447_vm0, %vm3521_vm1  ;;  %v372_v44 = vmul.f32 0.01, %v312_v33  ;;  %v373_v45 = vmul.f32 0.01, %v313_v34  ;;  %v281_v4 = vmul.f32 %v3507_v18, %v244_v55 }
  0x19   : > { %3023 = vmatprep.subr.bf16.mxu0 %v3338_v17  ;;  %vm3558_vm7 = vmand %vm452_vm2, %vm3521_vm1  ;;  %vm344_vm8 = vcmp.ge.f32.partialorder %v314_v37, 0.0  ;;  %vm345_vm9 = vcmp.ge.f32.partialorder %v315_v38, 0.0  ;;  %vm346_vm10 = vcmp.ge.f32.partialorder %v316_v39, 0.0  ;;  %v374_v49 = vmul.f32 0.01, %v314_v37 }
  0x1a   : > { %v3565_v48 = vsel %vm341_vm3, %v311_v32, %v371_v42  ;;  %v375_v50 = vmul.f32 0.01, %v315_v38  ;;  %v3568_v51 = vsel %vm342_vm4, %v312_v33, %v372_v44  ;;  %v403_v52 = vsel %vm343_vm5, %v313_v34, %v373_v45 }
  0x1b   : > { %2896 = vmatpush3.bf16.msra.mxu1 %v3337_v12  ;;  %v476_v53 = vsel %vm3550_vm6, %v3565_v48, 0.0  ;;  %v376_v54 = vmul.f32 0.01, %v316_v39  ;;  %v477_v57 = vsel %vm3521_vm1, %v3568_v51, 0.0  ;;  %v478_v58 = vsel %vm3558_vm7, %v403_v52, 0.0 }
  0x1c   : > { %3024 = vmatpush3.bf16.msra.mxu0 %v3338_v17  ;;  %2897 = vmatprep.subr.bf16.mxu1 %v3339_v31  ;;  %v3582_v59 = vsel %vm344_vm8, %v314_v37, %v374_v49  ;;  %v3585_v60 = vsel %vm345_vm9, %v315_v38, %v375_v50  ;;  %v3587_v61 = vpack.c.bf16 %v477_v57, %v476_v53  ;;  %v251_v57 = vld [vmem:[%s3489_s25 + $0x70] sm:$0x3] }
  0x1d   : > { %3025 = vmatprep.subr.bf16.mxu0 %v3340_v36  ;;  %v3589_v62 = vpack.c.bf16 %v478_v58, %v478_v58  ;;  %v406_v63 = vsel %vm346_vm10, %v316_v39, %v376_v54  ;;  %v479_v0 = vsel %vm447_vm0, %v3582_v59, 0.0  ;;  %v282_v14 = vmul.f32 %v3507_v18, %v245_v56  ;;  %v3345_v39 = vld [vmem:[%s4319_s1 + $0x8] sm:$0xff]  }
  0x1e   : > { %v481_v1 = vsel %vm452_vm2, %v406_v63, 0.0  ;;  %v3598_v2 = vpack.c.bf16 %v3585_v60, %v479_v0  ;;  %v544_v5 = vshrl.u32 %v3587_v61, 16  ;;  %v546_v6 = vshll.u32 %v3587_v61, 16  ;;  %v3347_v0 = vld [vmem:[%s4319_s1 + $0x10] sm:$0xff]  }
  0x1f   : > { %2898 = vmatpush3.bf16.msra.mxu1 %v3339_v31  ;;  %v551_v7 = vshll.u32 %v3589_v62, 16  ;;  %v3607_v8 = vpack.c.bf16 %v481_v1, %v481_v1  ;;  %v317_v15 = vadd.f32 %v3512_v19, %v280_v40  ;;  %v318_v22 = vadd.f32 %v3512_v19, %v281_v4 }
  0x20   : > { %3026 = vmatpush3.bf16.msra.mxu0 %v3340_v36  ;;  %2899 = vmatprep.subr.bf16.mxu1 %v3341_v41  ;;  %v556_v11 = vshrl.u32 %v3598_v2, 16  ;;  %v558_v12 = vshll.u32 %v3598_v2, 16  ;;  %v548_v17 = vrot.slane %v546_v6, 1  ;;  %v319_v25 = vadd.f32 %v3512_v19, %v282_v14  ;;  %v3346_v6 = vld [vmem:[%s4319_s1 + $0x148] sm:$0xff]   ;;  %v252_v14 = vld [vmem:[%s3489_s25 + $0x78] sm:$0xff] }
  0x21   : > { %3027 = vmatprep.subr.bf16.mxu0 %v3342_v47  ;;  %v553_v20 = vrot.slane %v551_v7, 1  ;;  %v563_v21 = vshll.u32 %v3607_v8, 16  ;;  %vm347_vm12 = vcmp.ge.f32.partialorder %v317_v15, 0.0  ;;  %v377_v26 = vmul.f32 0.01, %v317_v15 }
  0x22   : > { %v560_v24 = vrot.slane %v558_v12, 1  ;;  %v549_v29 = vor.u32 %v548_v17, %v544_v5  ;;  %vm348_vm13 = vcmp.ge.f32.partialorder %v318_v22, 0.0  ;;  %v378_v31 = vmul.f32 0.01, %v318_v22 }
  0x23   : > { %2900 = vmatpush3.bf16.msra.mxu1 %v3341_v41  ;;  %v565_v30 = vrot.slane %v563_v21, 1  ;;  %vm349_vm14 = vcmp.ge.f32.partialorder %v319_v25, 0.0  ;;  %v379_v33 = vmul.f32 0.01, %v319_v25  ;;  %v3625_v34 = vsel %vm347_vm12, %v317_v15, %v377_v26 }
  0x24   : > { %3028 = vmatpush3.bf16.msra.mxu0 %v3342_v47  ;;  %2917 = vmatprep.subr.bf16.mxu1 %v3343_v3  ;;  %v561_v32 = vor.u32 %v560_v24, %v556_v11  ;;  %v554_v36 = vsel %vm542_vm11, %v549_v29, %v553_v20  ;;  %v3629_v37 = vsel %vm348_vm13, %v318_v22, %v378_v31  ;;  %v482_v38 = vsel %vm447_vm0, %v3625_v34, 0.0  ;;  %v254_v31 = vld [vmem:[%s3489_s25 + $0x88] sm:$0x3] }
  0x25   : > { %3045 = vmatprep.subr.bf16.mxu0 %v3612_v10  ;;  %v283_v40 = vmul.f32 %v3507_v18, %v246_v16  ;;  %2901 = vmatprep.mubr.bf16.mxu1 %v554_v36  ;;  %v409_v42 = vsel %vm349_vm14, %v319_v25, %v379_v33  ;;  %v3640_v44 = vpack.c.bf16 %v3629_v37, %v482_v38  ;;  %v3349_v25 = vld [vmem:[%s4319_s1 + $0x18] sm:$0xff]   ;;  %v974_v43 = vrot.slane %v3598_v2, 1 }
  0x26   : > { %v566_v41 = vsel %vm542_vm11, %v561_v32, %v565_v30  ;;  %v284_v45 = vmul.f32 %v3507_v18, %v247_v23  ;;  %v484_v47 = vsel %vm452_vm2, %v409_v42, 0.0  ;;  %v285_v49 = vmul.f32 %v3507_v18, %v248_v28  ;;  %v253_v30 = vld [vmem:[%s3489_s25 + $0x80] sm:$0xff] }
  0x27   : > { %3029 = vmatprep.mubr.bf16.mxu0 %v566_v41  ;;  %2902 = vmatmul.mubr.bf16.vlgmr.msra.gmra.mrb[0].mxu1 %v566_v41  ;;  %v320_v50 = vadd.f32 %v3512_v19, %v283_v40  ;;  %v286_v52 = vmul.f32 %v3507_v18, %v249_v35  ;;  %v3649_v53 = vpack.c.bf16 %v484_v47, %v484_v47  ;;  %v568_v54 = vshrl.u32 %v3640_v44, 16 }
  0x28   : > { %v570_v55 = vshll.u32 %v3640_v44, 16  ;;  %2918 = vmatpush3.bf16.msra.mxu1 %v3343_v3  ;;  %v321_v56 = vadd.f32 %v3512_v19, %v284_v45  ;;  %v322_v58 = vadd.f32 %v3512_v19, %v285_v49  ;;  %v287_v1 = vmul.f32 %v3507_v18, %v250_v46  ;;  %v3348_v45 = vld [vmem:[%s4319_s1 + $0x150] sm:$0xff]  }
  0x29   : > { %2919 = vmatprep.subr.bf16.mxu1 %v3345_v39  ;;  %vm350_vm15 = vcmp.ge.f32.partialorder %v320_v50, 0.0  ;;  %v380_v63 = vmul.f32 0.01, %v320_v50  ;;  %v575_v5 = vshll.u32 %v3649_v53, 16  ;;  %v288_v12 = vmul.f32 %v3507_v18, %v251_v57 }
  0x2a   : > { %v572_v4 = vrot.slane %v570_v55, 1  ;;  %vm351_vm3 = vcmp.ge.f32.partialorder %v321_v56, 0.0  ;;  %v381_v3 = vmul.f32 0.01, %v321_v56  ;;  %vm352_vm4 = vcmp.ge.f32.partialorder %v322_v58, 0.0 }
  0x2b   : > { %v382_v7 = vmul.f32 0.01, %v322_v58  ;;  %v3664_v11 = vsel %vm350_vm15, %v320_v50, %v380_v63  ;;  %v577_v16 = vrot.slane %v575_v5, 1  ;;  %v323_v23 = vadd.f32 %v3512_v19, %v286_v52  ;;  %v255_v63 = vld [vmem:[%s3489_s25 + $0x90] sm:$0xff] }
  0x2c   : > { %v573_v15 = vor.u32 %v572_v4, %v568_v54  ;;  %2920 = vmatpush3.bf16.msra.mxu1 %v3345_v39  ;;  %v3668_v17 = vsel %vm351_vm3, %v321_v56, %v381_v3  ;;  %v485_v20 = vsel %vm447_vm0, %v3664_v11, 0.0  ;;  %v324_v24 = vadd.f32 %v3512_v19, %v287_v1  ;;  %v256_v3 = vld [vmem:[%s3489_s25 + $0x98] sm:$0xff] }
  0x2d   : > { %v412_v21 = vsel %vm352_vm4, %v322_v58, %v382_v7  ;;  %v3674_v22 = vpack.c.bf16 %v3668_v17, %v485_v20  ;;  %2921 = vmatprep.subr.bf16.mxu1 %v3347_v0  ;;  %v325_v29 = vadd.f32 %v3512_v19, %v288_v12  ;;  %v289_v32 = vmul.f32 %v3507_v18, %v252_v14  ;;  %v3350_v58 = vld [vmem:[%s4319_s1 + $0x158] sm:$0xff]   ;;  %v257_v7 = vld [vmem:[%s3489_s25 + $0xa0] sm:$0x3] }
  0x2e   : > { %v3682_v26 = vsel %vm542_vm11, %v573_v15, %v577_v16  ;;  %v487_v28 = vsel %vm452_vm2, %v412_v21, 0.0  ;;  %vm353_vm5 = vcmp.ge.f32.partialorder %v323_v23, 0.0  ;;  %vm354_vm7 = vcmp.ge.f32.partialorder %v324_v24, 0.0  ;;  %v3353_v15 = vld [vmem:[%s4319_s1 + $0x28] sm:$0xff]  }
  0x2f   : > { %3030 = vmatmul.mubr.bf16.vlgmr.msra.gmra.mrb[0].mxu0 %v3682_v26  ;;  %2905 = vmatprep.mubr.bf16.mxu1 %v3682_v26  ;;  %v3692_v33 = vpack.c.bf16 %v487_v28, %v487_v28  ;;  %v580_v35 = vshrl.u32 %v3674_v22, 16  ;;  %v582_v36 = vshll.u32 %v3674_v22, 16  ;;  %vm355_vm8 = vcmp.ge.f32.partialorder %v325_v29, 0.0  ;;  %v258_v28 = vld [vmem:[%s3489_s25 + $0xa8] sm:$0xff] }
  0x30   : > { %3046 = vmatpush3.bf16.msra.mxu0 %v3612_v10  ;;  %v383_v38 = vmul.f32 0.01, %v323_v23  ;;  %v384_v39 = vmul.f32 0.01, %v324_v24  ;;  %2922 = vmatpush3.bf16.msra.mxu1 %v3347_v0  ;;  %v385_v42 = vmul.f32 0.01, %v325_v29  ;;  %v290_v46 = vmul.f32 %v3507_v18, %v253_v30 }
  0x31   : > { %3047 = vmatprep.subr.bf16.mxu0 %v3346_v6  ;;  %v584_v40 = vrot.slane %v582_v36, 1  ;;  %v587_v41 = vshll.u32 %v3692_v33, 16  ;;  %2923 = vmatprep.subr.bf16.mxu1 %v3349_v25  ;;  %v3351_v10 = vld [vmem:[%s4319_s1 + $0x20] sm:$0xff]   ;;  %v291_v50 = vmul.f32 %v3507_v18, %v254_v31  ;;  %v326_v52 = vadd.f32 %v3512_v19, %v289_v32 }
  0x32   : > { %v3705_v47 = vsel %vm353_vm5, %v323_v23, %v383_v38  ;;  %v3707_v49 = vsel %vm354_vm7, %v324_v24, %v384_v39  ;;  %v415_v56 = vsel %vm355_vm8, %v325_v29, %v385_v42  ;;  %v327_v4 = vadd.f32 %v3512_v19, %v290_v46 }
  0x33   : > { %v585_v54 = vor.u32 %v584_v40, %v580_v35  ;;  %v589_v55 = vrot.slane %v587_v41, 1  ;;  %v488_v57 = vsel %vm447_vm0, %v3705_v47, 0.0  ;;  %v490_v0 = vsel %vm452_vm2, %v415_v56, 0.0  ;;  %v3352_v35 = vld [vmem:[%s4319_s1 + $0x160] sm:$0xff]   ;;  %v259_v41 = vld [vmem:[%s3489_s25 + $0xb0] sm:$0xff] }
  0x34   : > { %3048 = vmatpush3.bf16.msra.mxu0 %v3346_v6  ;;  %v3722_v1 = vpack.c.bf16 %v3707_v49, %v488_v57  ;;  %2924 = vmatpush3.bf16.msra.mxu1 %v3349_v25  ;;  %v328_v5 = vadd.f32 %v3512_v19, %v291_v50  ;;  %v3731_v14 = vpack.c.bf16 %v490_v0, %v490_v0  ;;  %vm356_vm9 = vcmp.ge.f32.partialorder %v326_v52, 0.0  ;;  %v260_v50 = vld [vmem:[%s3489_s25 + $0xb8] sm:$0x3] }
  0x35   : > { %v3729_v12 = vsel %vm542_vm11, %v585_v54, %v589_v55  ;;  %3049 = vmatprep.subr.bf16.mxu0 %v3348_v45  ;;  %v386_v6 = vmul.f32 0.01, %v326_v52  ;;  %2925 = vmatprep.subr.bf16.mxu1 %v3351_v10  ;;  %vm357_vm10 = vcmp.ge.f32.partialorder %v327_v4, 0.0  ;;  %v387_v23 = vmul.f32 0.01, %v327_v4 }
  0x36   : > { %3033 = vmatprep.mubr.bf16.mxu0 %v3729_v12  ;;  %2906 = vmatmul.mubr.bf16.gmra.mrb[4].mxu1 %v3729_v12  ;;  %v592_v16 = vshrl.u32 %v3722_v1, 16  ;;  %v594_v20 = vshll.u32 %v3722_v1, 16  ;;  %vm358_vm12 = vcmp.ge.f32.partialorder %v328_v5, 0.0  ;;  %v599_v21 = vshll.u32 %v3731_v14, 16 }
  0x37   : > { %v388_v24 = vmul.f32 0.01, %v328_v5  ;;  %v3741_v25 = vsel %vm356_vm9, %v326_v52, %v386_v6  ;;  %v292_v31 = vmul.f32 %v3507_v18, %v255_v63  ;;  %v293_v32 = vmul.f32 %v3507_v18, %v256_v3  ;;  %v3355_v52 = vld [vmem:[%s4319_s1 + $0x30] sm:$0xff]  }
  0x38   : > { %v596_v29 = vrot.slane %v594_v20, 1  ;;  %3050 = vmatpush3.bf16.msra.mxu0 %v3348_v45  ;;  %v491_v30 = vsel %vm447_vm0, %v3741_v25, 0.0  ;;  %2926 = vmatpush3.bf16.msra.mxu1 %v3351_v10  ;;  %v601_v36 = vrot.slane %v599_v21, 1  ;;  %v3753_v38 = vsel %vm357_vm10, %v327_v4, %v387_v23  ;;  %vm2498_vm10 = vmpackc.low %vm3521_vm1, %vm3550_vm6 }
  0x39   : > { %3051 = vmatprep.subr.bf16.mxu0 %v3350_v58  ;;  %v418_v39 = vsel %vm358_vm12, %v328_v5, %v388_v24  ;;  %v294_v40 = vmul.f32 %v3507_v18, %v257_v7  ;;  %2927 = vmatprep.subr.bf16.mxu1 %v3353_v15  ;;  %v3761_v46 = vpack.c.bf16 %v3753_v38, %v491_v30  ;;  %v3354_v5 = vld [vmem:[%s4319_s1 + $0x168] sm:$0xff]   ;;  %v975_v27 = vrot.slane %v3607_v8, 1 }
  0x3a   : > { %v597_v42 = vor.u32 %v596_v29, %v592_v16  ;;  %v493_v45 = vsel %vm452_vm2, %v418_v39, 0.0  ;;  %v329_v10 = vadd.f32 %v3512_v19, %v292_v31  ;;  %v330_v55 = vadd.f32 %v3512_v19, %v293_v32  ;;  %v3356_v39 = vld [vmem:[%s4319_s1 + $0x170] sm:$0xff]  }
  0x3b   : > { %v3768_v54 = vpack.c.bf16 %v493_v45, %v493_v45  ;;  %v331_v56 = vadd.f32 %v3512_v19, %v294_v40  ;;  %v295_v57 = vmul.f32 %v3507_v18, %v258_v28  ;;  %v604_v0 = vshrl.u32 %v3761_v46, 16 }
  0x3c   : > { %v3774_v63 = vsel %vm542_vm11, %v597_v42, %v601_v36  ;;  %3052 = vmatpush3.bf16.msra.mxu0 %v3350_v58  ;;  %v606_v4 = vshll.u32 %v3761_v46, 16  ;;  %vm359_vm13 = vcmp.ge.f32.partialorder %v329_v10, 0.0  ;;  %2928 = vmatpush3.bf16.msra.mxu1 %v3353_v15  ;;  %vm360_vm14 = vcmp.ge.f32.partialorder %v330_v55, 0.0  ;;  %v3357_v58 = vld [vmem:[%s4319_s1 + $0x38] sm:$0xff]   ;;  %v261_v36 = vld [vmem:[%s3489_s25 + $0xc0] sm:$0xff] }
  0x3d   : > { %3034 = vmatmul.mubr.bf16.gmra.mrb[4].mxu0 %v3774_v63  ;;  %2909 = vmatprep.mubr.bf16.mxu1 %v3774_v63  ;;  %v611_v3 = vshll.u32 %v3768_v54, 16  ;;  %vm361_vm15 = vcmp.ge.f32.partialorder %v331_v56, 0.0  ;;  %v389_v7 = vmul.f32 0.01, %v329_v10  ;;  %v390_v16 = vmul.f32 0.01, %v330_v55 }
  0x3e   : > { %v608_v6 = vrot.slane %v606_v4, 1  ;;  %v391_v20 = vmul.f32 0.01, %v331_v56  ;;  %3053 = vmatprep.subr.bf16.mxu0 %v3352_v35  ;;  %v296_v15 = vmul.f32 %v3507_v18, %v259_v41  ;;  %2929 = vmatprep.subr.bf16.mxu1 %v3355_v52  ;;  %v297_v24 = vmul.f32 %v3507_v18, %v260_v50 }
  0x3f   : > { %v613_v21 = vrot.slane %v611_v3, 1  ;;  %v3789_v23 = vsel %vm359_vm13, %v329_v10, %v389_v7  ;;  %v332_v28 = vadd.f32 %v3512_v19, %v295_v57  ;;  %v3793_v30 = vsel %vm360_vm14, %v330_v55, %v390_v16  ;;  %v263_v10 = vld [vmem:[%s3489_s25 + $0xd0] sm:$0x3]  ;;  %v3358_v16 = vld [vmem:[%s4319_s1 + $0x178] sm:$0xff]  }
  0x40   : > { %v609_v29 = vor.u32 %v608_v6, %v604_v0  ;;  %v421_v31 = vsel %vm361_vm15, %v331_v56, %v391_v20  ;;  %v494_v32 = vsel %vm447_vm0, %v3789_v23, 0.0  ;;  %3054 = vmatpush3.bf16.msra.mxu0 %v3352_v35  ;;  %2930 = vmatpush3.bf16.msra.mxu1 %v3355_v52  ;;  %v333_v42 = vadd.f32 %v3512_v19, %v296_v15  ;;  %v3813_v35 = vld [vmem:[%s4319_s1 + $0x80] sm:$0xff]   ;;  %v262_v56 = vld [vmem:[%s3489_s25 + $0xc8] sm:$0xff] }
  0x41   : > { %v496_v40 = vsel %vm452_vm2, %v421_v31, 0.0  ;;  %v3805_v41 = vpack.c.bf16 %v3793_v30, %v494_v32  ;;  %3055 = vmatprep.subr.bf16.mxu0 %v3354_v5  ;;  %v334_v45 = vadd.f32 %v3512_v19, %v297_v24  ;;  %2931 = vmatprep.subr.bf16.mxu1 %v3357_v58  ;;  %vm362_vm3 = vcmp.ge.f32.partialorder %v332_v28, 0.0 }
  0x42   : > { %v3816_v50 = vsel %vm542_vm11, %v609_v29, %v613_v21  ;;  %v3818_v52 = vpack.c.bf16 %v496_v40, %v496_v40  ;;  %v392_v55 = vmul.f32 0.01, %v332_v28  ;;  %vm363_vm4 = vcmp.ge.f32.partialorder %v333_v42, 0.0 }
  0x43   : > { %3037 = vmatprep.mubr.bf16.mxu0 %v3816_v50  ;;  %2910 = vmatmul.mubr.bf16.gmra.mrb[8].mxu1 %v3816_v50  ;;  %v616_v57 = vshrl.u32 %v3805_v41, 16  ;;  %v618_v0 = vshll.u32 %v3805_v41, 16  ;;  %vm364_vm5 = vcmp.ge.f32.partialorder %v334_v45, 0.0  ;;  %v393_v3 = vmul.f32 0.01, %v333_v42 }
  0x44   : > { %v623_v4 = vshll.u32 %v3818_v52, 16  ;;  %3056 = vmatpush3.bf16.msra.mxu0 %v3354_v5  ;;  %v394_v7 = vmul.f32 0.01, %v334_v45  ;;  %v3826_v6 = vsel %vm362_vm3, %v332_v28, %v392_v55  ;;  %2932 = vmatpush3.bf16.msra.mxu1 %v3357_v58  ;;  %v298_v21 = vmul.f32 %v3507_v18, %v261_v36 }
  0x45   : > { %v620_v20 = vrot.slane %v618_v0, 1  ;;  %v497_v15 = vsel %vm447_vm0, %v3826_v6, 0.0  ;;  %v299_v24 = vmul.f32 %v3507_v18, %v262_v56  ;;  %3057 = vmatprep.subr.bf16.mxu0 %v3356_v39  ;;  %2949 = vmatprep.subr.bf16.mxu1 %v3813_v35  ;;  %v3838_v28 = vsel %vm363_vm4, %v333_v42, %v393_v3  ;;  %v3860_v0 = vld [vmem:[%s4319_s1 + $0x180] sm:$0xff]  }
  0x46   : > { %v625_v5 = vrot.slane %v623_v4, 1  ;;  %v424_v29 = vsel %vm364_vm5, %v334_v45, %v394_v7  ;;  %v300_v58 = vmul.f32 %v3507_v18, %v263_v10  ;;  %v3845_v40 = vpack.c.bf16 %v3838_v28, %v497_v15 }
  0x47   : > { %v621_v31 = vor.u32 %v620_v20, %v616_v57  ;;  %v499_v32 = vsel %vm452_vm2, %v424_v29, 0.0  ;;  %v335_v36 = vadd.f32 %v3512_v19, %v298_v21  ;;  %v336_v56 = vadd.f32 %v3512_v19, %v299_v24 }
  0x48   : > { %v3848_v55 = vpack.c.bf16 %v499_v32, %v499_v32  ;;  %v337_v42 = vadd.f32 %v3512_v19, %v300_v58  ;;  %3058 = vmatpush3.bf16.msra.mxu0 %v3356_v39  ;;  %v628_v10 = vshrl.u32 %v3845_v40, 16  ;;  %v630_v57 = vshll.u32 %v3845_v40, 16 }
  0x49   : > { %v3853_v45 = vsel %vm542_vm11, %v621_v31, %v625_v5  ;;  %vm365_vm7 = vcmp.ge.f32.partialorder %v335_v36, 0.0  ;;  %3059 = vmatprep.subr.bf16.mxu0 %v3358_v16  ;;  %vm366_vm8 = vcmp.ge.f32.partialorder %v336_v56, 0.0  ;;  %v395_v4 = vmul.f32 0.01, %v335_v36 }
  0x4a   : > { %3038 = vmatmul.mubr.bf16.gmra.mrb[8].mxu0 %v3853_v45  ;;  %2913 = vmatprep.mubr.bf16.mxu1 %v3853_v45  ;;  %v635_v39 = vshll.u32 %v3848_v55, 16  ;;  %vm367_vm9 = vcmp.ge.f32.partialorder %v337_v42, 0.0  ;;  %v632_v3 = vrot.slane %v630_v57, 1  ;;  %v396_v7 = vmul.f32 0.01, %v336_v56 }
  0x4b   : > { %v397_v20 = vmul.f32 0.01, %v337_v42  ;;  %v425_v21 = vsel %vm365_vm7, %v335_v36, %v395_v4  ;;  %v2499_v24 = vpack.c.bf16 %v3568_v51, %v3565_v48  ;;  %vm970_vm1 = vcmask 1046528  }
  0x4c   : > { %v637_v15 = vrot.slane %v635_v39, 1  ;;  %3060 = vmatpush3.bf16.msra.mxu0 %v3358_v16  ;;  %v633_v5 = vor.u32 %v632_v3, %v628_v10  ;;  %v426_v29 = vsel %vm366_vm8, %v336_v56, %v396_v7  ;;  %v500_v31 = vsel %vm447_vm0, %v425_v21, 0.0 }
  0x4d   : > { %v427_v58 = vsel %vm367_vm9, %v337_v42, %v397_v20  ;;  %3077 = vmatprep.subr.bf16.mxu0 %v3860_v0  ;;  %v3872_v57 = vpack.c.bf16 %v426_v29, %v500_v31  ;;  %v3892_v39 = vpack.c.bf16 %v3585_v60, %v3582_v59  ;;  %vm3409_vm6 = vmmov 1   ;;  %v3361_v60 = vld [vmem:[%s4319_s1 + $0x88] sm:$0xff]  }
  0x4e   : > { %v502_v32 = vsel %vm452_vm2, %v427_v58, 0.0  ;;  %v3879_v48 = vsel %vm542_vm11, %v633_v5, %v637_v15  ;;  %vm3896_vm12 = vmpackc.low %vm3409_vm6, %vm447_vm0  ;;  %v3901_v2 = vsel %vm970_vm1, %v974_v43, %v975_v27  ;;  %v3905_v8 = vpack.c.bf16 %v3629_v37, %v3625_v34  ;;  %v265_v5 = vld [vmem:[%s3489_s25 + $0xe0] sm:$0xff]  ;;  %v3369_v43 = vld [vmem:[%s4319_s1 + $0xa8] sm:$0xff]  }
  0x4f   : > { %v3881_v51 = vpack.c.bf16 %v502_v32, %v502_v32  ;;  %3041 = vmatprep.mubr.bf16.mxu0 %v3879_v48  ;;  %2914 = vmatmul.mubr.bf16.gmra.mrb[12].mxu1 %v3879_v48  ;;  %v1360_v16 = vshrl.u32 %v3872_v57, 16  ;;  %v1362_v36 = vshll.u32 %v3872_v57, 16  ;;  %v977_v59 = vrot.slane %v3640_v44, 1  ;;  %v3363_v44 = vld [vmem:[%s4319_s1 + $0x90] sm:$0xff]   ;;  %v3365_v32 = vld [vmem:[%s4319_s1 + $0x98] sm:$0xff]  }
  0x50   : > { %2933 = vmatprep.mubr.msk.bf16.mxu1 %vm2498_vm10, %v2499_v24  ;;  %v978_v20 = vrot.slane %v3649_v53, 1  ;;  %v971_v15 = vrot.slane %v3587_v61, 1  ;;  %v972_v24 = vrot.slane %v3589_v62, 1  ;;  %v3918_v34 = vpack.c.bf16 %v426_v29, %v425_v21  ;;  %v3362_v21 = vld [vmem:[%s4319_s1 + $0x188] sm:$0xff]  }
  0x51   : > { %v1367_v56 = vshll.u32 %v3881_v51, 16  ;;  %v1364_v42 = vrot.slane %v1362_v36, 1  ;;  %v980_v61 = vrot.slane %v3674_v22, 1  ;;  %v981_v62 = vrot.slane %v3692_v33, 1  ;;  %v3393_v36 = vld [vmem:[%s4319_s1 + $0x210] sm:$0xff]  }
  0x52   : > { %v3932_v37 = vsel %vm970_vm1, %v971_v15, %v972_v24  ;;  %v3938_v53 = vsel %vm970_vm1, %v977_v59, %v978_v20  ;;  %v3949_v33 = vpack.c.bf16 %v3668_v17, %v3664_v11  ;;  %v3957_v58 = vpack.c.bf16 %v3707_v49, %v3705_v47  ;;  %v3371_v24 = vld [vmem:[%s4319_s1 + $0xb0] sm:$0xff]  }
  0x53   : > { %v1369_v10 = vrot.slane %v1367_v56, 1  ;;  %v1365_v4 = vor.u32 %v1364_v42, %v1360_v16  ;;  %v3945_v22 = vsel %vm970_vm1, %v980_v61, %v981_v62  ;;  %v302_v31 = vmul.f32 %v3507_v18, %v265_v5 }
  0x54   : > { %v983_v11 = vrot.slane %v3722_v1, 1  ;;  %v984_v17 = vrot.slane %v3731_v14, 1  ;;  %v986_v47 = vrot.slane %v3761_v46, 1  ;;  %v987_v49 = vrot.slane %v3768_v54, 1  ;;  %v3367_v1 = vld [vmem:[%s4319_s1 + $0xa0] sm:$0xff]   ;;  %v3366_v54 = vld [vmem:[%s4319_s1 + $0x198] sm:$0xff]  }
  0x55   : > { %v3908_v7 = vsel %vm542_vm11, %v1365_v4, %v1369_v10  ;;  %v468_v16 = vstv %s467_s21  ;;  %v339_v14 = vadd.f32 %v3512_v19, %v302_v31  ;;  %v4006_v42 = vpack.c.bf16 %v3793_v30, %v3789_v23  ;;  %v3368_v4 = vld [vmem:[%s4319_s1 + $0x1a0] sm:$0xff]  }
  0x56   : > { %3042 = vmatmul.mubr.bf16.gmra.mrb[12].mxu0 %v3908_v7  ;;  %v3985_v46 = vsel %vm970_vm1, %v983_v11, %v984_v17  ;;  %vm3990_vm13 = vcmp.eq.s32.totalorder %v468_v16, 1  ;;  %v3995_v56 = vsel %vm970_vm1, %v986_v47, %v987_v49  ;;  %v990_v59 = vrot.slane %v3818_v52, 1  ;;  %v3399_v23 = vld [vmem:[%s4320_s2] ss:$0 sm:$0xff] }
  0x57   : > { %3061 = vmatprep.mubr.bf16.mxu0 %v3901_v2  ;;  %2934 = vmatmul.mubr.msk.bf16.vlgmr.msra.gmra.mrb[0].mxu1 %vm3896_vm12, %v3892_v39  ;;  %v399_v10 = vmul.f32 0.01, %v339_v14  ;;  %vm369_vm15 = vcmp.ge.f32.partialorder %v339_v14, 0.0  ;;  %v993_v20 = vrot.slane %v3848_v55, 1  ;;  %vm4035_vm3 = vmand %vm447_vm0, %vm3990_vm13  ;;  %v4066_v5 = vpack.c.bf16 %v3838_v28, %v3826_v6  ;;  %v3376_v16 = vld [vmem:[%s4319_s1 + $0x1c0] sm:$0xff]  }
  0x58   : > { %2950 = vmatpush3.bf16.msra.mxu1 %v3813_v35  ;;  %2937 = vmatprep.mubr.msk.bf16.mxu1 %vm3896_vm12, %v3905_v8  ;;  %v264_v35 = vld [vmem:[%s3489_s25 + $0xd8] sm:$0xff]  ;;  %vm475_vm4 = vmand %vm452_vm2, %vm3990_vm13  ;;  %v1552_v11 = vrot.slane %v3872_v57, 1  ;;  %v1553_v6 = vrot.slane %v3881_v51, 1  ;;  %v3375_v51 = vld [vmem:[%s4319_s1 + $0xc0] sm:$0xff]   ;;  %vm2363_vm5 = vcmask 1041408  }
  0x59   : > { %2951 = vmatprep.subr.bf16.mxu1 %v3361_v60  ;;  %v301_v29 = vmul.f32 %v3507_v18, %v264_v35  ;;  %v3364_v18 = vld [vmem:[%s4319_s1 + $0x190] sm:$0xff]   ;;  %v4029_v52 = vsel %vm369_vm15, %v339_v14, %v399_v10  ;;  %v3370_v35 = vld [vmem:[%s4319_s1 + $0x1a8] sm:$0xff]   ;;  %vm2687_vm2 = vmpackc.low %vm3990_vm13, %vm4035_vm3 }
  0x5a   : > { %v504_v9 = vsel %vm3990_vm13, %v4029_v52, 0.0  ;;  %v4092_v47 = vsel %vm970_vm1, %v1552_v11, %v1553_v6  ;;  %v3378_v14 = vld [vmem:[%s4319_s1 + $0x1c8] sm:$0xff]  }
  0x5b   : > { %v3385_v10 = vld [vmem:[%s4319_s1 + $0xe8] sm:$0xff]  }
  0x5c   : > { %2952 = vmatpush3.bf16.msra.mxu1 %v3361_v60  ;;  %v992_v60 = vrot.slane %v3845_v40, 1  ;;  %v3400_v40 = vld [vmem:[%s4321_s3] ss:$0 sm:$0xff] }
  0x5d   : > { %2953 = vmatprep.subr.bf16.mxu1 %v3363_v44 }
  0x5e   : > { %3062 = vmatmul.mubr.bf16.vlgmr.msra.gmra.mrb[0].mxu0 %v3938_v53 }
  0x5f   : > { %3078 = vmatpush3.bf16.msra.mxu0 %v3860_v0  ;;  %3065 = vmatprep.mubr.bf16.mxu0 %v3945_v22  ;;  %v338_v0 = vadd.f32 %v3512_v19, %v301_v29  ;;  %v3999_v19 = vpack.c.bf16 %v3753_v38, %v3741_v25  ;;  %v266_v25 = vld [vmem:[%s3489_s25 + $0xe8] sm:$0x3]  ;;  %v989_v38 = vrot.slane %v3805_v41, 1 }
  0x60   : > { %3079 = vmatprep.subr.bf16.mxu0 %v3362_v21  ;;  %2938 = vmatmul.mubr.msk.bf16.gmra.mrb[4].mxu1 %vm3896_vm12, %v3949_v33  ;;  %v303_v30 = vmul.f32 %v3399_v23, %v266_v25  ;;  %v3387_v25 = vld [vmem:[%s4319_s1 + $0xf0] sm:$0xff]  }
  0x61   : > { %2954 = vmatpush3.bf16.msra.mxu1 %v3363_v44  ;;  %2941 = vmatprep.mubr.msk.bf16.mxu1 %vm3896_vm12, %v3957_v58  ;;  %v398_v27 = vmul.f32 0.01, %v338_v0  ;;  %vm368_vm14 = vcmp.ge.f32.partialorder %v338_v0, 0.0  ;;  %v4052_v62 = vsel %vm970_vm1, %v989_v38, %v990_v59  ;;  %v3386_v38 = vld [vmem:[%s4319_s1 + $0x1e8] sm:$0xff]   ;;  %v3389_v59 = vld [vmem:[%s4319_s1 + $0xf8] sm:$0xff]   ;;  %v3388_v23 = vld [vmem:[%s4319_s1 + $0x1f0] sm:$0xff]  }
  0x62   : > { %2955 = vmatprep.subr.bf16.mxu1 %v3365_v32  ;;  %v340_v55 = vadd.f32 %v3400_v40, %v303_v30 }
  0x63   : > { %3080 = vmatpush3.bf16.msra.mxu0 %v3362_v21  ;;  %v4027_v41 = vsel %vm368_vm14, %v338_v0, %v398_v27  ;;  %v4062_v21 = vsel %vm970_vm1, %v992_v60, %v993_v20  ;;  %v3374_v0 = vld [vmem:[%s4319_s1 + $0x1b8] sm:$0xff]   ;;  %v3391_v60 = vld [vmem:[%s4319_s1 + $0x200] sm:$0xff]  }
  0x64   : > { %3081 = vmatprep.subr.bf16.mxu0 %v3364_v18  ;;  %v503_v61 = vsel %vm4035_vm3, %v4027_v41, 0.0  ;;  %vm370_vm0 = vcmp.ge.f32.partialorder %v340_v55, 0.0  ;;  %v400_v44 = vmul.f32 0.01, %v340_v55  ;;  %v3382_v27 = vld [vmem:[%s4319_s1 + $0x1d8] sm:$0xff]   ;;  %v2688_v30 = vpack.c.bf16 %v4029_v52, %v4027_v41 }
  0x65   : > { %2956 = vmatpush3.bf16.msra.mxu1 %v3365_v32  ;;  %v4068_v29 = vpack.c.bf16 %v504_v9, %v503_v61  ;;  %v3390_v20 = vld [vmem:[%s4319_s1 + $0x1f8] sm:$0xff]  }
  0x66   : > { %3066 = vmatmul.mubr.bf16.gmra.mrb[4].mxu0 %v3985_v46  ;;  %2957 = vmatprep.subr.bf16.mxu1 %v3367_v1  ;;  %v430_v31 = vsel %vm370_vm0, %v340_v55, %v400_v44 }
  0x67   : > { %3082 = vmatpush3.bf16.msra.mxu0 %v3364_v18  ;;  %3069 = vmatprep.mubr.bf16.mxu0 %v3995_v56  ;;  %v505_v32 = vsel %vm475_vm4, %v430_v31, 0.0  ;;  %v2105_v17 = vrot.slane %v4068_v29, 1  ;;  %v3372_v18 = vld [vmem:[%s4319_s1 + $0x1b0] sm:$0xff]  }
  0x68   : > { %3083 = vmatprep.subr.bf16.mxu0 %v3366_v54  ;;  %2942 = vmatmul.mubr.msk.bf16.gmra.mrb[8].mxu1 %vm3896_vm12, %v3999_v19  ;;  %v4077_v28 = vpack.c.bf16 %v505_v32, %v505_v32 }
  0x69   : > { %2958 = vmatpush3.bf16.msra.mxu1 %v3367_v1  ;;  %2945 = vmatprep.mubr.msk.bf16.mxu1 %vm3896_vm12, %v4006_v42  ;;  %v3379_v1 = vld [vmem:[%s4319_s1 + $0xd0] sm:$0xff]  }
  0x6a   : > { %2959 = vmatprep.subr.bf16.mxu1 %v3369_v43  ;;  %v2106_v57 = vrot.slane %v4077_v28, 1 }
  0x6b   : > { %3084 = vmatpush3.bf16.msra.mxu0 %v3366_v54  ;;  %v3380_v54 = vld [vmem:[%s4319_s1 + $0x1d0] sm:$0xff]  }
  0x6c   : > { %3085 = vmatprep.subr.bf16.mxu0 %v3368_v4  ;;  %v4095_v49 = vsel %vm970_vm1, %v2105_v17, %v2106_v57 }
  0x6d   : > { %2960 = vmatpush3.bf16.msra.mxu1 %v3369_v43  ;;  %v3383_v43 = vld [vmem:[%s4319_s1 + $0xe0] sm:$0xff]  }
  0x6e   : > { %3070 = vmatmul.mubr.bf16.gmra.mrb[8].mxu0 %v4052_v62  ;;  %2961 = vmatprep.subr.bf16.mxu1 %v3371_v24 }
  0x6f   : > { %3086 = vmatpush3.bf16.msra.mxu0 %v3368_v4  ;;  %3073 = vmatprep.mubr.bf16.mxu0 %v4062_v21  ;;  %v3384_v4 = vld [vmem:[%s4319_s1 + $0x1e0] sm:$0xff]  }
  0x70   : > { %3087 = vmatprep.subr.bf16.mxu0 %v3370_v35  ;;  %2946 = vmatmul.mubr.msk.bf16.gmra.mrb[12].mxu1 %vm3896_vm12, %v4066_v5 }
  0x71   : > { %2962 = vmatpush3.bf16.msra.mxu1 %v3371_v24  ;;  %2965 = vmatprep.mubr.bf16.mxu1 %v3932_v37  ;;  %v3377_v37 = vld [vmem:[%s4319_s1 + $0xc8] sm:$0xff]  }
  0x72   : > { %2963 = vmatprep.subr.bf16.mxu1 %v3373_v13 }
  0x73   : > { %3088 = vmatpush3.bf16.msra.mxu0 %v3370_v35 }
  0x74   : > { %3089 = vmatprep.subr.bf16.mxu0 %v3372_v18 }
  0x75   : > { %2964 = vmatpush3.bf16.msra.mxu1 %v3373_v13 }
  0x76   : > { %3074 = vmatmul.mubr.bf16.gmra.mrb[12].mxu0 %v4092_v47  ;;  %2981 = vmatprep.subr.bf16.mxu1 %v3375_v51 }
  0x77   : > { %3090 = vmatpush3.bf16.msra.mxu0 %v3372_v18  ;;  %3093 = vmatprep.mubr.msk.bf16.mxu0 %vm3896_vm12, %v3905_v8 }
  0x78   : > { %3091 = vmatprep.subr.bf16.mxu0 %v3374_v0  ;;  %2966 = vmatmul.mubr.bf16.vlgmr.msra.gmra.mrb[0].mxu1 %v3901_v2  ;;  %v3381_v2 = vld [vmem:[%s4319_s1 + $0xd8] sm:$0xff]  }
  0x79   : > { %2982 = vmatpush3.bf16.msra.mxu1 %v3375_v51  ;;  %2969 = vmatprep.mubr.bf16.mxu1 %v3938_v53 }
  0x7a   : > { %2983 = vmatprep.subr.bf16.mxu1 %v3377_v37 }
  0x7b   : > { %3092 = vmatpush3.bf16.msra.mxu0 %v3374_v0 }
  0x7c   : > { %3109 = vmatprep.subr.bf16.mxu0 %v3376_v16 }
  0x7d   : > { %2984 = vmatpush3.bf16.msra.mxu1 %v3377_v37 }
  0x7e   : > { %3094 = vmatmul.mubr.msk.bf16.vlgmr.msra.gmra.mrb[0].mxu0 %vm3896_vm12, %v3949_v33  ;;  %2985 = vmatprep.subr.bf16.mxu1 %v3379_v1 }
  0x7f   : > { %3110 = vmatpush3.bf16.msra.mxu0 %v3376_v16  ;;  %3097 = vmatprep.mubr.msk.bf16.mxu0 %vm3896_vm12, %v3957_v58 }
  0x80   : > { %3111 = vmatprep.subr.bf16.mxu0 %v3378_v14  ;;  %2970 = vmatmul.mubr.bf16.gmra.mrb[4].mxu1 %v3945_v22 }
  0x81   : > { %2986 = vmatpush3.bf16.msra.mxu1 %v3379_v1  ;;  %2973 = vmatprep.mubr.bf16.mxu1 %v3985_v46 }
  0x82   : > { %2987 = vmatprep.subr.bf16.mxu1 %v3381_v2 }
  0x83   : > { %3112 = vmatpush3.bf16.msra.mxu0 %v3378_v14 }
  0x84   : > { %3113 = vmatprep.subr.bf16.mxu0 %v3380_v54 }
  0x85   : > { %2988 = vmatpush3.bf16.msra.mxu1 %v3381_v2 }
  0x86   : > { %3098 = vmatmul.mubr.msk.bf16.gmra.mrb[4].mxu0 %vm3896_vm12, %v3999_v19  ;;  %2989 = vmatprep.subr.bf16.mxu1 %v3383_v43 }
  0x87   : > { %3114 = vmatpush3.bf16.msra.mxu0 %v3380_v54  ;;  %3101 = vmatprep.mubr.msk.bf16.mxu0 %vm3896_vm12, %v4006_v42 }
  0x88   : > { %3115 = vmatprep.subr.bf16.mxu0 %v3382_v27  ;;  %2974 = vmatmul.mubr.bf16.gmra.mrb[8].mxu1 %v3995_v56 }
  0x89   : > { %2990 = vmatpush3.bf16.msra.mxu1 %v3383_v43  ;;  %2977 = vmatprep.mubr.bf16.mxu1 %v4052_v62 }
  0x8a   : > { %2991 = vmatprep.subr.bf16.mxu1 %v3385_v10 }
  0x8b   : > { %3116 = vmatpush3.bf16.msra.mxu0 %v3382_v27 }
  0x8c   : > { %3117 = vmatprep.subr.bf16.mxu0 %v3384_v4 }
  0x8d   : > { %2992 = vmatpush3.bf16.msra.mxu1 %v3385_v10 }
  0x8e   : > { %3102 = vmatmul.mubr.msk.bf16.gmra.mrb[8].mxu0 %vm3896_vm12, %v4066_v5  ;;  %2993 = vmatprep.subr.bf16.mxu1 %v3387_v25 }
  0x8f   : > { %3118 = vmatpush3.bf16.msra.mxu0 %v3384_v4  ;;  %3105 = vmatprep.mubr.msk.bf16.mxu0 %vm3896_vm12, %v3918_v34 }
  0x90   : > { %3119 = vmatprep.subr.bf16.mxu0 %v3386_v38  ;;  %2978 = vmatmul.mubr.bf16.gmra.mrb[12].mxu1 %v4062_v21 }
  0x91   : > { %2994 = vmatpush3.bf16.msra.mxu1 %v3387_v25  ;;  %2997 = vmatprep.mubr.msk.bf16.mxu1 %vm3896_vm12, %v3892_v39  ;;  %v3392_v39 = vld [vmem:[%s4319_s1 + $0x208] sm:$0xff]  }
  0x92   : > { %2995 = vmatprep.subr.bf16.mxu1 %v3389_v59 }
  0x93   : > { %3120 = vmatpush3.bf16.msra.mxu0 %v3386_v38 }
  0x94   : > { %3121 = vmatprep.subr.bf16.mxu0 %v3388_v23 }
  0x95   : > { %2996 = vmatpush3.bf16.msra.mxu1 %v3389_v59 }
  0x96   : > { %3106 = vmatmul.mubr.msk.bf16.gmra.mrb[12].mxu0 %vm2687_vm2, %v2688_v30  ;;  %3173 = vmatprep.subr.bf16.mxu1 %v3391_v60 }
  0x97   : > { %3122 = vmatpush3.bf16.msra.mxu0 %v3388_v23  ;;  %3125 = vmatprep.mubr.bf16.mxu0 %v3682_v26  ;;  %v3394_v26 = vld [vmem:[%s4319_s1 + $0x218] sm:$0xff]  }
  0x98   : > { %3123 = vmatprep.subr.bf16.mxu0 %v3390_v20  ;;  %2998 = vmatmul.mubr.msk.bf16.vlgmr.msra.gmra.mrb[0].mxu1 %vm3896_vm12, %v3905_v8  ;;  %v1915_v8 = vshll.u32 %v4068_v29, 16 }
  0x99   : > { %3181 = vmatpush3.bf16.msra.mxu1 %v3391_v60  ;;  %3001 = vmatprep.mubr.msk.bf16.mxu1 %vm3896_vm12, %v3949_v33 }
  0x9a   : > { %3174 = vmatprep.subr.bf16.mxu1 %v3392_v39  ;;  %v1917_v33 = vrot.slane %v1915_v8, 1 }
  0x9b   : > { %3124 = vmatpush3.bf16.msra.mxu0 %v3390_v20 }
  0x9c   : > { %3141 = vmatprep.subr.bf16.mxu0 %v3391_v60 }
  0x9d   : > { %3182 = vmatpush3.bf16.msra.mxu1 %v3392_v39 }
  0x9e   : > { %3126 = vmatmul.mubr.bf16.vlgmr.msra.gmra.mrb[0].mxu0 %v3729_v12  ;;  %3175 = vmatprep.subr.bf16.mxu1 %v3393_v36  ;;  %v3395_v12 = vld [vmem:[%s4319_s1 + $0x220] sm:$0xff]  }
  0x9f   : > { %3142 = vmatpush3.bf16.msra.mxu0 %v3391_v60  ;;  %3129 = vmatprep.mubr.bf16.mxu0 %v3774_v63  ;;  %v3396_v63 = vld [vmem:[%s4319_s1 + $0x228] sm:$0xff]  }
  0xa0   : > { %3143 = vmatprep.subr.bf16.mxu0 %v3392_v39  ;;  %3002 = vmatmul.mubr.msk.bf16.gmra.mrb[4].mxu1 %vm3896_vm12, %v3957_v58  ;;  %v1920_v58 = vshll.u32 %v4077_v28, 16 }
  0xa1   : > { %3183 = vmatpush3.bf16.msra.mxu1 %v3393_v36  ;;  %3005 = vmatprep.mubr.msk.bf16.mxu1 %vm3896_vm12, %v3999_v19  ;;  %v3398_v19 = vld [vmem:[%s4319_s1 + $0x238] sm:$0xff]  }
  0xa2   : > { %3176 = vmatprep.subr.bf16.mxu1 %v3394_v26  ;;  %v1922_v41 = vrot.slane %v1920_v58, 1 }
  0xa3   : > { %3144 = vmatpush3.bf16.msra.mxu0 %v3392_v39 }
  0xa4   : > { %3145 = vmatprep.subr.bf16.mxu0 %v3393_v36 }
  0xa5   : > { %3184 = vmatpush3.bf16.msra.mxu1 %v3394_v26 }
  0xa6   : > { %3130 = vmatmul.mubr.bf16.gmra.mrb[4].mxu0 %v3816_v50  ;;  %3177 = vmatprep.subr.bf16.mxu1 %v3395_v12  ;;  %v3397_v50 = vld [vmem:[%s4319_s1 + $0x230] sm:$0xff]  }
  0xa7   : > { %3146 = vmatpush3.bf16.msra.mxu0 %v3393_v36  ;;  %3133 = vmatprep.mubr.bf16.mxu0 %v3853_v45  ;;  %v1913_v45 = vshrl.u32 %v4068_v29, 16 }
  0xa8   : > { %3147 = vmatprep.subr.bf16.mxu0 %v3394_v26  ;;  %3006 = vmatmul.mubr.msk.bf16.gmra.mrb[8].mxu1 %vm3896_vm12, %v4006_v42 }
  0xa9   : > { %3185 = vmatpush3.bf16.msra.mxu1 %v3395_v12  ;;  %3009 = vmatprep.mubr.msk.bf16.mxu1 %vm3896_vm12, %v4066_v5  ;;  %v1918_v42 = vor.u32 %v1917_v33, %v1913_v45 }
  0xaa   : > { %3178 = vmatprep.subr.bf16.mxu1 %v3396_v63 }
  0xab   : > { %3148 = vmatpush3.bf16.msra.mxu0 %v3394_v26 }
  0xac   : > { %3149 = vmatprep.subr.bf16.mxu0 %v3395_v12 }
  0xad   : > { %3186 = vmatpush3.bf16.msra.mxu1 %v3396_v63 }
  0xae   : > { %3134 = vmatmul.mubr.bf16.gmra.mrb[8].mxu0 %v3879_v48  ;;  %3179 = vmatprep.subr.bf16.mxu1 %v3397_v50  ;;  %v1923_v48 = vsel %vm542_vm11, %v1918_v42, %v1922_v41  ;;  %vm2361_vm11 = vcmask 1040384  }
  0xaf   : > { %3150 = vmatpush3.bf16.msra.mxu0 %v3395_v12  ;;  %3137 = vmatprep.mubr.bf16.mxu0 %v3908_v7 }
  0xb0   : > { %3151 = vmatprep.subr.bf16.mxu0 %v3396_v63  ;;  %3010 = vmatmul.mubr.msk.bf16.gmra.mrb[12].mxu1 %vm3896_vm12, %v3918_v34 }
  0xb1   : > { %3187 = vmatpush3.bf16.msra.mxu1 %v3397_v50  ;;  %3165 = vmatprep.mubr.bf16.mxu1 %v4052_v62 }
  0xb2   : > { %3180 = vmatprep.subr.bf16.mxu1 %v3398_v19 }
  0xb3   : > { %3152 = vmatpush3.bf16.msra.mxu0 %v3396_v63 }
  0xb4   : > { %3153 = vmatprep.subr.bf16.mxu0 %v3397_v50 }
  0xb5   : > { %3188 = vmatpush3.bf16.msra.mxu1 %v3398_v19 }
  0xb6   : > { %3138 = vmatmul.mubr.bf16.gmra.mrb[12].mxu0 %v1923_v48 }
  0xb7   : > { %3154 = vmatpush3.bf16.msra.mxu0 %v3397_v50  ;;  %3157 = vmatprep.mubr.bf16.mxu0 %v3938_v53 }
  0xb8   : > { %3155 = vmatprep.subr.bf16.mxu0 %v3398_v19  ;;  %3166 = vmatmul.mubr.bf16.vlgmr.msra.gmra.mrb[16].mxu1 %v4062_v21 }
  0xb9   : > { %3169 = vmatprep.mubr.bf16.mxu1 %v4092_v47 }
  0xbb   : > { %3156 = vmatpush3.bf16.msra.mxu0 %v3398_v19 }
  0xbe   : > { %3158 = vmatmul.mubr.bf16.vlgmr.msra.gmra.mrb[0].mxu0 %v3945_v22 }
  0xbf   : > { %3161 = vmatprep.mubr.bf16.mxu0 %v3985_v46 }
  0xc0   : > { %3170 = vmatmul.mubr.bf16.gmra.mrb[20].mxu1 %v4095_v49 }
  0xc6   : > { %3162 = vmatmul.mubr.bf16.gmra.mrb[4].mxu0 %v3995_v56 }
 0x16b   : > { %v2999_v3 = vpop.f32.mrb[0].mxu1 }
 0x16c   : > { %v1280_v7 = vpop.f32.mrb[1].mxu1 }
 0x16d   : > { %v3000_v34 = vpop.f32.mrb[2].mxu1 }
 0x16e   : > { %v1283_v52 = vpop.f32.mrb[3].mxu1 }
 0x173   : > { %v4247_v15 = vpop.f32.mrb[4].mxu1 }
 0x174   : > { %v4249_v53 = vpop.f32.mrb[5].mxu1 }
 0x175   : > { %v4251_v40 = vpop.f32.mrb[6].mxu1 }
 0x176   : > { %v4253_v55 = vpop.f32.mrb[7].mxu1 }
 0x17b   : > { %v3007_v24 = vpop.f32.mrb[8].mxu1 }
 0x17c   : > { %v1312_v22 = vpop.f32.mrb[9].mxu1 }
 0x17d   : > { %v3008_v46 = vpop.f32.mrb[10].mxu1 }
 0x17e   : > { %v1315_v61 = vpop.f32.mrb[11].mxu1 }
 0x181   : > { %v3135_v9 = vpop.f32.mrb[8].mxu0 }
 0x182   : > { %v3197_v62 = vadd.f32 %v3135_v9, %v3007_v24  ;;  %v2056_v56 = vpop.f32.mrb[9].mxu0 }
 0x183   : > { %v3199_v44 = vadd.f32 %v2056_v56, %v1312_v22  ;;  %v3136_v35 = vpop.f32.mrb[10].mxu0  ;;  %v3011_v21 = vpop.f32.mrb[12].mxu1 }
 0x184   : > { %v3201_v5 = vadd.f32 %v3136_v35, %v3008_v46  ;;  %v2059_v29 = vpop.f32.mrb[11].mxu0  ;;  %v1328_v31 = vpop.f32.mrb[13].mxu1 }
 0x185   : > { %v3203_v13 = vadd.f32 %v2059_v29, %v1315_v61  ;;  %v3012_v32 = vpop.f32.mrb[14].mxu1 }
 0x186   : > { %v1331_v11 = vpop.f32.mrb[15].mxu1 }
 0x189   : > { %v3139_v6 = vpop.f32.mrb[12].mxu0 }
 0x18a   : > { %v3205_v28 = vadd.f32 %v3139_v6, %v3011_v21  ;;  %v2072_v17 = vpop.f32.mrb[13].mxu0 }
 0x18b   : > { %v3207_v18 = vadd.f32 %v2072_v17, %v1328_v31  ;;  %v3140_v57 = vpop.f32.mrb[14].mxu0  ;;  %v3167_v51 = vpop.f32.mrb[16].mxu1 }
 0x18c   : > { %v3209_v47 = vadd.f32 %v3140_v57, %v3012_v32  ;;  %v2075_v49 = vpop.f32.mrb[15].mxu0  ;;  %v4261_v0 = vadd.f32 %v3197_v62, %v3167_v51  ;;  %v2240_v37 = vpop.f32.mrb[17].mxu1 }
 0x18d   : > { %v3211_v16 = vadd.f32 %v2075_v49, %v1331_v11  ;;  %v4263_v1 = vadd.f32 %v3199_v44, %v2240_v37  ;;  %v3168_v14 = vpop.f32.mrb[18].mxu1 }
 0x18e   : > { %2297 = vst [vmem:[%s4259_s6 + $0x50] sm:$0xff] %v4261_v0  ;;  %v4267_v2 = vadd.f32 %v3201_v5, %v3168_v14  ;;  %v2243_v54 = vpop.f32.mrb[19].mxu1 }
 0x18f   : > { %2295 = vst [vmem:[%s4259_s6 + $0x40] sm:$0xff] %v4263_v1  ;;  %v4271_v43 = vadd.f32 %v3203_v13, %v2243_v54 }
 0x190   : > { %2298 = vst [vmem:[%s4259_s6 + $0x58] sm:$0xff] %v4267_v2 }
 0x191   : > { %v3159_v27 = vpop.f32.mrb[0].mxu0  ;;  %2296 = vst [vmem:[%s4259_s6 + $0x48] sm:$0xff] %v4271_v43 }
 0x192   : > { %v3189_v10 = vadd.f32 %v3159_v27, %v2999_v3  ;;  %v2208_v4 = vpop.f32.mrb[1].mxu0 }
 0x193   : > { %v3190_v25 = vadd.f32 %v2208_v4, %v1280_v7  ;;  %v3160_v38 = vpop.f32.mrb[2].mxu0  ;;  %v3171_v59 = vpop.f32.mrb[20].mxu1 }
 0x194   : > { %2289 = vst [vmem:[%s4259_s6 + $0x10] sm:$0xff] %v3189_v10  ;;  %v3191_v23 = vadd.f32 %v3160_v38, %v3000_v34  ;;  %v2211_v30 = vpop.f32.mrb[3].mxu0  ;;  %v4278_v60 = vadd.f32 %v3205_v28, %v3171_v59  ;;  %v2256_v20 = vpop.f32.mrb[21].mxu1  ;;  %v2326_v58 = vmul.f32 %v3189_v10, %v3189_v10 }
 0x195   : > { %2287 = vst [vmem:[%s4259_s6] sm:$0xff] %v3190_v25  ;;  %v3192_v39 = vadd.f32 %v2211_v30, %v1283_v52  ;;  %v3208_v36 = vadd.f32 %v3207_v18, %v2256_v20  ;;  %v3172_v26 = vpop.f32.mrb[22].mxu1  ;;  %v2324_v8 = vmul.f32 %v3190_v25, %v3190_v25  ;;  %v2334_v18 = vmul.f32 %v4261_v0, %v4261_v0 }
 0x196   : > { %2290 = vst [vmem:[%s4259_s6 + $0x18] sm:$0xff] %v3191_v23  ;;  %2301 = vst [vmem:[%s4259_s6 + $0x70] sm:$0xff] %v4278_v60  ;;  %v3210_v12 = vadd.f32 %v3209_v47, %v3172_v26  ;;  %v2259_v63 = vpop.f32.mrb[23].mxu1  ;;  %v2327_v7 = vmul.f32 %v3191_v23, %v3191_v23  ;;  %v2335_v47 = vmul.f32 %v4267_v2, %v4267_v2 }
 0x197   : > { %2288 = vst [vmem:[%s4259_s6 + $0x8] sm:$0xff] %v3192_v39  ;;  %v2303_v50 = vadd.f32 %v3192_v39, %v3190_v25  ;;  %v2325_v45 = vmul.f32 %v3192_v39, %v3192_v39  ;;  %2299 = vst [vmem:[%s4259_s6 + $0x60] sm:$0xff] %v3208_v36  ;;  %v3212_v33 = vadd.f32 %v3211_v16, %v2259_v63 }
 0x198   : > { %2302 = vst [vmem:[%s4259_s6 + $0x78] sm:$0xff] %v3210_v12  ;;  %v2336_v16 = vmul.f32 %v3208_v36, %v3208_v36  ;;  %v2339_v25 = vmul.f32 %v3210_v12, %v3210_v12 }
 0x199   : > { %v2304_v19 = vadd.f32 %v3189_v10, %v2303_v50  ;;  %v2340_v42 = vadd.f32 %v2325_v45, %v2324_v8  ;;  %v3163_v41 = vpop.f32.mrb[4].mxu0  ;;  %2300 = vst [vmem:[%s4259_s6 + $0x68] sm:$0xff] %v3212_v33  ;;  %v2337_v27 = vmul.f32 %v3212_v33, %v3212_v33 }
 0x19a   : > { %v3193_v48 = vadd.f32 %v3163_v41, %v4247_v15  ;;  %v2224_v3 = vpop.f32.mrb[5].mxu0 }
 0x19b   : > { %v2341_v34 = vadd.f32 %v2340_v42, %v2326_v58  ;;  %v3194_v52 = vadd.f32 %v2224_v3, %v4249_v53  ;;  %v2305_v24 = vadd.f32 %v3191_v23, %v2304_v19  ;;  %v3164_v22 = vpop.f32.mrb[6].mxu0 }
 0x19c   : > { %2293 = vst [vmem:[%s4259_s6 + $0x30] sm:$0xff] %v3193_v48  ;;  %v3195_v46 = vadd.f32 %v3164_v22, %v4251_v40  ;;  %v2227_v61 = vpop.f32.mrb[7].mxu0  ;;  %v2330_v5 = vmul.f32 %v3193_v48, %v3193_v48  ;;  %v2332_v40 = vmul.f32 %v4263_v1, %v4263_v1 }
 0x19d   : > { %2291 = vst [vmem:[%s4259_s6 + $0x20] sm:$0xff] %v3194_v52  ;;  %v2306_v9 = vadd.f32 %v3194_v52, %v2305_v24  ;;  %v2328_v62 = vmul.f32 %v3194_v52, %v3194_v52  ;;  %v2342_v56 = vadd.f32 %v2341_v34, %v2327_v7  ;;  %v3196_v44 = vadd.f32 %v2227_v61, %v4253_v55 }
 0x19e   : > { %2294 = vst [vmem:[%s4259_s6 + $0x38] sm:$0xff] %v3195_v46  ;;  %v2331_v31 = vmul.f32 %v3195_v46, %v3195_v46  ;;  %v2333_v55 = vmul.f32 %v4271_v43, %v4271_v43 }
 0x19f   : > { %v2343_v15 = vadd.f32 %v2342_v56, %v2328_v62  ;;  %2292 = vst [vmem:[%s4259_s6 + $0x28] sm:$0xff] %v3196_v44  ;;  %v2307_v35 = vadd.f32 %v3196_v44, %v2306_v9  ;;  %v2329_v21 = vmul.f32 %v3196_v44, %v3196_v44 }
 0x1a1   : > { %v2308_v29 = vadd.f32 %v3193_v48, %v2307_v35  ;;  %v2344_v53 = vadd.f32 %v2343_v15, %v2329_v21 }
 0x1a3   : > { %v2309_v13 = vadd.f32 %v3195_v46, %v2308_v29  ;;  %v2345_v32 = vadd.f32 %v2344_v53, %v2330_v5 }
 0x1a5   : > { %v2310_v11 = vadd.f32 %v4263_v1, %v2309_v13  ;;  %v2346_v6 = vadd.f32 %v2345_v32, %v2331_v31 }
 0x1a7   : > { %v2347_v28 = vadd.f32 %v2346_v6, %v2332_v40  ;;  %v2311_v17 = vadd.f32 %v4271_v43, %v2310_v11  ;;  %v2338_v43 = vmul.f32 %v4278_v60, %v4278_v60 }
 0x1a9   : > { %v2312_v57 = vadd.f32 %v4261_v0, %v2311_v17  ;;  %v2348_v51 = vadd.f32 %v2347_v28, %v2333_v55 }
 0x1ab   : > { %v2313_v49 = vadd.f32 %v4267_v2, %v2312_v57  ;;  %v2349_v37 = vadd.f32 %v2348_v51, %v2334_v18 }
 0x1ad   : > { %v2314_v1 = vadd.f32 %v3208_v36, %v2313_v49  ;;  %v2350_v14 = vadd.f32 %v2349_v37, %v2335_v47 }
 0x1af   : > { %v2315_v54 = vadd.f32 %v3212_v33, %v2314_v1  ;;  %v2351_v10 = vadd.f32 %v2350_v14, %v2336_v16 }
 0x1b1   : > { %v2316_v4 = vadd.f32 %v4278_v60, %v2315_v54  ;;  %v2352_v0 = vadd.f32 %v2351_v10, %v2337_v27 }
 0x1b3   : > { %v2317_v38 = vadd.f32 %v3210_v12, %v2316_v4  ;;  %v2353_v59 = vadd.f32 %v2352_v0, %v2338_v43 }
 0x1b5   : > { %v2318_v23 = vrot.slane %v2317_v38, 4  ;;  %v2354_v30 = vadd.f32 %v2353_v59, %v2339_v25 }
 0x1b7   : > { %v2319_v2 = vadd.f32 %v2318_v23, %v2317_v38  ;;  %v2355_v20 = vrot.slane %v2354_v30, 4 }
 0x1b9   : > { %v2320_v39 = vrot.slane %v2319_v2, 2  ;;  %v2356_v36 = vadd.f32 %v2355_v20, %v2354_v30 }
 0x1bb   : > { %v2321_v26 = vadd.f32 %v2320_v39, %v2319_v2  ;;  %v2357_v63 = vrot.slane %v2356_v36, 2 }
 0x1bd   : > { %v2322_v8 = vrot.slane %v2321_v26, 1  ;;  %v2358_v50 = vadd.f32 %v2357_v63, %v2356_v36 }
 0x1bf   : > { %v2359_v45 = vrot.slane %v2358_v50, 1  ;;  %v2323_v33 = vadd.f32 %v2322_v8, %v2321_v26 }
 0x1c1   : > { %v2360_v58 = vadd.f32 %v2359_v45, %v2358_v50 }
 0x1c3   : > { %v2362_v60 = vsel %vm2361_vm11, %v2323_v33, %v2360_v58 }
 0x1c4   : > { %v2364_v12 = vsel %vm2363_vm5, %v2362_v60, 0.0 }
 0x1c5   : > { %2365 = vst [vmem:[%s235_s10] sm:$0xff] %v2364_v12 }
 0x1c6 PF: > { %s16_s18 = sadd.s32 1, %s3407_s18  }
 0x1c7   : > { %p13_p8 = scmp.ge.s32.totalorder %s16_s18, 6  }
 0x1c9   :  { %15 = sbr.rel (!%p13_p8) target bundleno = 1 (0x1), region = 86 }

</bundles_post_ra>
